<compile_context>
chip_gen: v5e
topology: v5e:2x2
jax: 0.10.0
libtpu: 0.0.40
codegen_flags: <defaults>
</compile_context>

<pallas_src>
import functools

import jax
import jax.numpy as jnp
from jax import lax
from jax.experimental import pallas as pl
from jax.experimental.pallas import tpu as pltpu


def _round_up(x, m):
    return ((x + m - 1) // m) * m


def _pick_tile(n, target):
    """Largest multiple-of-8 divisor of n that is <= target (or n itself)."""
    if n <= target:
        return n
    t = (target // 8) * 8
    while t >= 8:
        if n % t == 0:
            return t
        t -= 8
    return n  # full extent is always a legal block size


# ---------------------------------------------------------------------------
# Kernel 1: key / value projections (1x1 convs == channel matmuls).
# ---------------------------------------------------------------------------
def _kv_proj_kernel(x_ref, wk_ref, bk_ref, wv_ref, bv_ref, k_ref, v_ref):
    x = x_ref[0].astype(jnp.bfloat16)                                   # (tn, C)
    k = jnp.dot(x, wk_ref[...], preferred_element_type=jnp.float32) + bk_ref[...]
    v = jnp.dot(x, wv_ref[...], preferred_element_type=jnp.float32) + bv_ref[...]
    k_ref[0] = k.astype(k_ref.dtype)                                    # (tn, Cq_pad)
    v_ref[0] = v.astype(v_ref.dtype)                                    # (tn, C)


# ---------------------------------------------------------------------------
# Kernel 2: flash attention (+ in-kernel q projection + gamma residual).
# ---------------------------------------------------------------------------
def _flash_kernel(gamma_ref, x_ref, wq_ref, bq_ref, k_ref, v_ref, o_ref,
                  q_sc, m_sc, l_sc, acc_sc):
    kv = pl.program_id(2)

    @pl.when(kv == 0)
    def _init():
        xq = x_ref[0].astype(jnp.bfloat16)                              # (tq, C)
        q = jnp.dot(xq, wq_ref[...],
                    preferred_element_type=jnp.float32) + bq_ref[...]   # (tq, Cq_pad)
        q_sc[...] = q.astype(jnp.bfloat16)
        m_sc[...] = jnp.full(m_sc.shape, -jnp.inf, m_sc.dtype)
        l_sc[...] = jnp.zeros(l_sc.shape, l_sc.dtype)
        acc_sc[...] = jnp.zeros(acc_sc.shape, acc_sc.dtype)

    # s[i, j] = <q_i, k_j>, contraction over the zero-padded 128-lane head dim.
    s = lax.dot_general(q_sc[...], k_ref[0],
                        (((1,), (1,)), ((), ())),
                        preferred_element_type=jnp.float32)             # (tq, tk)

    m_prev = m_sc[...]                                                  # (tq, 1)
    m_new = jnp.maximum(m_prev, jnp.max(s, axis=-1, keepdims=True))
    alpha = jnp.exp(m_prev - m_new)
    p = jnp.exp(s - m_new)                                              # (tq, tk) f32
    l_sc[...] = alpha * l_sc[...] + jnp.sum(p, axis=-1, keepdims=True)
    acc_sc[...] = alpha * acc_sc[...] + jnp.dot(
        p.astype(jnp.bfloat16), v_ref[0], preferred_element_type=jnp.float32)
    m_sc[...] = m_new

    @pl.when(kv == pl.num_programs(2) - 1)
    def _finalize():
        inv_l = pl.reciprocal(l_sc[...], approx=True)                   # EUP, ~free
        out = acc_sc[...] * inv_l                                       # (tq, C) f32
        o_ref[0] = (gamma_ref[0] * out + x_ref[0]).astype(o_ref.dtype)


# ---------------------------------------------------------------------------
# Wrapper
# ---------------------------------------------------------------------------
@functools.partial(jax.jit, static_argnames=("tq", "tk"))
def sa_block_pallas(x_nchw, params, *, tq=256, tk=512):
    """x_nchw: (B, C, H, W) float32.  Returns (B, C, H, W)."""
    B, C, H, W = x_nchw.shape
    N = H * W
    Cq = C // 8
    Cq_pad = max(128, _round_up(Cq, 128))
    f32, bf16 = jnp.float32, jnp.bfloat16

    # NCHW -> (B, N, C)
    # TODO(synk): fold these two transposes into the kernels' BlockSpecs (read /
    # write the native (B, C, N) slab) to save two full HBM round trips.
    x_bnc = jnp.transpose(x_nchw.reshape(B, C, N), (0, 2, 1))

    # Weight prep: zero-pad q/k projections to Cq_pad lanes (exact for q @ k^T),
    # cast MXU operands to bf16 (accumulation stays f32 inside the kernels).
    wq = jnp.zeros((C, Cq_pad), f32).at[:, :Cq].set(params["wq"]).astype(bf16)
    wk = jnp.zeros((C, Cq_pad), f32).at[:, :Cq].set(params["wk"]).astype(bf16)
    bq = jnp.zeros((1, Cq_pad), f32).at[:, :Cq].set(params["bq"])
    bk = jnp.zeros((1, Cq_pad), f32).at[:, :Cq].set(params["bk"])
    wv = params["wv"].astype(bf16)
    bv = params["bv"].astype(f32)
    gamma = params["gamma"].astype(f32)

    # -------------------- kernel 1: k / v projections --------------------
    tn = _pick_tile(N, 512)
    proj_need = 2 * (tn * C * 4 + C * Cq_pad * 2 + Cq_pad * 4 + C * C * 2
                     + C * 4 + tn * Cq_pad * 2 + tn * C * 2)
    proj_vmem = int(min(max(proj_need * 2, 16 << 20), 64 << 20))

    k_all, v_all = pl.pallas_call(
        _kv_proj_kernel,
        out_shape=(jax.ShapeDtypeStruct((B, N, Cq_pad), bf16),
                   jax.ShapeDtypeStruct((B, N, C), bf16)),
        grid_spec=pltpu.PrefetchScalarGridSpec(
            num_scalar_prefetch=0,
            grid=(B, N // tn),
            in_specs=[
                pl.BlockSpec((1, tn, C), lambda b, i: (b, i, 0)),       # x
                pl.BlockSpec((C, Cq_pad), lambda b, i: (0, 0)),         # Wk (padded)
                pl.BlockSpec((1, Cq_pad), lambda b, i: (0, 0)),         # bk (padded)
                pl.BlockSpec((C, C), lambda b, i: (0, 0)),              # Wv
                pl.BlockSpec((1, C), lambda b, i: (0, 0)),              # bv
            ],
            out_specs=[
                pl.BlockSpec((1, tn, Cq_pad), lambda b, i: (b, i, 0)),  # k
                pl.BlockSpec((1, tn, C), lambda b, i: (b, i, 0)),       # v
            ],
        ),
        compiler_params=pltpu.CompilerParams(
            dimension_semantics=("parallel", "parallel"),
            vmem_limit_bytes=proj_vmem),
        cost_estimate=pl.CostEstimate(
            flops=2 * B * N * C * (Cq_pad + C),
            transcendentals=0,
            bytes_accessed=B * N * (4 * C + 2 * Cq_pad + 2 * C)
                           + 2 * C * (Cq_pad + C)),
    )(x_bnc, wk, bk, wv, bv)

    # ------------- kernel 2: flash attention + gamma residual -------------
    tq_ = _pick_tile(N, tq)
    tk_ = _pick_tile(N, tk)
    flash_need = (2 * (tq_ * C * 4 + C * Cq_pad * 2 + Cq_pad * 4
                       + tk_ * Cq_pad * 2 + tk_ * C * 2 + tq_ * C * 4)
                  + tq_ * Cq_pad * 2 + 2 * tq_ * 4 + tq_ * C * 4
                  + 3 * tq_ * tk_ * 4)
    flash_vmem = int(min(max(flash_need * 2, 16 << 20), 64 << 20))

    out_bnc = pl.pallas_call(
        _flash_kernel,
        out_shape=jax.ShapeDtypeStruct((B, N, C), x_bnc.dtype),
        grid_spec=pltpu.PrefetchScalarGridSpec(
            num_scalar_prefetch=0,
            grid=(B, N // tq_, N // tk_),
            in_specs=[
                pl.BlockSpec(memory_space=pltpu.SMEM),                          # gamma
                pl.BlockSpec((1, tq_, C), lambda b, qi, ki: (b, qi, 0)),        # x (q tile)
                pl.BlockSpec((C, Cq_pad), lambda b, qi, ki: (0, 0)),            # Wq (padded)
                pl.BlockSpec((1, Cq_pad), lambda b, qi, ki: (0, 0)),            # bq (padded)
                pl.BlockSpec((1, tk_, Cq_pad), lambda b, qi, ki: (b, ki, 0)),   # k tile
                pl.BlockSpec((1, tk_, C), lambda b, qi, ki: (b, ki, 0)),        # v tile
            ],
            out_specs=pl.BlockSpec((1, tq_, C), lambda b, qi, ki: (b, qi, 0)),
            scratch_shapes=[
                pltpu.VMEM((tq_, Cq_pad), bf16),   # q tile (computed at kv==0)
                pltpu.VMEM((tq_, 1), f32),         # running max m
                pltpu.VMEM((tq_, 1), f32),         # running denominator l
                pltpu.VMEM((tq_, C), f32),         # output accumulator
            ],
        ),
        compiler_params=pltpu.CompilerParams(
            dimension_semantics=("parallel", "parallel", "arbitrary"),
            vmem_limit_bytes=flash_vmem),
        cost_estimate=pl.CostEstimate(
            flops=2 * B * (N * C * Cq_pad + N * N * (Cq_pad + C)),
            transcendentals=B * N * N,
            bytes_accessed=B * N * (4 * C + 2 * Cq_pad + 2 * C + 4 * C)
                           + C * Cq_pad * 2 + Cq_pad * 4),
    )(gamma, x_bnc, wq, bq, k_all, v_all)

    # (B, N, C) -> NCHW
    return jnp.transpose(out_bnc, (0, 2, 1)).reshape(B, C, H, W)


def init_params(key, C):
    """Deterministic parameter init matching nn.Conv2d (1x1) shapes."""
    Cq = C // 8
    k1, k2, k3, k4, k5, k6 = jax.random.split(key, 6)
    scale = 1.0 / jnp.sqrt(jnp.float32(C))
    # Conv2d weight (out, in, 1, 1) -> stored pre-transposed as (in, out)
    wq = jax.random.uniform(k1, (C, Cq), jnp.float32, -scale, scale)
    bq = jax.random.uniform(k2, (1, Cq), jnp.float32, -scale, scale)
    wk = jax.random.uniform(k3, (C, Cq), jnp.float32, -scale, scale)
    bk = jax.random.uniform(k4, (1, Cq), jnp.float32, -scale, scale)
    wv = jax.random.uniform(k5, (C, C), jnp.float32, -scale, scale)
    bv = jax.random.uniform(k6, (1, C), jnp.float32, -scale, scale)
    gamma = jnp.ones((1,), jnp.float32)   # torch.ones(1)
    return dict(wq=wq, bq=bq, wk=wk, bk=bk, wv=wv, bv=bv, gamma=gamma)


def sa_block_reference(x_nchw, params):
    """Plain-JAX (f32) reference mirroring the PyTorch forward."""
    B, C, H, W = x_nchw.shape
    N = H * W
    x_bnc = jnp.transpose(x_nchw.reshape(B, C, N), (0, 2, 1))   # (B, N, C)
    q = x_bnc @ params["wq"] + params["bq"]                     # (B, N, Cq)
    k = x_bnc @ params["wk"] + params["bk"]                     # (B, N, Cq)
    v = x_bnc @ params["wv"] + params["bv"]                     # (B, N, C)
    energy = jnp.einsum("bik,bjk->bij", q, k)                   # (B, N, N)
    attn = jax.nn.softmax(energy, axis=-1)
    out = jnp.einsum("bij,bjc->bic", attn, v)                   # (B, N, C)
    out = params["gamma"][0] * out + x_bnc
    return jnp.transpose(out, (0, 2, 1)).reshape(B, C, H, W)


if __name__ == "__main__":
    B, C, H, W = 2, 32, 16, 16          # C must be divisible by 8 (C//8 query dim)
    key = jax.random.PRNGKey(0)
    kx, kp = jax.random.split(key)
    x = jax.random.normal(kx, (B, C, H, W), jnp.float32)
    params = init_params(kp, C)

    ref = sa_block_reference(x, params)

    # Default tiles (single q / kv tile at this size).
    out = jax.block_until_ready(sa_block_pallas(x, params))
    assert out.shape == (B, C, H, W)
    assert jnp.allclose(out, ref, atol=2e-2, rtol=2e-2), "mismatch vs reference"

    # Small tiles: exercises the multi-tile online-softmax (flash) path.
    out_tiled = jax.block_until_ready(sa_block_pallas(x, params, tq=64, tk=64))
    assert jnp.allclose(out_tiled, ref, atol=2e-2, rtol=2e-2), "tiled mismatch"

    print("KERNEL_OK")
</pallas_src>

<mosaic_0001>
module attributes {stable_mosaic.version = 11 : i64} {
  func.func @_kv_proj_kernel(%arg0: i32, %arg1: i32, %arg2: memref<1x256x32xf32, #tpu.memory_space<vmem>>, %arg3: memref<32x128xbf16, #tpu.memory_space<vmem>>, %arg4: memref<1x128xf32, #tpu.memory_space<vmem>>, %arg5: memref<32x32xbf16, #tpu.memory_space<vmem>>, %arg6: memref<1x32xf32, #tpu.memory_space<vmem>>, %arg7: memref<1x256x128xbf16, #tpu.memory_space<vmem>>, %arg8: memref<1x256x32xbf16, #tpu.memory_space<vmem>>) attributes {dimension_semantics = [#tpu.dimension_semantics<parallel>, #tpu.dimension_semantics<parallel>], iteration_bounds = array<i64: 2, 1>, scalar_prefetch = 0 : i64, scratch_operands = 0 : i64, tpu.core_type = #tpu.core_type<tc>, window_params = [{transform_indices = @transform_0, window_bounds = array<i64: 1, 256, 32>}, {pipeline_mode = #tpu.pipeline_mode<synchronous>, transform_indices = @transform_1, window_bounds = array<i64: 32, 128>}, {pipeline_mode = #tpu.pipeline_mode<synchronous>, transform_indices = @transform_2, window_bounds = array<i64: 1, 128>}, {pipeline_mode = #tpu.pipeline_mode<synchronous>, transform_indices = @transform_3, window_bounds = array<i64: 32, 32>}, {pipeline_mode = #tpu.pipeline_mode<synchronous>, transform_indices = @transform_4, window_bounds = array<i64: 1, 32>}, {transform_indices = @transform_5, window_bounds = array<i64: 1, 256, 128>}, {transform_indices = @transform_6, window_bounds = array<i64: 1, 256, 32>}]} {
    %c0 = arith.constant 0 : index
    %c0_0 = arith.constant 0 : index
    %c0_1 = arith.constant 0 : index
    %0 = vector.load %arg2[%c0, %c0_0, %c0_1] : memref<1x256x32xf32, #tpu.memory_space<vmem>>, vector<1x256x32xf32>
    %1 = vector.shape_cast %0 : vector<1x256x32xf32> to vector<256x32xf32>
    %2 = arith.truncf %1 : vector<256x32xf32> to vector<256x32xbf16>
    %c0_2 = arith.constant 0 : index
    %c0_3 = arith.constant 0 : index
    %3 = vector.load %arg3[%c0_2, %c0_3] : memref<32x128xbf16, #tpu.memory_space<vmem>>, vector<32x128xbf16>
    %cst = arith.constant dense<0.000000e+00> : vector<256x128xf32>
    %4 = tpu.matmul %2, %3, %cst {dimension_numbers = #tpu.dot_dimension_numbers<[1], [0], [0], [1], [0, 0, 1, 1], [], []>} : vector<256x32xbf16>, vector<32x128xbf16>, vector<256x128xf32> -> vector<256x128xf32>
    %c0_4 = arith.constant 0 : index
    %c0_5 = arith.constant 0 : index
    %5 = vector.load %arg4[%c0_4, %c0_5] : memref<1x128xf32, #tpu.memory_space<vmem>>, vector<1x128xf32>
    %6 = vector.broadcast %5 : vector<1x128xf32> to vector<256x128xf32>
    %7 = arith.addf %4, %6 : vector<256x128xf32>
    %c0_6 = arith.constant 0 : index
    %c0_7 = arith.constant 0 : index
    %8 = vector.load %arg5[%c0_6, %c0_7] : memref<32x32xbf16, #tpu.memory_space<vmem>>, vector<32x32xbf16>
    %cst_8 = arith.constant dense<0.000000e+00> : vector<256x32xf32>
    %9 = tpu.matmul %2, %8, %cst_8 {dimension_numbers = #tpu.dot_dimension_numbers<[1], [0], [0], [1], [0, 0, 1, 1], [], []>} : vector<256x32xbf16>, vector<32x32xbf16>, vector<256x32xf32> -> vector<256x32xf32>
    %c0_9 = arith.constant 0 : index
    %c0_10 = arith.constant 0 : index
    %10 = vector.load %arg6[%c0_9, %c0_10] : memref<1x32xf32, #tpu.memory_space<vmem>>, vector<1x32xf32>
    %11 = vector.broadcast %10 : vector<1x32xf32> to vector<256x32xf32>
    %12 = arith.addf %9, %11 : vector<256x32xf32>
    %13 = arith.truncf %7 : vector<256x128xf32> to vector<256x128xbf16>
    %c0_11 = arith.constant 0 : index
    %c0_12 = arith.constant 0 : index
    %c0_13 = arith.constant 0 : index
    %14 = vector.load %arg7[%c0_11, %c0_12, %c0_13] : memref<1x256x128xbf16, #tpu.memory_space<vmem>>, vector<1x256x128xbf16>
    %15 = vector.shape_cast %14 : vector<1x256x128xbf16> to vector<256x128xbf16>
    %16 = vector.shape_cast %13 : vector<256x128xbf16> to vector<1x256x128xbf16>
    tpu.vector_store %arg7[%c0_11, %c0_12, %c0_13], %16 {strides = array<i32>} : memref<1x256x128xbf16, #tpu.memory_space<vmem>>, vector<1x256x128xbf16>,
    %17 = arith.truncf %12 : vector<256x32xf32> to vector<256x32xbf16>
    %c0_14 = arith.constant 0 : index
    %c0_15 = arith.constant 0 : index
    %c0_16 = arith.constant 0 : index
    %18 = vector.load %arg8[%c0_14, %c0_15, %c0_16] : memref<1x256x32xbf16, #tpu.memory_space<vmem>>, vector<1x256x32xbf16>
    %19 = vector.shape_cast %18 : vector<1x256x32xbf16> to vector<256x32xbf16>
    %20 = vector.shape_cast %17 : vector<256x32xbf16> to vector<1x256x32xbf16>
    tpu.vector_store %arg8[%c0_14, %c0_15, %c0_16], %20 {strides = array<i32>} : memref<1x256x32xbf16, #tpu.memory_space<vmem>>, vector<1x256x32xbf16>,
    return
  }
  func.func @transform_0(%arg0: i32, %arg1: i32) -> (i32, i32, i32) {
    %c0_i32 = arith.constant 0 : i32
    %c0_i32_0 = arith.constant 0 : i32
    return %arg0, %arg1, %c0_i32 : i32, i32, i32
  }
  func.func @transform_1(%arg0: i32, %arg1: i32) -> (i32, i32) {
    %c0_i32 = arith.constant 0 : i32
    %c0_i32_0 = arith.constant 0 : i32
    %c0_i32_1 = arith.constant 0 : i32
    return %c0_i32, %c0_i32_0 : i32, i32
  }
  func.func @transform_2(%arg0: i32, %arg1: i32) -> (i32, i32) {
    %c0_i32 = arith.constant 0 : i32
    %c0_i32_0 = arith.constant 0 : i32
    %c0_i32_1 = arith.constant 0 : i32
    return %c0_i32, %c0_i32_0 : i32, i32
  }
  func.func @transform_3(%arg0: i32, %arg1: i32) -> (i32, i32) {
    %c0_i32 = arith.constant 0 : i32
    %c0_i32_0 = arith.constant 0 : i32
    %c0_i32_1 = arith.constant 0 : i32
    return %c0_i32, %c0_i32_0 : i32, i32
  }
  func.func @transform_4(%arg0: i32, %arg1: i32) -> (i32, i32) {
    %c0_i32 = arith.constant 0 : i32
    %c0_i32_0 = arith.constant 0 : i32
    %c0_i32_1 = arith.constant 0 : i32
    return %c0_i32, %c0_i32_0 : i32, i32
  }
  func.func @transform_5(%arg0: i32, %arg1: i32) -> (i32, i32, i32) {
    %c0_i32 = arith.constant 0 : i32
    %c0_i32_0 = arith.constant 0 : i32
    return %arg0, %arg1, %c0_i32 : i32, i32, i32
  }
  func.func @transform_6(%arg0: i32, %arg1: i32) -> (i32, i32, i32) {
    %c0_i32 = arith.constant 0 : i32
    %c0_i32_0 = arith.constant 0 : i32
    return %arg0, %arg1, %c0_i32 : i32, i32, i32
  }
}

module attributes {stable_mosaic.version = 11 : i64} {
  func.func @_flash_kernel(%arg0: i32, %arg1: i32, %arg2: i32, %arg3: memref<1xf32, #tpu.memory_space<smem>>, %arg4: memref<1x256x32xf32, #tpu.memory_space<vmem>>, %arg5: memref<32x128xbf16, #tpu.memory_space<vmem>>, %arg6: memref<1x128xf32, #tpu.memory_space<vmem>>, %arg7: memref<1x256x128xbf16, #tpu.memory_space<vmem>>, %arg8: memref<1x256x32xbf16, #tpu.memory_space<vmem>>, %arg9: memref<1x256x32xf32, #tpu.memory_space<vmem>>, %arg10: memref<256x128xbf16, #tpu.memory_space<vmem>>, %arg11: memref<256x1xf32, #tpu.memory_space<vmem>>, %arg12: memref<256x1xf32, #tpu.memory_space<vmem>>, %arg13: memref<256x32xf32, #tpu.memory_space<vmem>>) attributes {dimension_semantics = [#tpu.dimension_semantics<parallel>, #tpu.dimension_semantics<parallel>, #tpu.dimension_semantics<arbitrary>], iteration_bounds = array<i64: 2, 1, 1>, scalar_prefetch = 0 : i64, scratch_operands = 4 : i64, tpu.core_type = #tpu.core_type<tc>, window_params = [{transform_indices = @transform_0, window_bounds = array<i64: 1>}, {transform_indices = @transform_1, window_bounds = array<i64: 1, 256, 32>}, {pipeline_mode = #tpu.pipeline_mode<synchronous>, transform_indices = @transform_2, window_bounds = array<i64: 32, 128>}, {pipeline_mode = #tpu.pipeline_mode<synchronous>, transform_indices = @transform_3, window_bounds = array<i64: 1, 128>}, {transform_indices = @transform_4, window_bounds = array<i64: 1, 256, 128>}, {transform_indices = @transform_5, window_bounds = array<i64: 1, 256, 32>}, {transform_indices = @transform_6, window_bounds = array<i64: 1, 256, 32>}]} {
    %c0_i32 = arith.constant 0 : i32
    %0 = arith.cmpi eq, %arg2, %c0_i32 : i32
    %1 = arith.extui %0 : i1 to i32
    %c0_i32_0 = arith.constant 0 : i32
    %2 = arith.cmpi ne, %1, %c0_i32_0 : i32
    scf.if %2 {
      %c0_25 = arith.constant 0 : index
      %c0_26 = arith.constant 0 : index
      %c0_27 = arith.constant 0 : index
      %35 = vector.load %arg4[%c0_25, %c0_26, %c0_27] : memref<1x256x32xf32, #tpu.memory_space<vmem>>, vector<1x256x32xf32>
      %36 = vector.shape_cast %35 : vector<1x256x32xf32> to vector<256x32xf32>
      %37 = arith.truncf %36 : vector<256x32xf32> to vector<256x32xbf16>
      %c0_28 = arith.constant 0 : index
      %c0_29 = arith.constant 0 : index
      %38 = vector.load %arg5[%c0_28, %c0_29] : memref<32x128xbf16, #tpu.memory_space<vmem>>, vector<32x128xbf16>
      %cst_30 = arith.constant dense<0.000000e+00> : vector<256x128xf32>
      %39 = tpu.matmul %37, %38, %cst_30 {dimension_numbers = #tpu.dot_dimension_numbers<[1], [0], [0], [1], [0, 0, 1, 1], [], []>} : vector<256x32xbf16>, vector<32x128xbf16>, vector<256x128xf32> -> vector<256x128xf32>
      %c0_31 = arith.constant 0 : index
      %c0_32 = arith.constant 0 : index
      %40 = vector.load %arg6[%c0_31, %c0_32] : memref<1x128xf32, #tpu.memory_space<vmem>>, vector<1x128xf32>
      %41 = vector.broadcast %40 : vector<1x128xf32> to vector<256x128xf32>
      %42 = arith.addf %39, %41 : vector<256x128xf32>
      %43 = arith.truncf %42 : vector<256x128xf32> to vector<256x128xbf16>
      %c0_33 = arith.constant 0 : index
      %c0_34 = arith.constant 0 : index
      %44 = vector.load %arg10[%c0_33, %c0_34] : memref<256x128xbf16, #tpu.memory_space<vmem>>, vector<256x128xbf16>
      tpu.vector_store %arg10[%c0_33, %c0_34], %43 {strides = array<i32>} : memref<256x128xbf16, #tpu.memory_space<vmem>>, vector<256x128xbf16>,
      %cst_35 = arith.constant 0xFF800000 : f32
      %45 = vector.broadcast %cst_35 : f32 to vector<256x1xf32>
      %c0_36 = arith.constant 0 : index
      %c0_37 = arith.constant 0 : index
      %46 = vector.load %arg11[%c0_36, %c0_37] : memref<256x1xf32, #tpu.memory_space<vmem>>, vector<256x1xf32>
      tpu.vector_store %arg11[%c0_36, %c0_37], %45 {strides = array<i32>} : memref<256x1xf32, #tpu.memory_space<vmem>>, vector<256x1xf32>,
      %cst_38 = arith.constant 0.000000e+00 : f32
      %47 = vector.broadcast %cst_38 : f32 to vector<256x1xf32>
      %c0_39 = arith.constant 0 : index
      %c0_40 = arith.constant 0 : index
      %48 = vector.load %arg12[%c0_39, %c0_40] : memref<256x1xf32, #tpu.memory_space<vmem>>, vector<256x1xf32>
      tpu.vector_store %arg12[%c0_39, %c0_40], %47 {strides = array<i32>} : memref<256x1xf32, #tpu.memory_space<vmem>>, vector<256x1xf32>,
      %cst_41 = arith.constant 0.000000e+00 : f32
      %49 = vector.broadcast %cst_41 : f32 to vector<256x32xf32>
      %c0_42 = arith.constant 0 : index
      %c0_43 = arith.constant 0 : index
      %50 = vector.load %arg13[%c0_42, %c0_43] : memref<256x32xf32, #tpu.memory_space<vmem>>, vector<256x32xf32>
      tpu.vector_store %arg13[%c0_42, %c0_43], %49 {strides = array<i32>} : memref<256x32xf32, #tpu.memory_space<vmem>>, vector<256x32xf32>,
    } else {
    }
    %c0 = arith.constant 0 : index
    %c0_1 = arith.constant 0 : index
    %3 = vector.load %arg10[%c0, %c0_1] : memref<256x128xbf16, #tpu.memory_space<vmem>>, vector<256x128xbf16>
    %c0_2 = arith.constant 0 : index
    %c0_3 = arith.constant 0 : index
    %c0_4 = arith.constant 0 : index
    %4 = vector.load %arg7[%c0_2, %c0_3, %c0_4] : memref<1x256x128xbf16, #tpu.memory_space<vmem>>, vector<1x256x128xbf16>
    %5 = vector.shape_cast %4 : vector<1x256x128xbf16> to vector<256x128xbf16>
    %cst = arith.constant dense<0.000000e+00> : vector<256x256xf32>
    %6 = tpu.matmul %3, %5, %cst {dimension_numbers = #tpu.dot_dimension_numbers<[1], [1], [0], [0], [0, 0, 1, 0], [], []>} : vector<256x128xbf16>, vector<256x128xbf16>, vector<256x256xf32> -> vector<256x256xf32>
    %c0_5 = arith.constant 0 : index
    %c0_6 = arith.constant 0 : index
    %7 = vector.load %arg11[%c0_5, %c0_6] : memref<256x1xf32, #tpu.memory_space<vmem>>, vector<256x1xf32>
    %cst_7 = arith.constant dense<0xFF800000> : vector<256xf32>
    %8 = vector.multi_reduction <maximumf>, %6, %cst_7 [1] : vector<256x256xf32> to vector<256xf32>
    %9 = vector.shape_cast %8 : vector<256xf32> to vector<256x1xf32>
    %10 = arith.maximumf %7, %9 : vector<256x1xf32>
    %11 = arith.subf %7, %10 : vector<256x1xf32>
    %12 = math.exp %11 : vector<256x1xf32>
    %13 = vector.broadcast %10 : vector<256x1xf32> to vector<256x256xf32>
    %14 = arith.subf %6, %13 : vector<256x256xf32>
    %15 = math.exp %14 : vector<256x256xf32>
    %c0_8 = arith.constant 0 : index
    %c0_9 = arith.constant 0 : index
    %16 = vector.load %arg12[%c0_8, %c0_9] : memref<256x1xf32, #tpu.memory_space<vmem>>, vector<256x1xf32>
    %17 = arith.mulf %12, %16 : vector<256x1xf32>
    %cst_10 = arith.constant dense<0.000000e+00> : vector<256xf32>
    %18 = vector.multi_reduction <add>, %15, %cst_10 [1] : vector<256x256xf32> to vector<256xf32>
    %19 = vector.shape_cast %18 : vector<256xf32> to vector<256x1xf32>
    %20 = arith.addf %17, %19 : vector<256x1xf32>
    %c0_11 = arith.constant 0 : index
    %c0_12 = arith.constant 0 : index
    %21 = vector.load %arg12[%c0_11, %c0_12] : memref<256x1xf32, #tpu.memory_space<vmem>>, vector<256x1xf32>
    tpu.vector_store %arg12[%c0_11, %c0_12], %20 {strides = array<i32>} : memref<256x1xf32, #tpu.memory_space<vmem>>, vector<256x1xf32>,
    %c0_13 = arith.constant 0 : index
    %c0_14 = arith.constant 0 : index
    %22 = vector.load %arg13[%c0_13, %c0_14] : memref<256x32xf32, #tpu.memory_space<vmem>>, vector<256x32xf32>
    %23 = vector.broadcast %12 : vector<256x1xf32> to vector<256x32xf32>
    %24 = arith.mulf %23, %22 : vector<256x32xf32>
    %25 = arith.truncf %15 : vector<256x256xf32> to vector<256x256xbf16>
    %c0_15 = arith.constant 0 : index
    %c0_16 = arith.constant 0 : index
    %c0_17 = arith.constant 0 : index
    %26 = vector.load %arg8[%c0_15, %c0_16, %c0_17] : memref<1x256x32xbf16, #tpu.memory_space<vmem>>, vector<1x256x32xbf16>
    %27 = vector.shape_cast %26 : vector<1x256x32xbf16> to vector<256x32xbf16>
    %cst_18 = arith.constant dense<0.000000e+00> : vector<256x32xf32>
    %28 = tpu.matmul %25, %27, %cst_18 {dimension_numbers = #tpu.dot_dimension_numbers<[1], [0], [0], [1], [0, 0, 1, 1], [], []>} : vector<256x256xbf16>, vector<256x32xbf16>, vector<256x32xf32> -> vector<256x32xf32>
    %29 = arith.addf %24, %28 : vector<256x32xf32>
    %c0_19 = arith.constant 0 : index
    %c0_20 = arith.constant 0 : index
    %30 = vector.load %arg13[%c0_19, %c0_20] : memref<256x32xf32, #tpu.memory_space<vmem>>, vector<256x32xf32>
    tpu.vector_store %arg13[%c0_19, %c0_20], %29 {strides = array<i32>} : memref<256x32xf32, #tpu.memory_space<vmem>>, vector<256x32xf32>,
    %c0_21 = arith.constant 0 : index
    %c0_22 = arith.constant 0 : index
    %31 = vector.load %arg11[%c0_21, %c0_22] : memref<256x1xf32, #tpu.memory_space<vmem>>, vector<256x1xf32>
    tpu.vector_store %arg11[%c0_21, %c0_22], %10 {strides = array<i32>} : memref<256x1xf32, #tpu.memory_space<vmem>>, vector<256x1xf32>,
    %c0_i32_23 = arith.constant 0 : i32
    %32 = arith.cmpi eq, %arg2, %c0_i32_23 : i32
    %33 = arith.extui %32 : i1 to i32
    %c0_i32_24 = arith.constant 0 : i32
    %34 = arith.cmpi ne, %33, %c0_i32_24 : i32
    scf.if %34 {
      %c0_25 = arith.constant 0 : index
      %c0_26 = arith.constant 0 : index
      %35 = vector.load %arg12[%c0_25, %c0_26] : memref<256x1xf32, #tpu.memory_space<vmem>>, vector<256x1xf32>
      %36 = tpu.reciprocal %35 {approx = true} : vector<256x1xf32> -> vector<256x1xf32>
      %c0_27 = arith.constant 0 : index
      %c0_28 = arith.constant 0 : index
      %37 = vector.load %arg13[%c0_27, %c0_28] : memref<256x32xf32, #tpu.memory_space<vmem>>, vector<256x32xf32>
      %38 = vector.broadcast %36 : vector<256x1xf32> to vector<256x32xf32>
      %39 = arith.mulf %37, %38 : vector<256x32xf32>
      %c0_29 = arith.constant 0 : index
      %40 = memref.load %arg3[%c0_29] : memref<1xf32, #tpu.memory_space<smem>>
      %41 = vector.broadcast %40 : f32 to vector<256x32xf32>
      %42 = arith.mulf %41, %39 : vector<256x32xf32>
      %c0_30 = arith.constant 0 : index
      %c0_31 = arith.constant 0 : index
      %c0_32 = arith.constant 0 : index
      %43 = vector.load %arg4[%c0_30, %c0_31, %c0_32] : memref<1x256x32xf32, #tpu.memory_space<vmem>>, vector<1x256x32xf32>
      %44 = vector.shape_cast %43 : vector<1x256x32xf32> to vector<256x32xf32>
      %45 = arith.addf %42, %44 : vector<256x32xf32>
      %c0_33 = arith.constant 0 : index
      %c0_34 = arith.constant 0 : index
      %c0_35 = arith.constant 0 : index
      %46 = vector.load %arg9[%c0_33, %c0_34, %c0_35] : memref<1x256x32xf32, #tpu.memory_space<vmem>>, vector<1x256x32xf32>
      %47 = vector.shape_cast %46 : vector<1x256x32xf32> to vector<256x32xf32>
      %48 = vector.shape_cast %45 : vector<256x32xf32> to vector<1x256x32xf32>
      tpu.vector_store %arg9[%c0_33, %c0_34, %c0_35], %48 {strides = array<i32>} : memref<1x256x32xf32, #tpu.memory_space<vmem>>, vector<1x256x32xf32>,
    } else {
    }
    return
  }
  func.func @transform_0(%arg0: i32, %arg1: i32, %arg2: i32) -> i32 {
    %c0_i32 = arith.constant 0 : i32
    %c0_i32_0 = arith.constant 0 : i32
    return %c0_i32 : i32
  }
  func.func @transform_1(%arg0: i32, %arg1: i32, %arg2: i32) -> (i32, i32, i32) {
    %c0_i32 = arith.constant 0 : i32
    %c0_i32_0 = arith.constant 0 : i32
    return %arg0, %arg1, %c0_i32 : i32, i32, i32
  }
  func.func @transform_2(%arg0: i32, %arg1: i32, %arg2: i32) -> (i32, i32) {
    %c0_i32 = arith.constant 0 : i32
    %c0_i32_0 = arith.constant 0 : i32
    %c0_i32_1 = arith.constant 0 : i32
    return %c0_i32, %c0_i32_0 : i32, i32
  }
  func.func @transform_3(%arg0: i32, %arg1: i32, %arg2: i32) -> (i32, i32) {
    %c0_i32 = arith.constant 0 : i32
    %c0_i32_0 = arith.constant 0 : i32
    %c0_i32_1 = arith.constant 0 : i32
    return %c0_i32, %c0_i32_0 : i32, i32
  }
  func.func @transform_4(%arg0: i32, %arg1: i32, %arg2: i32) -> (i32, i32, i32) {
    %c0_i32 = arith.constant 0 : i32
    %c0_i32_0 = arith.constant 0 : i32
    return %arg0, %arg2, %c0_i32 : i32, i32, i32
  }
  func.func @transform_5(%arg0: i32, %arg1: i32, %arg2: i32) -> (i32, i32, i32) {
    %c0_i32 = arith.constant 0 : i32
    %c0_i32_0 = arith.constant 0 : i32
    return %arg0, %arg2, %c0_i32 : i32, i32, i32
  }
  func.func @transform_6(%arg0: i32, %arg1: i32, %arg2: i32) -> (i32, i32, i32) {
    %c0_i32 = arith.constant 0 : i32
    %c0_i32_0 = arith.constant 0 : i32
    return %arg0, %arg1, %c0_i32 : i32, i32, i32
  }
}

</mosaic_0001>

<bundles_post_ra>
// kernel: sa_block_pallas.2
= control target key start
LH: loop header
LB: loop body
LE: loop exit
PB: predicated region body
PF: predicated region fallthrough
CT: control target
= control target key end

     0   :  { %12 = vsyncpa [#allocation3], 0  ;;  %s1590_s0 = inlined_call_operand.hbm [shape: f32[2,256,32], index: 0, kind: input, shape index: {}]   ;;  %s1591_s1 = inlined_call_operand.vmem [shape: bf16[32,128], index: 1, kind: input, shape index: {}]   ;;  %s1592_s2 = inlined_call_operand.vmem [shape: f32[1,128], index: 2, kind: input, shape index: {}]   ;;  %s1593_s3 = inlined_call_operand.vmem [shape: bf16[32,32], index: 3, kind: input, shape index: {}]   ;;  %s1594_s4 = inlined_call_operand.vmem [shape: f32[1,32], index: 4, kind: input, shape index: {}]   ;;  %s1595_s5 = inlined_call_operand.vmem [shape: bf16[2,256,128], index: 5, kind: output, shape index: {0}]   ;;  %s1596_s6 = inlined_call_operand.vmem [shape: bf16[2,256,32], index: 6, kind: output, shape index: {1}]  }
   0x1   :  { %14 = vsyncpa [#allocation3 + $0x1], 0  ;;  %s1263_s21 = smov 0   ;;  %s1265_s22 = smov 0  }
   0x2   :  { %s1267_s23 = smov 0   ;;  %s1269_s24 = smov 0  }
   0x3   :  { %s1271_s25 = smov 0   ;;  %s1273_s26 = smov 0  }
   0x4 LB: > { %s916_s27 = sadd.s32 4294967295, %s1224_s26   ;;  %s32_s28 = sadd.s32 1, %s1220_s25  ;;  %s1224_s26 = sphi %s1273_s26, %s20_s26   ;;  %s1220_s25 = sphi %s1271_s25, %s1603_s25   ;;  %s1216_s24 = sphi %s1269_s24, %s1602_s24   ;;  %s1212_s23 = sphi %s1267_s23, %s1601_s23   ;;  %s1208_s22 = sphi %s1265_s22, %s1600_s22   ;;  %s1204_s21 = sphi %s1263_s21, %s1599_s21  }
   0x5   : > { %p34_p0 = scmp.ge.s32.totalorder %s32_s28, 2  ;;  %s41_s29 = sadd.s32 1, %s1212_s23 }
   0x6   : > { %p48_p1 = scmp.ne.s32.totalorder %s1212_s23, %s1208_s22  ;;  %p49_p2 = scmp.eq.s32.totalorder %s1224_s26, 0 }
   0x7   : > { %s1605_s28 = smov (%p34_p0, %s32_s28), 0  ;;  %p54_p4 = scmp.ne.s32.totalorder %s1208_s22, %s1204_s21 }
   0x8   : > { %p1299_p3 = por %p49_p2, %p48_p1  ;;  %s36_s7 = ssub.s32 %s1220_s25, %s1605_s28 }
   0x9   : > { %p55_p5 = scmp.eq.s32.totalorder %s916_s27, 0  ;;  %p39_p6 = scmp.eq.s32.totalorder %s36_s7, 0 }
   0xa   : > { %p1091_p8 = scmp.lt.s32.totalorder %s1224_s26, 2  ;;  %s230_s10 = sand.u32 1, %s1212_s23  }
   0xb   : > { %p1306_p7 = por %p55_p5, %p54_p4  ;;  %s979_s11 = sshll.u32 %s1220_s25, 8 }
   0xc   : > { %s1312_s9 = scalar_select %p39_p6, %s1212_s23, %s41_s29  }
   0xd   : > { %s920_s12 = sshll.u32 %s230_s10, 8  ;;  %s241_s15 = scalar_lea.hbm %s1590_s0, %s979_s11 }
   0xe   : > { %s242_s16 = sshll.u32 %s241_s15, 4  ;;  %s234_s17 = scalar_lea.vmem [#allocation2], %s920_s12  ;;  %s243_s16 = int_to_ptr.hbm [resolvable:$true] %s242_s16 }
   0xf   : > { %s244_s18 = sshll.u32 %s234_s17, 4  ;;  %p1088_p9 = pnand %p1091_p8, %p1299_p3  ;;  %s245_s18 = int_to_ptr.vmem [resolvable:$true] %s244_s18 }
  0x10   : > { %p923_p10 = scmp.ge.s32.totalorder %s1224_s26, 1  ;;  %p252_p11 = scmp.lt.s32.totalorder %s1224_s26, 3 }
  0x11   : > { %s231_s19 = scalar_lea.sflag [#allocation3], %s230_s10  ;;  %s1226_s20 = smov 128  }
  0x12   : > { %s1227_s21 = smov 8   ;;  %p253_p12 = pnand %p923_p10, %p252_p11 }
  0x13   : > { %1090 = dma.hbm_to_vmem [thread:$0]  (!%p1088_p9), %s243_s16, 4096, %s245_s18, %s231_s19, %s1226_s20, %s1226_s20, %s1227_s21  }
  0x14   : > { %256 = sbr.rel (%p253_p12) target bundleno = 292 (0x124), region = 40  ;;  %s258_s27 = sand.u32 (!%p253_p12), 1, %s1208_s22  }
  0x15   : > { %s924_s29 = sshll.u32 (!%p253_p12), %s258_s27, 8  ;;  %s259_s7 = scalar_lea.sflag (!%p253_p12), [#allocation3], %s258_s27 }
  0x16   : > { %s1324_s11 = scalar_lea.vmem (!%p253_p12), [#allocation2], %s924_s29 }
  0x19   : > { %1199 = dma.done.wait (%p1306_p7), %s259_s7, 4096  }
  0x1a   : > { %1201 = vsyncadd (%p1306_p7), %s259_s7, 4294963200  ;;  %v983_v0 = vld [vmem:[%s1591_s1 + $0x8] sm:$0xff]  ;;  %v982_v2 = vld [vmem:[%s1591_s1] sm:$0xff]  ;;  %vm395_vm0 = vcmask 261120   ;;  %p307_p13 = scmp.lt.s32.totalorder %s1216_s24, 1  ;;  %vm738_vm1 = vcmask 257024  }
  0x1b   : > { %v985_v1 = vld [vmem:[%s1593_s3 + $0x8] sm:$0xff]  ;;  %v327_v3 = vld [vmem:[%s1324_s11] sm:$0xff]  ;;  %450 = vmatpush.bf16.msra.mxu0 %v983_v0  ;;  %1081 = vmatpush.bf16.msra.mxu2 %v983_v0  ;;  %v329_v10 = vld [vmem:[%s1324_s11 + $0x10] sm:$0xff] }
  0x1c   : > { %v328_v4 = vld [vmem:[%s1324_s11 + $0x8] sm:$0xff]  ;;  %v343_v5 = vld [vmem:[%s1324_s11 + $0x80] sm:$0xff]  ;;  %559 = vmatpush.bf16.msra.mxu1 %v985_v1  ;;  %1083 = vmatpush.bf16.msra.mxu3 %v985_v1  ;;  %v330_v11 = vld [vmem:[%s1324_s11 + $0x18] sm:$0xff]  ;;  %s1607_s24 = smov (!%p307_p13, %s1216_s24), 1 }
  0x1d   : > { %v344_v6 = vld [vmem:[%s1324_s11 + $0x88] sm:$0xff]  ;;  %v984_v7 = vld [vmem:[%s1593_s3] sm:$0xff]  ;;  %v359_v8 = vpack.c.bf16 %v328_v4, %v327_v3  ;;  %v345_v12 = vld [vmem:[%s1324_s11 + $0x90] sm:$0xff]  ;;  %v360_v14 = vpack.c.bf16 %v330_v11, %v329_v10  ;;  %s980_s19 = sshll.u32 %s1607_s24, 7 }
  0x1e   : > { %v367_v9 = vpack.c.bf16 %v344_v6, %v343_v5  ;;  %v346_v13 = vld [vmem:[%s1324_s11 + $0x98] sm:$0xff]  ;;  %v331_v16 = vld [vmem:[%s1324_s11 + $0x20] sm:$0xff]  ;;  %v332_v17 = vld [vmem:[%s1324_s11 + $0x28] sm:$0xff]  ;;  %s1417_s27 = scalar_lea.vmem %s1596_s6, %s980_s19  ;;  %s1432_s30 = scalar_lea.vmem %s1595_s5, %s980_s19 }
  0x1f   : > { %451 = vmatpush.bf16.msra.mxu0 %v982_v2  ;;  %1082 = vmatpush.bf16.msra.mxu2 %v982_v2  ;;  %v368_v15 = vpack.c.bf16 %v346_v13, %v345_v12  ;;  %v347_v18 = vld [vmem:[%s1324_s11 + $0xa0] sm:$0xff]  ;;  %v348_v19 = vld [vmem:[%s1324_s11 + $0xa8] sm:$0xff]  ;;  %v361_v20 = vpack.c.bf16 %v332_v17, %v331_v16  ;;  %v333_v22 = vld [vmem:[%s1324_s11 + $0x30] sm:$0xff] }
  0x20   : > { %560 = vmatpush.bf16.msra.mxu1 %v984_v7  ;;  %1084 = vmatpush.bf16.msra.mxu3 %v984_v7  ;;  %v369_v21 = vpack.c.bf16 %v348_v19, %v347_v18  ;;  %v334_v23 = vld [vmem:[%s1324_s11 + $0x38] sm:$0xff]  ;;  %v349_v24 = vld [vmem:[%s1324_s11 + $0xb0] sm:$0xff]  ;;  %v335_v28 = vld [vmem:[%s1324_s11 + $0x40] sm:$0xff] }
  0x21   : > { %v350_v25 = vld [vmem:[%s1324_s11 + $0xb8] sm:$0xff]  ;;  %v362_v26 = vpack.c.bf16 %v334_v23, %v333_v22  ;;  %v336_v29 = vld [vmem:[%s1324_s11 + $0x48] sm:$0xff]  ;;  %v351_v30 = vld [vmem:[%s1324_s11 + $0xc0] sm:$0xff] }
  0x22   : > { %937 = vmatmul.msk.bf16.vlgmr.msra.gmra.mxu0 %vm395_vm0, %v359_v8  ;;  %945 = vmatmul.msk.bf16.vlgmr.msra.gmra.mxu2 %vm395_vm0, %v367_v9  ;;  %v370_v27 = vpack.c.bf16 %v350_v25, %v349_v24  ;;  %v352_v31 = vld [vmem:[%s1324_s11 + $0xc8] sm:$0xff]  ;;  %v363_v32 = vpack.c.bf16 %v336_v29, %v335_v28  ;;  %v337_v34 = vld [vmem:[%s1324_s11 + $0x50] sm:$0xff]  ;;  %v338_v35 = vld [vmem:[%s1324_s11 + $0x58] sm:$0xff] }
  0x23   : > { %961 = vmatmul.msk.bf16.vlgmr.msra.gmra.mxu1 %vm395_vm0, %v359_v8  ;;  %969 = vmatmul.msk.bf16.vlgmr.msra.gmra.mxu3 %vm395_vm0, %v367_v9  ;;  %v371_v33 = vpack.c.bf16 %v352_v31, %v351_v30  ;;  %v353_v36 = vld [vmem:[%s1324_s11 + $0xd0] sm:$0xff]  ;;  %v354_v37 = vld [vmem:[%s1324_s11 + $0xd8] sm:$0xff]  ;;  %v364_v38 = vpack.c.bf16 %v338_v35, %v337_v34  ;;  %v339_v40 = vld [vmem:[%s1324_s11 + $0x60] sm:$0xff] }
  0x24   : > { %v372_v39 = vpack.c.bf16 %v354_v37, %v353_v36  ;;  %v340_v41 = vld [vmem:[%s1324_s11 + $0x68] sm:$0xff]  ;;  %v355_v42 = vld [vmem:[%s1324_s11 + $0xe0] sm:$0xff]  ;;  %v341_v46 = vld [vmem:[%s1324_s11 + $0x70] sm:$0xff] }
  0x25   : > { %v356_v43 = vld [vmem:[%s1324_s11 + $0xe8] sm:$0xff]  ;;  %v365_v44 = vpack.c.bf16 %v340_v41, %v339_v40  ;;  %v342_v47 = vld [vmem:[%s1324_s11 + $0x78] sm:$0xff]  ;;  %v357_v48 = vld [vmem:[%s1324_s11 + $0xf0] sm:$0xff] }
  0x26   : > { %v373_v45 = vpack.c.bf16 %v356_v43, %v355_v42  ;;  %v358_v49 = vld [vmem:[%s1324_s11 + $0xf8] sm:$0xff]  ;;  %v366_v50 = vpack.c.bf16 %v342_v47, %v341_v46  ;;  %v1411_v52 = vld [vmem:[%s1594_s4] ss:$0 sm:$0xff] }
  0x27   : > { %v374_v51 = vpack.c.bf16 %v358_v49, %v357_v48  ;;  %v1422_v57 = vld [vmem:[%s1592_s2] ss:$0 sm:$0xff] }
  0x32   : > { %938 = vmatmul.msk.bf16.gmra.mxu0 %vm395_vm0, %v360_v14  ;;  %946 = vmatmul.msk.bf16.gmra.mxu2 %vm395_vm0, %v368_v15 }
  0x33   : > { %962 = vmatmul.msk.bf16.gmra.mxu1 %vm395_vm0, %v360_v14  ;;  %970 = vmatmul.msk.bf16.gmra.mxu3 %vm395_vm0, %v368_v15 }
  0x42   : > { %939 = vmatmul.msk.bf16.gmra.mxu0 %vm395_vm0, %v361_v20  ;;  %947 = vmatmul.msk.bf16.gmra.mxu2 %vm395_vm0, %v369_v21 }
  0x43   : > { %963 = vmatmul.msk.bf16.gmra.mxu1 %vm395_vm0, %v361_v20  ;;  %971 = vmatmul.msk.bf16.gmra.mxu3 %vm395_vm0, %v369_v21 }
  0x52   : > { %940 = vmatmul.msk.bf16.gmra.mxu0 %vm395_vm0, %v362_v26  ;;  %948 = vmatmul.msk.bf16.gmra.mxu2 %vm395_vm0, %v370_v27 }
  0x53   : > { %964 = vmatmul.msk.bf16.gmra.mxu1 %vm395_vm0, %v362_v26  ;;  %972 = vmatmul.msk.bf16.gmra.mxu3 %vm395_vm0, %v370_v27 }
  0x62   : > { %941 = vmatmul.msk.bf16.gmra.mxu0 %vm395_vm0, %v363_v32  ;;  %949 = vmatmul.msk.bf16.gmra.mxu2 %vm395_vm0, %v371_v33 }
  0x63   : > { %965 = vmatmul.msk.bf16.gmra.mxu1 %vm395_vm0, %v363_v32  ;;  %973 = vmatmul.msk.bf16.gmra.mxu3 %vm395_vm0, %v371_v33 }
  0x72   : > { %942 = vmatmul.msk.bf16.gmra.mxu0 %vm395_vm0, %v364_v38  ;;  %950 = vmatmul.msk.bf16.gmra.mxu2 %vm395_vm0, %v372_v39 }
  0x73   : > { %966 = vmatmul.msk.bf16.gmra.mxu1 %vm395_vm0, %v364_v38  ;;  %974 = vmatmul.msk.bf16.gmra.mxu3 %vm395_vm0, %v372_v39 }
  0x82   : > { %943 = vmatmul.msk.bf16.gmra.mxu0 %vm395_vm0, %v365_v44  ;;  %951 = vmatmul.msk.bf16.gmra.mxu2 %vm395_vm0, %v373_v45 }
  0x83   : > { %967 = vmatmul.msk.bf16.gmra.mxu1 %vm395_vm0, %v365_v44  ;;  %975 = vmatmul.msk.bf16.gmra.mxu3 %vm395_vm0, %v373_v45 }
  0x92   : > { %944 = vmatmul.msk.bf16.gmra.mxu0 %vm395_vm0, %v366_v50  ;;  %952 = vmatmul.msk.bf16.gmra.mxu2 %vm395_vm0, %v374_v51 }
  0x93   : > { %968 = vmatmul.msk.bf16.gmra.mxu1 %vm395_vm0, %v366_v50  ;;  %976 = vmatmul.msk.bf16.gmra.mxu3 %vm395_vm0, %v374_v51 }
  0x9f   : > { %v453_v53 = vpop.f32.mrf.mxu0 }
  0xa0   : > { %v562_v54 = vpop.f32.mrf.mxu1  ;;  %v454_v62 = vadd.f32 %v1422_v57, %v453_v53 }
  0xa1   : > { %v563_v55 = vadd.f32 %v1411_v52, %v562_v54 }
  0xa3   : > { %v706_v56 = vpack.c.bf16 %v563_v55, %v563_v55 }
  0xa5   : > { %739 = vst.msk [vmem:[%s1417_s27] sm:$0xf] %vm738_vm1, %v706_v56  ;;  %v493_v58 = vpop.f32.mrf.mxu2 }
  0xa6   : > { %v602_v59 = vpop.f32.mrf.mxu3  ;;  %v494_v6 = vadd.f32 %v1422_v57, %v493_v58 }
  0xa7   : > { %v603_v60 = vadd.f32 %v1411_v52, %v602_v59  ;;  %v455_v61 = vpop.f32.mrf.mxu0 }
  0xa8   : > { %v456_v63 = vadd.f32 %v1422_v57, %v455_v61  ;;  %v564_v0 = vpop.f32.mrf.mxu1 }
  0xa9   : > { %v722_v1 = vpack.c.bf16 %v603_v60, %v603_v60  ;;  %v565_v2 = vadd.f32 %v1411_v52, %v564_v0 }
  0xaa   : > { %v989_v3 = vpack.c.bf16 %v456_v63, %v454_v62 }
  0xab   : > { %755 = vst.msk [vmem:[%s1417_s27 + $0x40] sm:$0xf] %vm738_vm1, %v722_v1  ;;  %v707_v4 = vpack.c.bf16 %v565_v2, %v565_v2 }
  0xac   : > { %990 = vst [vmem:[%s1432_s30] sm:$0xff] %v989_v3  }
  0xad   : > { %740 = vst.msk [vmem:[%s1417_s27 + $0x4] sm:$0xf] %vm738_vm1, %v707_v4  ;;  %v495_v5 = vpop.f32.mrf.mxu2 }
  0xae   : > { %v496_v7 = vadd.f32 %v1422_v57, %v495_v5  ;;  %v604_v8 = vpop.f32.mrf.mxu3 }
  0xaf   : > { %v605_v9 = vadd.f32 %v1411_v52, %v604_v8  ;;  %v458_v10 = vpop.f32.mrf.mxu0 }
  0xb0   : > { %v1029_v11 = vpack.c.bf16 %v496_v7, %v494_v6  ;;  %v567_v12 = vpop.f32.mrf.mxu1  ;;  %v459_v20 = vadd.f32 %v1422_v57, %v458_v10 }
  0xb1   : > { %v723_v13 = vpack.c.bf16 %v605_v9, %v605_v9  ;;  %v568_v14 = vadd.f32 %v1411_v52, %v567_v12 }
  0xb2   : > { %1073 = vst [vmem:[%s1432_s30 + $0x40] sm:$0xff] %v1029_v11  }
  0xb3   : > { %756 = vst.msk [vmem:[%s1417_s27 + $0x44] sm:$0xf] %vm738_vm1, %v723_v13  ;;  %v708_v15 = vpack.c.bf16 %v568_v14, %v568_v14 }
  0xb5   : > { %741 = vst.msk [vmem:[%s1417_s27 + $0x8] sm:$0xf] %vm738_vm1, %v708_v15  ;;  %v498_v16 = vpop.f32.mrf.mxu2 }
  0xb6   : > { %v607_v17 = vpop.f32.mrf.mxu3  ;;  %v499_v28 = vadd.f32 %v1422_v57, %v498_v16 }
  0xb7   : > { %v608_v18 = vadd.f32 %v1411_v52, %v607_v17  ;;  %v460_v19 = vpop.f32.mrf.mxu0 }
  0xb8   : > { %v461_v21 = vadd.f32 %v1422_v57, %v460_v19  ;;  %v569_v22 = vpop.f32.mrf.mxu1 }
  0xb9   : > { %v724_v23 = vpack.c.bf16 %v608_v18, %v608_v18  ;;  %v570_v24 = vadd.f32 %v1411_v52, %v569_v22 }
  0xba   : > { %v994_v25 = vpack.c.bf16 %v461_v21, %v459_v20 }
  0xbb   : > { %757 = vst.msk [vmem:[%s1417_s27 + $0x48] sm:$0xf] %vm738_vm1, %v724_v23  ;;  %v709_v26 = vpack.c.bf16 %v570_v24, %v570_v24 }
  0xbc   : > { %1066 = vst [vmem:[%s1432_s30 + $0x8] sm:$0xff] %v994_v25  }
  0xbd   : > { %742 = vst.msk [vmem:[%s1417_s27 + $0xc] sm:$0xf] %vm738_vm1, %v709_v26  ;;  %v500_v27 = vpop.f32.mrf.mxu2 }
  0xbe   : > { %v501_v29 = vadd.f32 %v1422_v57, %v500_v27  ;;  %v609_v30 = vpop.f32.mrf.mxu3 }
  0xbf   : > { %v610_v31 = vadd.f32 %v1411_v52, %v609_v30  ;;  %v463_v32 = vpop.f32.mrf.mxu0 }
  0xc0   : > { %v1034_v33 = vpack.c.bf16 %v501_v29, %v499_v28  ;;  %v572_v34 = vpop.f32.mrf.mxu1  ;;  %v464_v42 = vadd.f32 %v1422_v57, %v463_v32 }
  0xc1   : > { %v725_v35 = vpack.c.bf16 %v610_v31, %v610_v31  ;;  %v573_v36 = vadd.f32 %v1411_v52, %v572_v34 }
  0xc2   : > { %1074 = vst [vmem:[%s1432_s30 + $0x48] sm:$0xff] %v1034_v33  }
  0xc3   : > { %758 = vst.msk [vmem:[%s1417_s27 + $0x4c] sm:$0xf] %vm738_vm1, %v725_v35  ;;  %v710_v37 = vpack.c.bf16 %v573_v36, %v573_v36 }
  0xc5   : > { %743 = vst.msk [vmem:[%s1417_s27 + $0x10] sm:$0xf] %vm738_vm1, %v710_v37  ;;  %v503_v38 = vpop.f32.mrf.mxu2 }
  0xc6   : > { %v612_v39 = vpop.f32.mrf.mxu3  ;;  %v504_v50 = vadd.f32 %v1422_v57, %v503_v38 }
  0xc7   : > { %v613_v40 = vadd.f32 %v1411_v52, %v612_v39  ;;  %v465_v41 = vpop.f32.mrf.mxu0 }
  0xc8   : > { %v466_v43 = vadd.f32 %v1422_v57, %v465_v41  ;;  %v574_v44 = vpop.f32.mrf.mxu1 }
  0xc9   : > { %v726_v45 = vpack.c.bf16 %v613_v40, %v613_v40  ;;  %v575_v46 = vadd.f32 %v1411_v52, %v574_v44 }
  0xca   : > { %v999_v47 = vpack.c.bf16 %v466_v43, %v464_v42 }
  0xcb   : > { %759 = vst.msk [vmem:[%s1417_s27 + $0x50] sm:$0xf] %vm738_vm1, %v726_v45  ;;  %v711_v48 = vpack.c.bf16 %v575_v46, %v575_v46 }
  0xcc   : > { %1067 = vst [vmem:[%s1432_s30 + $0x10] sm:$0xff] %v999_v47  }
  0xcd   : > { %744 = vst.msk [vmem:[%s1417_s27 + $0x14] sm:$0xf] %vm738_vm1, %v711_v48  ;;  %v505_v49 = vpop.f32.mrf.mxu2 }
  0xce   : > { %v506_v51 = vadd.f32 %v1422_v57, %v505_v49  ;;  %v614_v53 = vpop.f32.mrf.mxu3 }
  0xcf   : > { %v615_v54 = vadd.f32 %v1411_v52, %v614_v53  ;;  %v468_v55 = vpop.f32.mrf.mxu0 }
  0xd0   : > { %v1039_v56 = vpack.c.bf16 %v506_v51, %v504_v50  ;;  %v577_v58 = vpop.f32.mrf.mxu1  ;;  %v469_v2 = vadd.f32 %v1422_v57, %v468_v55 }
  0xd1   : > { %v727_v59 = vpack.c.bf16 %v615_v54, %v615_v54  ;;  %v578_v60 = vadd.f32 %v1411_v52, %v577_v58 }
  0xd2   : > { %1075 = vst [vmem:[%s1432_s30 + $0x50] sm:$0xff] %v1039_v56  }
  0xd3   : > { %760 = vst.msk [vmem:[%s1417_s27 + $0x54] sm:$0xf] %vm738_vm1, %v727_v59  ;;  %v712_v61 = vpack.c.bf16 %v578_v60, %v578_v60 }
  0xd5   : > { %745 = vst.msk [vmem:[%s1417_s27 + $0x18] sm:$0xf] %vm738_vm1, %v712_v61  ;;  %v508_v62 = vpop.f32.mrf.mxu2 }
  0xd6   : > { %v617_v63 = vpop.f32.mrf.mxu3  ;;  %v509_v10 = vadd.f32 %v1422_v57, %v508_v62 }
  0xd7   : > { %v618_v0 = vadd.f32 %v1411_v52, %v617_v63  ;;  %v470_v1 = vpop.f32.mrf.mxu0 }
  0xd8   : > { %v471_v3 = vadd.f32 %v1422_v57, %v470_v1  ;;  %v579_v4 = vpop.f32.mrf.mxu1 }
  0xd9   : > { %v728_v5 = vpack.c.bf16 %v618_v0, %v618_v0  ;;  %v580_v6 = vadd.f32 %v1411_v52, %v579_v4 }
  0xda   : > { %v1004_v7 = vpack.c.bf16 %v471_v3, %v469_v2 }
  0xdb   : > { %761 = vst.msk [vmem:[%s1417_s27 + $0x58] sm:$0xf] %vm738_vm1, %v728_v5  ;;  %v713_v8 = vpack.c.bf16 %v580_v6, %v580_v6 }
  0xdc   : > { %1068 = vst [vmem:[%s1432_s30 + $0x18] sm:$0xff] %v1004_v7  }
  0xdd   : > { %746 = vst.msk [vmem:[%s1417_s27 + $0x1c] sm:$0xf] %vm738_vm1, %v713_v8  ;;  %v510_v9 = vpop.f32.mrf.mxu2 }
  0xde   : > { %v511_v11 = vadd.f32 %v1422_v57, %v510_v9  ;;  %v619_v12 = vpop.f32.mrf.mxu3 }
  0xdf   : > { %v620_v13 = vadd.f32 %v1411_v52, %v619_v12  ;;  %v473_v14 = vpop.f32.mrf.mxu0 }
  0xe0   : > { %v1044_v15 = vpack.c.bf16 %v511_v11, %v509_v10  ;;  %v582_v16 = vpop.f32.mrf.mxu1  ;;  %v474_v24 = vadd.f32 %v1422_v57, %v473_v14 }
  0xe1   : > { %v729_v17 = vpack.c.bf16 %v620_v13, %v620_v13  ;;  %v583_v18 = vadd.f32 %v1411_v52, %v582_v16 }
  0xe2   : > { %1076 = vst [vmem:[%s1432_s30 + $0x58] sm:$0xff] %v1044_v15  }
  0xe3   : > { %762 = vst.msk [vmem:[%s1417_s27 + $0x5c] sm:$0xf] %vm738_vm1, %v729_v17  ;;  %v714_v19 = vpack.c.bf16 %v583_v18, %v583_v18 }
  0xe5   : > { %747 = vst.msk [vmem:[%s1417_s27 + $0x20] sm:$0xf] %vm738_vm1, %v714_v19  ;;  %v513_v20 = vpop.f32.mrf.mxu2 }
  0xe6   : > { %v622_v21 = vpop.f32.mrf.mxu3  ;;  %v514_v32 = vadd.f32 %v1422_v57, %v513_v20 }
  0xe7   : > { %v623_v22 = vadd.f32 %v1411_v52, %v622_v21  ;;  %v475_v23 = vpop.f32.mrf.mxu0 }
  0xe8   : > { %v476_v25 = vadd.f32 %v1422_v57, %v475_v23  ;;  %v584_v26 = vpop.f32.mrf.mxu1 }
  0xe9   : > { %v730_v27 = vpack.c.bf16 %v623_v22, %v623_v22  ;;  %v585_v28 = vadd.f32 %v1411_v52, %v584_v26 }
  0xea   : > { %v1009_v29 = vpack.c.bf16 %v476_v25, %v474_v24 }
  0xeb   : > { %763 = vst.msk [vmem:[%s1417_s27 + $0x60] sm:$0xf] %vm738_vm1, %v730_v27  ;;  %v715_v30 = vpack.c.bf16 %v585_v28, %v585_v28 }
  0xec   : > { %1069 = vst [vmem:[%s1432_s30 + $0x20] sm:$0xff] %v1009_v29  }
  0xed   : > { %748 = vst.msk [vmem:[%s1417_s27 + $0x24] sm:$0xf] %vm738_vm1, %v715_v30  ;;  %v515_v31 = vpop.f32.mrf.mxu2 }
  0xee   : > { %v516_v33 = vadd.f32 %v1422_v57, %v515_v31  ;;  %v624_v34 = vpop.f32.mrf.mxu3 }
  0xef   : > { %v625_v35 = vadd.f32 %v1411_v52, %v624_v34  ;;  %v478_v36 = vpop.f32.mrf.mxu0 }
  0xf0   : > { %v1049_v37 = vpack.c.bf16 %v516_v33, %v514_v32  ;;  %v587_v38 = vpop.f32.mrf.mxu1  ;;  %v479_v46 = vadd.f32 %v1422_v57, %v478_v36 }
  0xf1   : > { %v731_v39 = vpack.c.bf16 %v625_v35, %v625_v35  ;;  %v588_v40 = vadd.f32 %v1411_v52, %v587_v38 }
  0xf2   : > { %1077 = vst [vmem:[%s1432_s30 + $0x60] sm:$0xff] %v1049_v37  }
  0xf3   : > { %764 = vst.msk [vmem:[%s1417_s27 + $0x64] sm:$0xf] %vm738_vm1, %v731_v39  ;;  %v716_v41 = vpack.c.bf16 %v588_v40, %v588_v40 }
  0xf5   : > { %749 = vst.msk [vmem:[%s1417_s27 + $0x28] sm:$0xf] %vm738_vm1, %v716_v41  ;;  %v518_v42 = vpop.f32.mrf.mxu2 }
  0xf6   : > { %v627_v43 = vpop.f32.mrf.mxu3  ;;  %v519_v55 = vadd.f32 %v1422_v57, %v518_v42 }
  0xf7   : > { %v628_v44 = vadd.f32 %v1411_v52, %v627_v43  ;;  %v480_v45 = vpop.f32.mrf.mxu0 }
  0xf8   : > { %v481_v47 = vadd.f32 %v1422_v57, %v480_v45  ;;  %v589_v48 = vpop.f32.mrf.mxu1 }
  0xf9   : > { %v732_v49 = vpack.c.bf16 %v628_v44, %v628_v44  ;;  %v590_v50 = vadd.f32 %v1411_v52, %v589_v48 }
  0xfa   : > { %v1014_v51 = vpack.c.bf16 %v481_v47, %v479_v46 }
  0xfb   : > { %765 = vst.msk [vmem:[%s1417_s27 + $0x68] sm:$0xf] %vm738_vm1, %v732_v49  ;;  %v717_v53 = vpack.c.bf16 %v590_v50, %v590_v50 }
  0xfc   : > { %1070 = vst [vmem:[%s1432_s30 + $0x28] sm:$0xff] %v1014_v51  }
  0xfd   : > { %750 = vst.msk [vmem:[%s1417_s27 + $0x2c] sm:$0xf] %vm738_vm1, %v717_v53  ;;  %v520_v54 = vpop.f32.mrf.mxu2 }
  0xfe   : > { %v521_v56 = vadd.f32 %v1422_v57, %v520_v54  ;;  %v629_v58 = vpop.f32.mrf.mxu3 }
  0xff   : > { %v630_v59 = vadd.f32 %v1411_v52, %v629_v58  ;;  %v483_v60 = vpop.f32.mrf.mxu0 }
 0x100   : > { %v1054_v61 = vpack.c.bf16 %v521_v56, %v519_v55  ;;  %v592_v62 = vpop.f32.mrf.mxu1  ;;  %v484_v6 = vadd.f32 %v1422_v57, %v483_v60 }
 0x101   : > { %v733_v63 = vpack.c.bf16 %v630_v59, %v630_v59  ;;  %v593_v0 = vadd.f32 %v1411_v52, %v592_v62 }
 0x102   : > { %1078 = vst [vmem:[%s1432_s30 + $0x68] sm:$0xff] %v1054_v61  }
 0x103   : > { %766 = vst.msk [vmem:[%s1417_s27 + $0x6c] sm:$0xf] %vm738_vm1, %v733_v63  ;;  %v718_v1 = vpack.c.bf16 %v593_v0, %v593_v0 }
 0x105   : > { %751 = vst.msk [vmem:[%s1417_s27 + $0x30] sm:$0xf] %vm738_vm1, %v718_v1  ;;  %v523_v2 = vpop.f32.mrf.mxu2 }
 0x106   : > { %v632_v3 = vpop.f32.mrf.mxu3  ;;  %v524_v14 = vadd.f32 %v1422_v57, %v523_v2 }
 0x107   : > { %v633_v4 = vadd.f32 %v1411_v52, %v632_v3  ;;  %v485_v5 = vpop.f32.mrf.mxu0 }
 0x108   : > { %v486_v7 = vadd.f32 %v1422_v57, %v485_v5  ;;  %v594_v8 = vpop.f32.mrf.mxu1 }
 0x109   : > { %v734_v9 = vpack.c.bf16 %v633_v4, %v633_v4  ;;  %v595_v10 = vadd.f32 %v1411_v52, %v594_v8 }
 0x10a   : > { %v1019_v11 = vpack.c.bf16 %v486_v7, %v484_v6 }
 0x10b   : > { %767 = vst.msk [vmem:[%s1417_s27 + $0x70] sm:$0xf] %vm738_vm1, %v734_v9  ;;  %v719_v12 = vpack.c.bf16 %v595_v10, %v595_v10 }
 0x10c   : > { %1071 = vst [vmem:[%s1432_s30 + $0x30] sm:$0xff] %v1019_v11  }
 0x10d   : > { %752 = vst.msk [vmem:[%s1417_s27 + $0x34] sm:$0xf] %vm738_vm1, %v719_v12  ;;  %v525_v13 = vpop.f32.mrf.mxu2 }
 0x10e   : > { %v526_v15 = vadd.f32 %v1422_v57, %v525_v13  ;;  %v634_v16 = vpop.f32.mrf.mxu3 }
 0x10f   : > { %v635_v17 = vadd.f32 %v1411_v52, %v634_v16  ;;  %v488_v18 = vpop.f32.mrf.mxu0 }
 0x110   : > { %v1059_v19 = vpack.c.bf16 %v526_v15, %v524_v14  ;;  %v597_v20 = vpop.f32.mrf.mxu1  ;;  %v489_v28 = vadd.f32 %v1422_v57, %v488_v18 }
 0x111   : > { %v735_v21 = vpack.c.bf16 %v635_v17, %v635_v17  ;;  %v598_v22 = vadd.f32 %v1411_v52, %v597_v20 }
 0x112   : > { %1079 = vst [vmem:[%s1432_s30 + $0x70] sm:$0xff] %v1059_v19  }
 0x113   : > { %768 = vst.msk [vmem:[%s1417_s27 + $0x74] sm:$0xf] %vm738_vm1, %v735_v21  ;;  %v720_v23 = vpack.c.bf16 %v598_v22, %v598_v22 }
 0x115   : > { %753 = vst.msk [vmem:[%s1417_s27 + $0x38] sm:$0xf] %vm738_vm1, %v720_v23  ;;  %v528_v24 = vpop.f32.mrf.mxu2 }
 0x116   : > { %v637_v25 = vpop.f32.mrf.mxu3  ;;  %v529_v36 = vadd.f32 %v1422_v57, %v528_v24 }
 0x117   : > { %v638_v26 = vadd.f32 %v1411_v52, %v637_v25  ;;  %v490_v27 = vpop.f32.mrf.mxu0 }
 0x118   : > { %v491_v29 = vadd.f32 %v1422_v57, %v490_v27  ;;  %v599_v30 = vpop.f32.mrf.mxu1 }
 0x119   : > { %v736_v31 = vpack.c.bf16 %v638_v26, %v638_v26  ;;  %v600_v32 = vadd.f32 %v1411_v52, %v599_v30 }
 0x11a   : > { %v1024_v33 = vpack.c.bf16 %v491_v29, %v489_v28 }
 0x11b   : > { %769 = vst.msk [vmem:[%s1417_s27 + $0x78] sm:$0xf] %vm738_vm1, %v736_v31  ;;  %v721_v34 = vpack.c.bf16 %v600_v32, %v600_v32 }
 0x11c   : > { %1072 = vst [vmem:[%s1432_s30 + $0x38] sm:$0xff] %v1024_v33  }
 0x11d   : > { %754 = vst.msk [vmem:[%s1417_s27 + $0x3c] sm:$0xf] %vm738_vm1, %v721_v34  ;;  %v530_v35 = vpop.f32.mrf.mxu2 }
 0x11e   : > { %v531_v37 = vadd.f32 %v1422_v57, %v530_v35  ;;  %v639_v38 = vpop.f32.mrf.mxu3 }
 0x11f   : > { %v640_v39 = vadd.f32 %v1411_v52, %v639_v38 }
 0x120   : > { %v1064_v40 = vpack.c.bf16 %v531_v37, %v529_v36 }
 0x121   : > { %v737_v41 = vpack.c.bf16 %v640_v39, %v640_v39 }
 0x122   : > { %1080 = vst [vmem:[%s1432_s30 + $0x78] sm:$0xff] %v1064_v40  }
 0x123   : > { %770 = vst.msk [vmem:[%s1417_s27 + $0x7c] sm:$0xf] %vm738_vm1, %v737_v41 }
 0x124 PF: > { %s20_s26 = sadd.s32 1, %s1224_s26   ;;  %s1599_s21 = smov %s1208_s22 }
 0x125   : > { %p17_p0 = scmp.ge.s32.totalorder %s20_s26, 4   ;;  %s1600_s22 = smov %s1212_s23 }
 0x126   : > { %s1601_s23 = smov %s1312_s9  ;;  %s1602_s24 = smov %s1220_s25 }
 0x127   : > { %s1603_s25 = smov %s1605_s28  ;;  %19 = sbr.rel (!%p17_p0) target bundleno = 4 (0x4), region = 92 }
 0x12c   :  { %826 = vsyncpa [#allocation3], 1 }
 0x12d   :  { %828 = vsyncpa [#allocation3 + $0x1], 1 }

// kernel: sa_block_pallas.3
= control target key start
LH: loop header
LB: loop body
LE: loop exit
PB: predicated region body
PF: predicated region fallthrough
CT: control target
= control target key end

     0   :  { %s5642_s0 = inlined_call_operand.<no memory space> [shape: f32[1], index: 0, kind: input, shape index: {}]   ;;  %s5643_s1 = inlined_call_operand.vmem [shape: f32[2,256,32], index: 1, kind: input, shape index: {}]   ;;  %s5644_s2 = inlined_call_operand.vmem [shape: bf16[32,128], index: 2, kind: input, shape index: {}]   ;;  %s5645_s3 = inlined_call_operand.vmem [shape: f32[1,128], index: 3, kind: input, shape index: {}]   ;;  %s5646_s4 = inlined_call_operand.vmem [shape: bf16[2,256,128], index: 4, kind: input, shape index: {}]   ;;  %s5647_s5 = inlined_call_operand.vmem [shape: bf16[2,256,32], index: 5, kind: input, shape index: {}]   ;;  %s5648_s6 = inlined_call_operand.hbm [shape: f32[2,256,32], index: 6, kind: output, shape index: {}]  }
   0x1   :  { %11 = sst [smem:[#allocation6]] %s5642_s0 }
   0x2   :  { %12 = vsyncpa [#allocation8], 0 }
   0x3   :  { %14 = vsyncpa [#allocation8 + $0x1], 0  ;;  %s4048_s23 = smov 0   ;;  %s4050_s24 = smov 0  }
   0x4   :  { %s4052_s25 = smov 0   ;;  %s4054_s26 = smov 0  }
   0x5   :  { %s4056_s27 = smov 0   ;;  %s4058_s28 = smov 0  }
   0x6 LB: > { %s3216_s0 = sadd.s32 4294967295, %s4003_s28   ;;  %s3217_s29 = sadd.s32 4294967294, %s4003_s28   ;;  %s4003_s28 = sphi %s4058_s28, %s20_s28   ;;  %s3999_s27 = sphi %s4056_s27, %s5826_s27   ;;  %s3995_s26 = sphi %s4054_s26, %s5825_s26   ;;  %s3991_s25 = sphi %s4052_s25, %s5824_s25   ;;  %s3987_s24 = sphi %s4050_s24, %s5823_s24   ;;  %s3983_s23 = sphi %s4048_s23, %s5822_s23  }
   0x7   : > { %s39_s30 = sadd.s32 1, %s3999_s27  ;;  %s195_s7 = sadd.s32 1, %s3991_s25 }
   0x8   : > { %p41_p0 = scmp.ge.s32.totalorder %s39_s30, 2  ;;  %p205_p1 = scmp.ne.s32.totalorder %s3991_s25, %s3987_s24 }
   0x9   : > { %p206_p2 = scmp.eq.s32.totalorder %s3216_s0, 1  ;;  %p211_p3 = scmp.ne.s32.totalorder %s3987_s24, %s3983_s23 }
   0xa   : > { %s5828_s30 = smov (%p41_p0, %s39_s30), 0  ;;  %p212_p5 = scmp.eq.s32.totalorder %s3217_s29, 1 }
   0xb   : > { %p4088_p4 = por %p206_p2, %p205_p1  ;;  %s190_s9 = ssub.s32 %s3999_s27, %s5828_s30 }
   0xc   : > { %p3220_p6 = scmp.ge.s32.totalorder %s4003_s28, 1  ;;  %p193_p7 = scmp.eq.s32.totalorder %s190_s9, 0 }
   0xd   : > { %p4095_p8 = por %p212_p5, %p211_p3  ;;  %p278_p9 = scmp.lt.s32.totalorder %s4003_s28, 3 }
   0xe   : > { %s4101_s11 = scalar_select %p193_p7, %s3991_s25, %s195_s7  }
   0xf   : > { %p279_p10 = pnand %p3220_p6, %p278_p9 }
  0x11   : > { %282 = sbr.rel (%p279_p10) target bundleno = 1790 (0x6fe), region = 44 }
  0x16   : > { %v3453_v0 = vld [vmem:[%s5644_s2 + $0x8] sm:$0xff]  ;;  %p331_p11 = scmp.lt.s32.totalorder %s3995_s26, 1  ;;  %v3452_v1 = vld [vmem:[%s5644_s2] sm:$0xff]  ;;  %vm434_vm0 = vcmask 261120   ;;  %vm636_vm1 = vcmask 7168   ;;  %s327_s18 = sand.u32 1, %s3987_s24  }
  0x17   : > { %489 = vmatpush.bf16.msra.mxu0 %v3453_v0  ;;  %3598 = vmatpush.bf16.msra.mxu1 %v3453_v0  ;;  %v4179_v52 = vld [vmem:[%s5645_s3] ss:$0 sm:$0xff]  ;;  %s3221_s19 = sshll.u32 %s327_s18, 8  ;;  %s3502_s22 = sshll.u32 %s3995_s26, 8 }
  0x18   : > { %s4111_s16 = scalar_select %p331_p11, %s3995_s26, 1  ;;  %3599 = vmatpush.bf16.msra.mxu2 %v3453_v0  ;;  %3600 = vmatpush.bf16.msra.mxu3 %v3453_v0 }
  0x19   : > { %s3094_s7 = scalar_lea.hbm %s5648_s6, %s3502_s22  ;;  %s3081_s26 = scalar_lea.sflag [#allocation8], %s327_s18 }
  0x1a   : > { %s3449_s17 = sshll.u32 %s4111_s16, 8  ;;  %s3450_s21 = sshll.u32 %s4111_s16, 7 }
  0x1b   : > { %s4117_s20 = scalar_lea.vmem %s5643_s1, %s3449_s17  ;;  %490 = vmatpush.bf16.msra.mxu0 %v3452_v1  ;;  %3601 = vmatpush.bf16.msra.mxu1 %v3452_v1  ;;  %s4130_s29 = scalar_lea.vmem %s5646_s4, %s3450_s21 }
  0x1c   : > { %v366_v2 = vld [vmem:[%s4117_s20] sm:$0xff]  ;;  %v367_v3 = vld [vmem:[%s4117_s20 + $0x8] sm:$0xff]  ;;  %3602 = vmatpush.bf16.msra.mxu2 %v3452_v1  ;;  %3603 = vmatpush.bf16.msra.mxu3 %v3452_v1  ;;  %v372_v5 = vld [vmem:[%s4117_s20 + $0x30] sm:$0xff]  ;;  %s4631_s14 = scalar_lea.vmem %s5647_s5, %s3450_s21  ;;  %s2950_s17 = sld [smem:[#allocation6]] }
  0x1d   : > { %v398_v4 = vpack.c.bf16 %v367_v3, %v366_v2  ;;  %v373_v6 = vld [vmem:[%s4117_s20 + $0x38] sm:$0xff]  ;;  %v380_v8 = vld [vmem:[%s4117_s20 + $0x70] sm:$0xff]  ;;  %v374_v16 = vld [vmem:[%s4117_s20 + $0x40] sm:$0xff]  ;;  %s5389_s21 = scalar_lea.vmem [#allocation7], %s3221_s19  ;;  %s3097_s12 = sshll.u32 %s3094_s7, 4  ;;  %s3098_s12 = int_to_ptr.hbm [resolvable:$true] %s3097_s12 }
  0x1e   : > { %v401_v7 = vpack.c.bf16 %v373_v6, %v372_v5  ;;  %v381_v9 = vld [vmem:[%s4117_s20 + $0x78] sm:$0xff]  ;;  %v368_v13 = vld [vmem:[%s4117_s20 + $0x10] sm:$0xff]  ;;  %v375_v17 = vld [vmem:[%s4117_s20 + $0x48] sm:$0xff]  ;;  %s3095_s9 = sshll.u32 %s5389_s21, 4  ;;  %s3939_s13 = sshra.s32 %s3098_s12, 4  ;;  %s3096_s9 = int_to_ptr.vmem [resolvable:$true] %s3095_s9  ;;  %s3940_s13 = int_to_ptr.hbm [resolvable:$true] %s3939_s13 }
  0x1f   : > { %3236 = vmatmul.msk.bf16.vlgmr.msra.gmra.mxu0 %vm434_vm0, %v398_v4  ;;  %v3485_v10 = vld [vmem:[%s4130_s29 + $0x78] sm:$0xff]  ;;  %v405_v11 = vpack.c.bf16 %v381_v9, %v380_v8  ;;  %v402_v18 = vpack.c.bf16 %v375_v17, %v374_v16  ;;  %v382_v19 = vld [vmem:[%s4117_s20 + $0x80] sm:$0xff]  ;;  %v383_v20 = vld [vmem:[%s4117_s20 + $0x88] sm:$0xff]  ;;  %p3946_p1 = scmp.lt.s32.totalorder %s3940_s13, %s5648_s6 }
  0x20   : > { %3239 = vmatmul.msk.bf16.vlgmr.msra.gmra.mxu1 %vm434_vm0, %v401_v7  ;;  %v3477_v12 = vld [vmem:[%s4130_s29 + $0x38] sm:$0xff]  ;;  %1078 = vmatpush.bf16.xpose.msrb.mxu2 %v3485_v10  ;;  %v3484_v21 = vld [vmem:[%s4130_s29 + $0x70] sm:$0xff]  ;;  %v406_v22 = vpack.c.bf16 %v383_v20, %v382_v19  ;;  %v370_v24 = vld [vmem:[%s4117_s20 + $0x20] sm:$0xff] }
  0x21   : > { %3243 = vmatmul.msk.bf16.vlgmr.msra.gmra.mxu2 %vm434_vm0, %v405_v11  ;;  %989 = vmatpush.bf16.xpose.msrb.mxu1 %v3477_v12  ;;  %v369_v14 = vld [vmem:[%s4117_s20 + $0x18] sm:$0xff]  ;;  %v3476_v23 = vld [vmem:[%s4130_s29 + $0x30] sm:$0xff]  ;;  %v371_v25 = vld [vmem:[%s4117_s20 + $0x28] sm:$0xff] }
  0x22   : > { %v399_v15 = vpack.c.bf16 %v369_v14, %v368_v13  ;;  %v3483_v26 = vld [vmem:[%s4130_s29 + $0x68] sm:$0xff]  ;;  %v400_v28 = vpack.c.bf16 %v371_v25, %v370_v24  ;;  %v376_v29 = vld [vmem:[%s4117_s20 + $0x50] sm:$0xff]  ;;  %v377_v30 = vld [vmem:[%s4117_s20 + $0x58] sm:$0xff] }
  0x23   : > { %v3475_v27 = vld [vmem:[%s4130_s29 + $0x28] sm:$0xff]  ;;  %v403_v31 = vpack.c.bf16 %v377_v30, %v376_v29  ;;  %v384_v32 = vld [vmem:[%s4117_s20 + $0x90] sm:$0xff]  ;;  %v385_v33 = vld [vmem:[%s4117_s20 + $0x98] sm:$0xff] }
  0x24   : > { %v3482_v34 = vld [vmem:[%s4130_s29 + $0x60] sm:$0xff]  ;;  %v407_v35 = vpack.c.bf16 %v385_v33, %v384_v32  ;;  %v3481_v37 = vld [vmem:[%s4130_s29 + $0x58] sm:$0xff]  ;;  %v379_v40 = vld [vmem:[%s4117_s20 + $0x68] sm:$0xff] }
  0x25   : > { %v3474_v36 = vld [vmem:[%s4130_s29 + $0x20] sm:$0xff]  ;;  %v3473_v38 = vld [vmem:[%s4130_s29 + $0x18] sm:$0xff]  ;;  %v387_v43 = vld [vmem:[%s4117_s20 + $0xa8] sm:$0xff] }
  0x26   : > { %v378_v39 = vld [vmem:[%s4117_s20 + $0x60] sm:$0xff]  ;;  %v3480_v44 = vld [vmem:[%s4130_s29 + $0x50] sm:$0xff]  ;;  %v3479_v47 = vld [vmem:[%s4130_s29 + $0x48] sm:$0xff] }
  0x27   : > { %v404_v41 = vpack.c.bf16 %v379_v40, %v378_v39  ;;  %v386_v42 = vld [vmem:[%s4117_s20 + $0xa0] sm:$0xff]  ;;  %v3472_v46 = vld [vmem:[%s4130_s29 + $0x10] sm:$0xff]  ;;  %v3471_v48 = vld [vmem:[%s4130_s29 + $0x8] sm:$0xff] }
  0x28   : > { %1079 = vmatpush.bf16.xpose.msrb.mxu2 %v3484_v21  ;;  %v408_v45 = vpack.c.bf16 %v387_v43, %v386_v42  ;;  %v3478_v49 = vld [vmem:[%s4130_s29 + $0x40] sm:$0xff]  ;;  %v389_v42 = vld [vmem:[%s4117_s20 + $0xb8] sm:$0xff] }
  0x29   : > { %990 = vmatpush.bf16.xpose.msrb.mxu1 %v3476_v23  ;;  %v3470_v50 = vld [vmem:[%s4130_s29] sm:$0xff] }
  0x2f   : > { %3237 = vmatmul.msk.bf16.gmra.mxu0 %vm434_vm0, %v399_v15 }
  0x30   : > { %3240 = vmatmul.msk.bf16.gmra.mxu1 %vm434_vm0, %v402_v18  ;;  %1080 = vmatpush.bf16.xpose.msrb.mxu2 %v3483_v26 }
  0x31   : > { %3244 = vmatmul.msk.bf16.gmra.mxu2 %vm434_vm0, %v406_v22  ;;  %991 = vmatpush.bf16.xpose.msrb.mxu1 %v3475_v27 }
  0x38   : > { %1081 = vmatpush.bf16.xpose.msrb.mxu2 %v3482_v34 }
  0x39   : > { %992 = vmatpush.bf16.xpose.msrb.mxu1 %v3474_v36 }
  0x3f   : > { %3238 = vmatmul.msk.bf16.gmra.mxu0 %vm434_vm0, %v400_v28 }
  0x40   : > { %3241 = vmatmul.msk.bf16.gmra.mxu1 %vm434_vm0, %v403_v31  ;;  %1082 = vmatpush.bf16.xpose.msrb.mxu2 %v3481_v37 }
  0x41   : > { %3245 = vmatmul.msk.bf16.gmra.mxu2 %vm434_vm0, %v407_v35  ;;  %993 = vmatpush.bf16.xpose.msrb.mxu1 %v3473_v38 }
  0x48   : > { %1083 = vmatpush.bf16.xpose.msrb.mxu2 %v3480_v44 }
  0x49   : > { %994 = vmatpush.bf16.xpose.msrb.mxu1 %v3472_v46 }
  0x50   : > { %3242 = vmatmul.msk.bf16.gmra.mxu1 %vm434_vm0, %v404_v41  ;;  %1084 = vmatpush.bf16.xpose.msrb.mxu2 %v3479_v47  ;;  %v388_v41 = vld [vmem:[%s4117_s20 + $0xb0] sm:$0xff] }
  0x51   : > { %3246 = vmatmul.msk.bf16.gmra.mxu2 %vm434_vm0, %v408_v45  ;;  %995 = vmatpush.bf16.xpose.msrb.mxu1 %v3471_v48  ;;  %v409_v44 = vpack.c.bf16 %v389_v42, %v388_v41 }
  0x53   : > { %3247 = vmatmul.msk.bf16.vlgmr.msra.gmra.mxu3 %vm434_vm0, %v409_v44  ;;  %v395_v44 = vld [vmem:[%s4117_s20 + $0xe8] sm:$0xff] }
  0x58   : > { %1085 = vmatpush.bf16.xpose.msrb.mxu2 %v3478_v49 }
  0x59   : > { %996 = vmatpush.bf16.xpose.msrb.mxu1 %v3470_v50 }
  0x9c   : > { %v492_v51 = vpop.f32.mrf.mxu0 }
  0x9d   : > { %v507_v54 = vpop.f32.mrf.mxu1  ;;  %v493_v55 = vadd.f32 %v4179_v52, %v492_v51 }
  0x9e   : > { %v508_v58 = vadd.f32 %v4179_v52, %v507_v54 }
  0xa4   : > { %v494_v53 = vpop.f32.mrf.mxu0  ;;  %v527_v16 = vpop.f32.mrf.mxu2 }
  0xa5   : > { %v495_v56 = vadd.f32 %v4179_v52, %v494_v53  ;;  %v509_v60 = vpop.f32.mrf.mxu1  ;;  %v528_v22 = vadd.f32 %v4179_v52, %v527_v16 }
  0xa6   : > { %v510_v61 = vadd.f32 %v4179_v52, %v509_v60  ;;  %v390_v60 = vld [vmem:[%s4117_s20 + $0xc0] sm:$0xff] }
  0xa7   : > { %v3506_v57 = vpack.c.bf16 %v495_v56, %v493_v55 }
  0xa8   : > { %v3521_v62 = vpack.c.bf16 %v510_v61, %v508_v58  ;;  %v391_v61 = vld [vmem:[%s4117_s20 + $0xc8] sm:$0xff] }
  0xa9   : > { %3507 = vst [vmem:[#allocation2 + $0x30] sm:$0xff] %v3506_v57  }
  0xaa   : > { %3585 = vst [vmem:[#allocation2 + $0x18] sm:$0xff] %v3521_v62   ;;  %v410_v62 = vpack.c.bf16 %v391_v61, %v390_v60 }
  0xac   : > { %v497_v59 = vpop.f32.mrf.mxu0  ;;  %v529_v23 = vpop.f32.mrf.mxu2  ;;  %3248 = vmatmul.msk.bf16.gmra.mxu3 %vm434_vm0, %v410_v62 }
  0xad   : > { %v512_v1 = vpop.f32.mrf.mxu1  ;;  %v498_v2 = vadd.f32 %v4179_v52, %v497_v59  ;;  %v530_v24 = vadd.f32 %v4179_v52, %v529_v23 }
  0xae   : > { %v513_v5 = vadd.f32 %v4179_v52, %v512_v1 }
  0xaf   : > { %v3541_v26 = vpack.c.bf16 %v530_v24, %v528_v22  ;;  %v392_v24 = vld [vmem:[%s4117_s20 + $0xd0] sm:$0xff] }
  0xb0   : > { %v3454_v63 = vld [vmem:[#allocation2 + $0x30] sm:$0xff] }
  0xb1   : > { %997 = vmatmul.bf16.vlgmr.msrb.gmra.mxu1 %v3454_v63  ;;  %1086 = vmatmul.bf16.vlgmr.msrb.gmra.mxu2 %v3454_v63  ;;  %3589 = vst [vmem:[#allocation2 + $0x48] sm:$0xff] %v3541_v26   ;;  %v3457_v32 = vld [vmem:[#allocation2 + $0x18] sm:$0xff] }
  0xb4   : > { %v499_v0 = vpop.f32.mrf.mxu0  ;;  %v532_v27 = vpop.f32.mrf.mxu2 }
  0xb5   : > { %v500_v3 = vadd.f32 %v4179_v52, %v499_v0  ;;  %v514_v7 = vpop.f32.mrf.mxu1  ;;  %v533_v33 = vadd.f32 %v4179_v52, %v532_v27 }
  0xb6   : > { %v515_v8 = vadd.f32 %v4179_v52, %v514_v7 }
  0xb7   : > { %v3511_v4 = vpack.c.bf16 %v500_v3, %v498_v2 }
  0xb8   : > { %v3526_v9 = vpack.c.bf16 %v515_v8, %v513_v5  ;;  %v3461_v54 = vld [vmem:[#allocation2 + $0x48] sm:$0xff] }
  0xb9   : > { %3583 = vst [vmem:[#allocation2] sm:$0xff] %v3511_v4  }
  0xba   : > { %3586 = vst [vmem:[#allocation2 + $0x50] sm:$0xff] %v3526_v9  }
  0xbc   : > { %v502_v6 = vpop.f32.mrf.mxu0  ;;  %v534_v34 = vpop.f32.mrf.mxu2 }
  0xbd   : > { %v517_v12 = vpop.f32.mrf.mxu1  ;;  %v503_v13 = vadd.f32 %v4179_v52, %v502_v6  ;;  %v535_v35 = vadd.f32 %v4179_v52, %v534_v34 }
  0xbe   : > { %v518_v17 = vadd.f32 %v4179_v52, %v517_v12 }
  0xbf   : > { %v3546_v36 = vpack.c.bf16 %v535_v35, %v533_v33 }
  0xc0   : > { %v3455_v10 = vld [vmem:[#allocation2] sm:$0xff] }
  0xc1   : > { %1002 = vmatmul.bf16.gmra.mxu1 %v3455_v10  ;;  %1091 = vmatmul.bf16.gmra.mxu2 %v3455_v10  ;;  %3590 = vst [vmem:[#allocation2 + $0x40] sm:$0xff] %v3546_v36   ;;  %v3458_v38 = vld [vmem:[#allocation2 + $0x50] sm:$0xff] }
  0xc4   : > { %v504_v11 = vpop.f32.mrf.mxu0  ;;  %v537_v37 = vpop.f32.mrf.mxu2 }
  0xc5   : > { %v505_v14 = vadd.f32 %v4179_v52, %v504_v11  ;;  %v519_v18 = vpop.f32.mrf.mxu1  ;;  %v538_v39 = vadd.f32 %v4179_v52, %v537_v37 }
  0xc6   : > { %v520_v19 = vadd.f32 %v4179_v52, %v519_v18 }
  0xc7   : > { %v3516_v15 = vpack.c.bf16 %v505_v14, %v503_v13 }
  0xc8   : > { %v3531_v20 = vpack.c.bf16 %v520_v19, %v518_v17  ;;  %v3462_v56 = vld [vmem:[#allocation2 + $0x40] sm:$0xff] }
  0xc9   : > { %3584 = vst [vmem:[#allocation2 + $0x58] sm:$0xff] %v3516_v15  }
  0xca   : > { %3587 = vst [vmem:[#allocation2 + $0x68] sm:$0xff] %v3531_v20  }
  0xcc   : > { %v539_v40 = vpop.f32.mrf.mxu2 }
  0xcd   : > { %v522_v25 = vpop.f32.mrf.mxu1  ;;  %v540_v43 = vadd.f32 %v4179_v52, %v539_v40 }
  0xce   : > { %v523_v28 = vadd.f32 %v4179_v52, %v522_v25  ;;  %v393_v25 = vld [vmem:[%s4117_s20 + $0xd8] sm:$0xff] }
  0xcf   : > { %v3551_v45 = vpack.c.bf16 %v540_v43, %v538_v39  ;;  %v411_v27 = vpack.c.bf16 %v393_v25, %v392_v24  ;;  %v394_v43 = vld [vmem:[%s4117_s20 + $0xe0] sm:$0xff] }
  0xd0   : > { %v3456_v21 = vld [vmem:[#allocation2 + $0x58] sm:$0xff] }
  0xd1   : > { %1007 = vmatmul.bf16.gmra.mxu1 %v3456_v21  ;;  %1096 = vmatmul.bf16.gmra.mxu2 %v3456_v21  ;;  %3591 = vst [vmem:[#allocation2 + $0x20] sm:$0xff] %v3551_v45   ;;  %v3459_v47 = vld [vmem:[#allocation2 + $0x68] sm:$0xff] }
  0xd2   : > { %3249 = vmatmul.msk.bf16.gmra.mxu3 %vm434_vm0, %v411_v27 }
  0xd4   : > { %v542_v46 = vpop.f32.mrf.mxu2 }
  0xd5   : > { %v524_v29 = vpop.f32.mrf.mxu1  ;;  %v543_v48 = vadd.f32 %v4179_v52, %v542_v46  ;;  %v412_v46 = vpack.c.bf16 %v395_v44, %v394_v43 }
  0xd6   : > { %v525_v30 = vadd.f32 %v4179_v52, %v524_v29 }
  0xd8   : > { %v3536_v31 = vpack.c.bf16 %v525_v30, %v523_v28  ;;  %v3463_v2 = vld [vmem:[#allocation2 + $0x20] sm:$0xff] }
  0xda   : > { %3588 = vst [vmem:[#allocation2 + $0x8] sm:$0xff] %v3536_v31   ;;  %v547_v31 = vpop.f32.mrf.mxu3 }
  0xdb   : > { %v548_v36 = vadd.f32 %v4179_v52, %v547_v31 }
  0xdc   : > { %v544_v49 = vpop.f32.mrf.mxu2 }
  0xdd   : > { %v545_v50 = vadd.f32 %v4179_v52, %v544_v49 }
  0xdf   : > { %v3556_v51 = vpack.c.bf16 %v545_v50, %v543_v48 }
  0xe1   : > { %1012 = vmatmul.bf16.gmra.mxu1 %v3457_v32  ;;  %1101 = vmatmul.bf16.gmra.mxu2 %v3457_v32  ;;  %3592 = vst [vmem:[#allocation2 + $0x10] sm:$0xff] %v3556_v51   ;;  %v3460_v53 = vld [vmem:[#allocation2 + $0x8] sm:$0xff]  ;;  %v4005_v32 = vmov -inf  }
  0xe2   : > { %637 = vst.msk [vmem:[#allocation3] sm:$0xff] %vm636_vm1, %v4005_v32  ;;  %v549_v37 = vpop.f32.mrf.mxu3  ;;  %3250 = vmatmul.msk.bf16.gmra.mxu3 %vm434_vm0, %v412_v46 }
  0xe3   : > { %638 = vst.msk [vmem:[#allocation3 + $0x8] sm:$0xff] %vm636_vm1, %v4005_v32 }
  0xe4   : > { %639 = vst.msk [vmem:[#allocation3 + $0x10] sm:$0xff] %vm636_vm1, %v4005_v32 }
  0xe5   : > { %640 = vst.msk [vmem:[#allocation3 + $0x18] sm:$0xff] %vm636_vm1, %v4005_v32 }
  0xe6   : > { %641 = vst.msk [vmem:[#allocation3 + $0x20] sm:$0xff] %vm636_vm1, %v4005_v32 }
  0xe7   : > { %642 = vst.msk [vmem:[#allocation3 + $0x28] sm:$0xff] %vm636_vm1, %v4005_v32 }
  0xe8   : > { %v3464_v9 = vld [vmem:[#allocation2 + $0x10] sm:$0xff]  ;;  %643 = vst.msk [vmem:[#allocation3 + $0x30] sm:$0xff] %vm636_vm1, %v4005_v32 }
  0xe9   : > { %644 = vst.msk [vmem:[#allocation3 + $0x38] sm:$0xff] %vm636_vm1, %v4005_v32  ;;  %v1167_v61 = vld [vmem:[#allocation3] sm:$0xff] }
  0xea   : > { %645 = vst.msk [vmem:[#allocation3 + $0x40] sm:$0xff] %vm636_vm1, %v4005_v32 }
  0xeb   : > { %646 = vst.msk [vmem:[#allocation3 + $0x48] sm:$0xff] %vm636_vm1, %v4005_v32  ;;  %v4429_v25 = vld [vmem:[#allocation3 + $0x10] sm:$0xff] }
  0xec   : > { %647 = vst.msk [vmem:[#allocation3 + $0x50] sm:$0xff] %vm636_vm1, %v4005_v32 }
  0xed   : > { %648 = vst.msk [vmem:[#allocation3 + $0x58] sm:$0xff] %vm636_vm1, %v4005_v32 }
  0xee   : > { %649 = vst.msk [vmem:[#allocation3 + $0x60] sm:$0xff] %vm636_vm1, %v4005_v32 }
  0xef   : > { %650 = vst.msk [vmem:[#allocation3 + $0x68] sm:$0xff] %vm636_vm1, %v4005_v32 }
  0xf0   : > { %651 = vst.msk [vmem:[#allocation3 + $0x70] sm:$0xff] %vm636_vm1, %v4005_v32 }
  0xf1   : > { %1017 = vmatmul.bf16.gmra.mxu1 %v3458_v38  ;;  %1106 = vmatmul.bf16.gmra.mxu2 %v3458_v38  ;;  %v550_v38 = vadd.f32 %v4179_v52, %v549_v37  ;;  %652 = vst.msk [vmem:[#allocation3 + $0x78] sm:$0xff] %vm636_vm1, %v4005_v32 }
  0xf2   : > { %653 = vst.msk [vmem:[#allocation3 + $0x80] sm:$0xff] %vm636_vm1, %v4005_v32 }
  0xf3   : > { %v3561_v39 = vpack.c.bf16 %v550_v38, %v548_v36  ;;  %654 = vst.msk [vmem:[#allocation3 + $0x88] sm:$0xff] %vm636_vm1, %v4005_v32  ;;  %v396_v38 = vld [vmem:[%s4117_s20 + $0xf0] sm:$0xff] }
  0xf4   : > { %655 = vst.msk [vmem:[#allocation3 + $0x90] sm:$0xff] %vm636_vm1, %v4005_v32 }
  0xf5   : > { %3593 = vst [vmem:[#allocation2 + $0x38] sm:$0xff] %v3561_v39   ;;  %v397_v39 = vld [vmem:[%s4117_s20 + $0xf8] sm:$0xff] }
  0xf6   : > { %656 = vst.msk [vmem:[#allocation3 + $0x98] sm:$0xff] %vm636_vm1, %v4005_v32  ;;  %v413_v43 = vpack.c.bf16 %v397_v39, %v396_v38  ;;  %v4546_v38 = vld [vmem:[#allocation3 + $0x38] sm:$0xff] }
  0xf7   : > { %657 = vst.msk [vmem:[#allocation3 + $0xa0] sm:$0xff] %vm636_vm1, %v4005_v32 }
  0xf8   : > { %658 = vst.msk [vmem:[#allocation3 + $0xa8] sm:$0xff] %vm636_vm1, %v4005_v32  ;;  %3251 = vmatmul.msk.bf16.gmra.mxu3 %vm434_vm0, %v413_v43 }
  0xf9   : > { %659 = vst.msk [vmem:[#allocation3 + $0xb0] sm:$0xff] %vm636_vm1, %v4005_v32 }
  0xfa   : > { %660 = vst.msk [vmem:[#allocation3 + $0xb8] sm:$0xff] %vm636_vm1, %v4005_v32 }
  0xfb   : > { %661 = vst.msk [vmem:[#allocation3 + $0xc0] sm:$0xff] %vm636_vm1, %v4005_v32 }
  0xfc   : > { %v3465_v49 = vld [vmem:[#allocation2 + $0x38] sm:$0xff]  ;;  %662 = vst.msk [vmem:[#allocation3 + $0xc8] sm:$0xff] %vm636_vm1, %v4005_v32 }
  0xfd   : > { %663 = vst.msk [vmem:[#allocation3 + $0xd0] sm:$0xff] %vm636_vm1, %v4005_v32 }
  0xfe   : > { %664 = vst.msk [vmem:[#allocation3 + $0xd8] sm:$0xff] %vm636_vm1, %v4005_v32 }
  0xff   : > { %665 = vst.msk [vmem:[#allocation3 + $0xe0] sm:$0xff] %vm636_vm1, %v4005_v32 }
 0x100   : > { %666 = vst.msk [vmem:[#allocation3 + $0xe8] sm:$0xff] %vm636_vm1, %v4005_v32 }
 0x101   : > { %1022 = vmatmul.bf16.gmra.mxu1 %v3459_v47  ;;  %1111 = vmatmul.bf16.gmra.mxu2 %v3459_v47  ;;  %667 = vst.msk [vmem:[#allocation3 + $0xf0] sm:$0xff] %vm636_vm1, %v4005_v32 }
 0x102   : > { %668 = vst.msk [vmem:[#allocation3 + $0xf8] sm:$0xff] %vm636_vm1, %v4005_v32  ;;  %v4450_v32 = vld [vmem:[#allocation3 + $0x18] sm:$0xff] }
 0x111   : > { %1027 = vmatmul.bf16.gmra.mxu1 %v3460_v53  ;;  %1116 = vmatmul.bf16.gmra.mxu2 %v3460_v53  ;;  %v4006_v53 = vmov 0  }
 0x112   : > { %3664 = vset.pattern.permute.xlu2 %v4006_v53  ;;  %3665 = vset.pattern.permute.xlu0 %v4006_v53 }
 0x113   : > { %3666 = vset.pattern.permute.xlu1 %v4006_v53 }
 0x121   : > { %1032 = vmatmul.bf16.gmra.mxu1 %v3461_v54  ;;  %1121 = vmatmul.bf16.gmra.mxu2 %v3461_v54 }
 0x12e   : > { %v4206_v55 = vpop.f32.mrf.mxu1 }
 0x12f   : > { %v552_v31 = vpop.f32.mrf.mxu3 }
 0x131   : > { %1037 = vmatmul.bf16.gmra.mxu1 %v3462_v56  ;;  %1126 = vmatmul.bf16.gmra.mxu2 %v3462_v56 }
 0x134   : > { %v4208_v57 = vpop.f32.mrf.mxu2 }
 0x135   : > { %v1199_v58 = vmax.f32 %v4206_v55, %v4208_v57 }
 0x136   : > { %v4212_v59 = vpop.f32.mrf.mxu1 }
 0x137   : > { %1200 = vmax.xlane.f32.xlu0 %v1199_v58  ;;  %v4007_v58 = vmov 0.0   ;;  %v554_v46 = vpop.f32.mrf.mxu3 }
 0x138   : > { %701 = vst.msk [vmem:[#allocation5] sm:$0xff] %vm434_vm0, %v4007_v58 }
 0x139   : > { %669 = vst.msk [vmem:[#allocation4] sm:$0xff] %vm636_vm1, %v4007_v58 }
 0x13a   : > { %670 = vst.msk [vmem:[#allocation4 + $0x8] sm:$0xff] %vm636_vm1, %v4007_v58 }
 0x13b   : > { %671 = vst.msk [vmem:[#allocation4 + $0x10] sm:$0xff] %vm636_vm1, %v4007_v58 }
 0x13c   : > { %v4217_v63 = vpop.f32.mrf.mxu2  ;;  %672 = vst.msk [vmem:[#allocation4 + $0x18] sm:$0xff] %vm636_vm1, %v4007_v58 }
 0x13d   : > { %v1202_v0 = vmax.f32 %v4212_v59, %v4217_v63  ;;  %673 = vst.msk [vmem:[#allocation4 + $0x20] sm:$0xff] %vm636_vm1, %v4007_v58 }
 0x13e   : > { %v4221_v1 = vpop.f32.mrf.mxu1  ;;  %674 = vst.msk [vmem:[#allocation4 + $0x28] sm:$0xff] %vm636_vm1, %v4007_v58 }
 0x13f   : > { %1203 = vmax.xlane.f32.xlu0 %v1202_v0  ;;  %675 = vst.msk [vmem:[#allocation4 + $0x30] sm:$0xff] %vm636_vm1, %v4007_v58 }
 0x140   : > { %676 = vst.msk [vmem:[#allocation4 + $0x38] sm:$0xff] %vm636_vm1, %v4007_v58 }
 0x141   : > { %1042 = vmatmul.bf16.gmra.mxu1 %v3463_v2  ;;  %1131 = vmatmul.bf16.gmra.mxu2 %v3463_v2  ;;  %677 = vst.msk [vmem:[#allocation4 + $0x40] sm:$0xff] %vm636_vm1, %v4007_v58 }
 0x142   : > { %678 = vst.msk [vmem:[#allocation4 + $0x48] sm:$0xff] %vm636_vm1, %v4007_v58 }
 0x143   : > { %679 = vst.msk [vmem:[#allocation4 + $0x50] sm:$0xff] %vm636_vm1, %v4007_v58 }
 0x144   : > { %v4223_v3 = vpop.f32.mrf.mxu2  ;;  %680 = vst.msk [vmem:[#allocation4 + $0x58] sm:$0xff] %vm636_vm1, %v4007_v58 }
 0x145   : > { %v1205_v4 = vmax.f32 %v4221_v1, %v4223_v3  ;;  %681 = vst.msk [vmem:[#allocation4 + $0x60] sm:$0xff] %vm636_vm1, %v4007_v58 }
 0x146   : > { %v4227_v5 = vpop.f32.mrf.mxu1  ;;  %682 = vst.msk [vmem:[#allocation4 + $0x68] sm:$0xff] %vm636_vm1, %v4007_v58 }
 0x147   : > { %1206 = vmax.xlane.f32.xlu1 %v1205_v4  ;;  %683 = vst.msk [vmem:[#allocation4 + $0x70] sm:$0xff] %vm636_vm1, %v4007_v58 }
 0x148   : > { %684 = vst.msk [vmem:[#allocation4 + $0x78] sm:$0xff] %vm636_vm1, %v4007_v58 }
 0x149   : > { %685 = vst.msk [vmem:[#allocation4 + $0x80] sm:$0xff] %vm636_vm1, %v4007_v58 }
 0x14a   : > { %686 = vst.msk [vmem:[#allocation4 + $0x88] sm:$0xff] %vm636_vm1, %v4007_v58 }
 0x14b   : > { %687 = vst.msk [vmem:[#allocation4 + $0x90] sm:$0xff] %vm636_vm1, %v4007_v58 }
 0x14c   : > { %v4229_v6 = vpop.f32.mrf.mxu2  ;;  %688 = vst.msk [vmem:[#allocation4 + $0x98] sm:$0xff] %vm636_vm1, %v4007_v58 }
 0x14d   : > { %v1208_v7 = vmax.f32 %v4227_v5, %v4229_v6  ;;  %689 = vst.msk [vmem:[#allocation4 + $0xa0] sm:$0xff] %vm636_vm1, %v4007_v58 }
 0x14e   : > { %v4233_v8 = vpop.f32.mrf.mxu1  ;;  %690 = vst.msk [vmem:[#allocation4 + $0xa8] sm:$0xff] %vm636_vm1, %v4007_v58 }
 0x14f   : > { %1209 = vmax.xlane.f32.xlu1 %v1208_v7  ;;  %691 = vst.msk [vmem:[#allocation4 + $0xb0] sm:$0xff] %vm636_vm1, %v4007_v58 }
 0x150   : > { %692 = vst.msk [vmem:[#allocation4 + $0xb8] sm:$0xff] %vm636_vm1, %v4007_v58 }
 0x151   : > { %1047 = vmatmul.bf16.gmra.mxu1 %v3464_v9  ;;  %1136 = vmatmul.bf16.gmra.mxu2 %v3464_v9  ;;  %v4400_v9 = vld [vmem:[#allocation3 + $0x8] sm:$0xff]  ;;  %693 = vst.msk [vmem:[#allocation4 + $0xc0] sm:$0xff] %vm636_vm1, %v4007_v58 }
 0x152   : > { %694 = vst.msk [vmem:[#allocation4 + $0xc8] sm:$0xff] %vm636_vm1, %v4007_v58 }
 0x153   : > { %695 = vst.msk [vmem:[#allocation4 + $0xd0] sm:$0xff] %vm636_vm1, %v4007_v58 }
 0x154   : > { %v4235_v10 = vpop.f32.mrf.mxu2  ;;  %696 = vst.msk [vmem:[#allocation4 + $0xd8] sm:$0xff] %vm636_vm1, %v4007_v58 }
 0x155   : > { %v1211_v11 = vmax.f32 %v4233_v8, %v4235_v10  ;;  %697 = vst.msk [vmem:[#allocation4 + $0xe0] sm:$0xff] %vm636_vm1, %v4007_v58 }
 0x156   : > { %v4239_v12 = vpop.f32.mrf.mxu1  ;;  %698 = vst.msk [vmem:[#allocation4 + $0xe8] sm:$0xff] %vm636_vm1, %v4007_v58 }
 0x157   : > { %1212 = vmax.xlane.f32.xlu2 %v1211_v11  ;;  %699 = vst.msk [vmem:[#allocation4 + $0xf0] sm:$0xff] %vm636_vm1, %v4007_v58 }
 0x158   : > { %700 = vst.msk [vmem:[#allocation4 + $0xf8] sm:$0xff] %vm636_vm1, %v4007_v58 }
 0x159   : > { %702 = vst.msk [vmem:[#allocation5 + $0x8] sm:$0xff] %vm434_vm0, %v4007_v58 }
 0x15a   : > { %703 = vst.msk [vmem:[#allocation5 + $0x10] sm:$0xff] %vm434_vm0, %v4007_v58 }
 0x15b   : > { %704 = vst.msk [vmem:[#allocation5 + $0x18] sm:$0xff] %vm434_vm0, %v4007_v58 }
 0x15c   : > { %v4241_v13 = vpop.f32.mrf.mxu2  ;;  %705 = vst.msk [vmem:[#allocation5 + $0x20] sm:$0xff] %vm434_vm0, %v4007_v58 }
 0x15d   : > { %v1214_v14 = vmax.f32 %v4239_v12, %v4241_v13  ;;  %706 = vst.msk [vmem:[#allocation5 + $0x28] sm:$0xff] %vm434_vm0, %v4007_v58 }
 0x15e   : > { %v4245_v15 = vpop.f32.mrf.mxu1  ;;  %707 = vst.msk [vmem:[#allocation5 + $0x30] sm:$0xff] %vm434_vm0, %v4007_v58 }
 0x15f   : > { %1215 = vmax.xlane.f32.xlu2 %v1214_v14  ;;  %708 = vst.msk [vmem:[#allocation5 + $0x38] sm:$0xff] %vm434_vm0, %v4007_v58 }
 0x160   : > { %709 = vst.msk [vmem:[#allocation5 + $0x40] sm:$0xff] %vm434_vm0, %v4007_v58 }
 0x161   : > { %1141 = vmatmul.bf16.gmra.mxu2 %v3465_v49  ;;  %1052 = vmatmul.bf16.gmra.mxu1 %v3465_v49  ;;  %v4477_v49 = vld [vmem:[#allocation3 + $0x20] sm:$0xff]  ;;  %710 = vst.msk [vmem:[#allocation5 + $0x48] sm:$0xff] %vm434_vm0, %v4007_v58 }
 0x162   : > { %711 = vst.msk [vmem:[#allocation5 + $0x50] sm:$0xff] %vm434_vm0, %v4007_v58 }
 0x163   : > { %712 = vst.msk [vmem:[#allocation5 + $0x58] sm:$0xff] %vm434_vm0, %v4007_v58 }
 0x164   : > { %v4247_v16 = vpop.f32.mrf.mxu2  ;;  %713 = vst.msk [vmem:[#allocation5 + $0x60] sm:$0xff] %vm434_vm0, %v4007_v58 }
 0x165   : > { %v1217_v17 = vmax.f32 %v4245_v15, %v4247_v16  ;;  %714 = vst.msk [vmem:[#allocation5 + $0x68] sm:$0xff] %vm434_vm0, %v4007_v58 }
 0x166   : > { %v4251_v18 = vpop.f32.mrf.mxu1  ;;  %715 = vst.msk [vmem:[#allocation5 + $0x70] sm:$0xff] %vm434_vm0, %v4007_v58 }
 0x167   : > { %1218 = vmax.xlane.f32.xlu0 %v1217_v17  ;;  %716 = vst.msk [vmem:[#allocation5 + $0x78] sm:$0xff] %vm434_vm0, %v4007_v58 }
 0x168   : > { %717 = vst.msk [vmem:[#allocation5 + $0x80] sm:$0xff] %vm434_vm0, %v4007_v58 }
 0x169   : > { %718 = vst.msk [vmem:[#allocation5 + $0x88] sm:$0xff] %vm434_vm0, %v4007_v58 }
 0x16a   : > { %719 = vst.msk [vmem:[#allocation5 + $0x90] sm:$0xff] %vm434_vm0, %v4007_v58 }
 0x16b   : > { %720 = vst.msk [vmem:[#allocation5 + $0x98] sm:$0xff] %vm434_vm0, %v4007_v58 }
 0x16c   : > { %v4253_v19 = vpop.f32.mrf.mxu2  ;;  %721 = vst.msk [vmem:[#allocation5 + $0xa0] sm:$0xff] %vm434_vm0, %v4007_v58 }
 0x16d   : > { %v1220_v20 = vmax.f32 %v4251_v18, %v4253_v19  ;;  %722 = vst.msk [vmem:[#allocation5 + $0xa8] sm:$0xff] %vm434_vm0, %v4007_v58 }
 0x16e   : > { %v4257_v21 = vpop.f32.mrf.mxu1  ;;  %723 = vst.msk [vmem:[#allocation5 + $0xb0] sm:$0xff] %vm434_vm0, %v4007_v58 }
 0x16f   : > { %1221 = vmax.xlane.f32.xlu1 %v1220_v20  ;;  %724 = vst.msk [vmem:[#allocation5 + $0xb8] sm:$0xff] %vm434_vm0, %v4007_v58 }
 0x170   : > { %725 = vst.msk [vmem:[#allocation5 + $0xc0] sm:$0xff] %vm434_vm0, %v4007_v58 }
 0x171   : > { %726 = vst.msk [vmem:[#allocation5 + $0xc8] sm:$0xff] %vm434_vm0, %v4007_v58 }
 0x172   : > { %727 = vst.msk [vmem:[#allocation5 + $0xd0] sm:$0xff] %vm434_vm0, %v4007_v58 }
 0x173   : > { %728 = vst.msk [vmem:[#allocation5 + $0xd8] sm:$0xff] %vm434_vm0, %v4007_v58 }
 0x174   : > { %v4259_v22 = vpop.f32.mrf.mxu2  ;;  %729 = vst.msk [vmem:[#allocation5 + $0xe0] sm:$0xff] %vm434_vm0, %v4007_v58 }
 0x175   : > { %v1223_v23 = vmax.f32 %v4257_v21, %v4259_v22  ;;  %730 = vst.msk [vmem:[#allocation5 + $0xe8] sm:$0xff] %vm434_vm0, %v4007_v58 }
 0x176   : > { %v4265_v26 = vpop.f32.mrf.mxu1  ;;  %731 = vst.msk [vmem:[#allocation5 + $0xf0] sm:$0xff] %vm434_vm0, %v4007_v58 }
 0x177   : > { %1224 = vmax.xlane.f32.xlu2 %v1223_v23  ;;  %732 = vst.msk [vmem:[#allocation5 + $0xf8] sm:$0xff] %vm434_vm0, %v4007_v58 }
 0x17c   : > { %v4268_v28 = vpop.f32.mrf.mxu2 }
 0x17d   : > { %v1226_v29 = vmax.f32 %v4265_v26, %v4268_v28 }
 0x17e   : > { %v4272_v30 = vpop.f32.mrf.mxu1 }
 0x17f   : > { %1227 = vmax.xlane.f32.xlu0 %v1226_v29 }
 0x184   : > { %v4276_v33 = vpop.f32.mrf.mxu2 }
 0x185   : > { %v1229_v34 = vmax.f32 %v4272_v30, %v4276_v33 }
 0x186   : > { %v4284_v35 = vpop.f32.mrf.mxu1 }
 0x187   : > { %1230 = vmax.xlane.f32.xlu1 %v1229_v34 }
 0x18c   : > { %v4300_v40 = vpop.f32.mrf.mxu2 }
 0x18d   : > { %v1232_v41 = vmax.f32 %v4284_v35, %v4300_v40 }
 0x18e   : > { %v4306_v42 = vpop.f32.mrf.mxu1 }
 0x18f   : > { %5708 = vst [vmem:[#allocation10_spill] sm:$0xff] %v4306_v42  ;;  %1233 = vmax.xlane.f32.xlu2 %v1232_v41  ;;  %v553_v41 = vadd.f32 %v4179_v52, %v552_v31 }
 0x194   : > { %v4322_v45 = vpop.f32.mrf.mxu2 }
 0x195   : > { %5709 = vst [vmem:[#allocation11_spill] sm:$0xff] %v4322_v45  ;;  %v1235_v47 = vmax.f32 %v4306_v42, %v4322_v45 }
 0x196   : > { %v4330_v48 = vpop.f32.mrf.mxu1 }
 0x197   : > { %1236 = vmax.xlane.f32.xlu0 %v1235_v47  ;;  %v555_v47 = vadd.f32 %v4179_v52, %v554_v46  ;;  %v4571_v46 = vld [vmem:[#allocation3 + $0x40] sm:$0xff] }
 0x19c   : > { %v4345_v50 = vpop.f32.mrf.mxu2 }
 0x19d   : > { %v1238_v51 = vmax.f32 %v4330_v48, %v4345_v50 }
 0x19e   : > { %v4357_v54 = vpop.f32.mrf.mxu1 }
 0x19f   : > { %1239 = vmax.xlane.f32.xlu1 %v1238_v51  ;;  %5710 = vst [vmem:[#allocation12_spill] sm:$0xff] %v4357_v54  ;;  %v3566_v51 = vpack.c.bf16 %v555_v47, %v553_v41 }
 0x1a1   : > { %3594 = vst [vmem:[#allocation2 + $0x60] sm:$0xff] %v3566_v51  }
 0x1a4   : > { %v4367_v56 = vpop.f32.mrf.mxu2 }
 0x1a5   : > { %5711 = vst [vmem:[#allocation13_spill] sm:$0xff] %v4367_v56  ;;  %v1241_v60 = vmax.f32 %v4357_v54, %v4367_v56 }
 0x1a6   : > { %v4383_v62 = vpop.f32.mrf.mxu1 }
 0x1a7   : > { %1242 = vmax.xlane.f32.xlu2 %v1241_v60  ;;  %5712 = vst [vmem:[#allocation14_spill] sm:$0xff] %v4383_v62 }
 0x1aa   : > { %v1201_v0 = vpop.xlane.xlu0 %1200 }
 0x1ab   : > { %v1295_v2 = vmax.f32 %v1167_v61, %v1201_v0  ;;  %v4499_v0 = vld [vmem:[#allocation3 + $0x28] sm:$0xff] }
 0x1ac   : > { %v4389_v4 = vpop.f32.mrf.mxu2 }
 0x1ad   : > { %5713 = vst [vmem:[#allocation15_spill] sm:$0xff] %v4389_v4  ;;  %v1244_v7 = vmax.f32 %v4383_v62, %v4389_v4  ;;  %v1327_v34 = vsub.f32 %v1167_v61, %v1295_v2  ;;  %v3494_v4 = vld [vmem:[%s4631_s14 + $0x40] sm:$0xff] }
 0x1ae   : > { %2627 = vst.msk [vmem:[#allocation3] sm:$0xff] %vm636_vm1, %v1295_v2  ;;  %v4413_v17 = vpop.f32.mrf.mxu1 }
 0x1af   : > { %1245 = vmax.xlane.f32.xlu0 %v1244_v7  ;;  %5714 = vst [vmem:[#allocation16_spill] sm:$0xff] %v4413_v17  ;;  %v1359_v44 = vmul.f32 1.442695, %v1327_v34 }
 0x1b1   : > { %3668 = vpow2.f32 %v1359_v44 }
 0x1b2   : > { %v1204_v11 = vpop.xlane.xlu0 %1203 }
 0x1b3   : > { %v4409_v14 = vmax.f32 %v4400_v9, %v1204_v11 }
 0x1b4   : > { %v4415_v20 = vpop.f32.mrf.mxu2 }
 0x1b5   : > { %5715 = vst [vmem:[#allocation17_spill] sm:$0xff] %v4415_v20  ;;  %v1328_v23 = vsub.f32 %v4400_v9, %v4409_v14  ;;  %v1247_v24 = vmax.f32 %v4413_v17, %v4415_v20 }
 0x1b6   : > { %2628 = vst.msk [vmem:[#allocation3 + $0x8] sm:$0xff] %vm636_vm1, %v4409_v14 }
 0x1b7   : > { %1248 = vmax.xlane.f32.xlu1 %v1247_v24  ;;  %v4494_v61 = vpop.eup %3668  ;;  %v4521_v24 = vld [vmem:[#allocation3 + $0x30] sm:$0xff] }
 0x1b8   : > { %5716 = vst [vmem:[#allocation18_spill] sm:$0xff] %v4494_v61 }
 0x1ba   : > { %v1207_v27 = vpop.xlane.xlu1 %1206 }
 0x1bb   : > { %v4438_v29 = vmax.f32 %v4429_v25, %v1207_v27 }
 0x1bc   : > { %v4538_v34 = vpop.f32.mrf.mxu2 }
 0x1bd   : > { %2629 = vst.msk [vmem:[#allocation3 + $0x10] sm:$0xff] %vm636_vm1, %v4438_v29 }
 0x1be   : > { %5717 = vst [vmem:[#allocation19_spill] sm:$0xff] %v4538_v34 }
 0x1bf   : > { %1425 = vperm.xlu2 %3664, %v1295_v2   ;;  %v3466_v2 = vld [vmem:[#allocation2 + $0x60] sm:$0xff] }
 0x1c0   : > { %1146 = vmatmul.bf16.gmra.mxu2 %v3466_v2  ;;  %1057 = vmatmul.bf16.gmra.mxu1 %v3466_v2 }
 0x1c2   : > { %v1210_v36 = vpop.xlane.xlu1 %1209 }
 0x1c3   : > { %v4459_v37 = vmax.f32 %v4450_v32, %v1210_v36  ;;  %1430 = vperm.xlu0 %3665, %v4409_v14   ;;  %v4544_v36 = vpop.f32.mrf.mxu1 }
 0x1c4   : > { %5718 = vst [vmem:[#allocation20_spill] sm:$0xff] %v4544_v36  ;;  %v1250_v43 = vmax.f32 %v4544_v36, %v4538_v34  ;;  %v4569_v44 = vpop.f32.mrf.mxu2 }
 0x1c5   : > { %2630 = vst.msk [vmem:[#allocation3 + $0x18] sm:$0xff] %vm636_vm1, %v4459_v37 }
 0x1c6   : > { %5719 = vst [vmem:[#allocation21_spill] sm:$0xff] %v4569_v44 }
 0x1ca   : > { %v1213_v53 = vpop.xlane.xlu2 %1212 }
 0x1cb   : > { %v4484_v60 = vmax.f32 %v4477_v49, %v1213_v53  ;;  %v4577_v47 = vpop.f32.mrf.mxu1 }
 0x1cc   : > { %5720 = vst [vmem:[#allocation22_spill] sm:$0xff] %v4577_v47  ;;  %v1253_v2 = vmax.f32 %v4577_v47, %v4569_v44  ;;  %v4604_v44 = vld [vmem:[#allocation3 + $0x50] sm:$0xff]  ;;  %v4611_v47 = vpop.f32.mrf.mxu2 }
 0x1cd   : > { %2631 = vst.msk [vmem:[#allocation3 + $0x20] sm:$0xff] %vm636_vm1, %v4484_v60 }
 0x1ce   : > { %5721 = vst [vmem:[#allocation23_spill] sm:$0xff] %v4611_v47 }
 0x1d0   : > { %2034 = vperm.xlu1 %3666, %v4494_v61  }
 0x1d2   : > { %v1216_v7 = vpop.xlane.xlu2 %1215 }
 0x1d3   : > { %v4508_v11 = vmax.f32 %v4499_v0, %v1216_v7  ;;  %v4592_v7 = vld [vmem:[#allocation3 + $0x48] sm:$0xff] }
 0x1d5   : > { %2632 = vst.msk [vmem:[#allocation3 + $0x28] sm:$0xff] %vm636_vm1, %v4508_v11 }
 0x1d8   : > { %1435 = vperm.xlu1 %3666, %v4438_v29  }
 0x1da   : > { %v1219_v27 = vpop.xlane.xlu0 %1218 }
 0x1db   : > { %v4530_v31 = vmax.f32 %v4521_v24, %v1219_v27  ;;  %v1329_v27 = vsub.f32 %v4429_v25, %v4438_v29  ;;  %v1331_v25 = vsub.f32 %v4477_v49, %v4484_v60  ;;  %v4622_v49 = vld [vmem:[#allocation3 + $0x58] sm:$0xff] }
 0x1dd   : > { %2633 = vst.msk [vmem:[#allocation3 + $0x30] sm:$0xff] %vm636_vm1, %v4530_v31  ;;  %v1363_v58 = vmul.f32 1.442695, %v1329_v27  ;;  %v1367_v9 = vmul.f32 1.442695, %v1331_v25 }
 0x1e2   : > { %v1222_v39 = vpop.xlane.xlu1 %1221 }
 0x1e3   : > { %v4555_v41 = vmax.f32 %v4546_v38, %v1222_v39 }
 0x1e5   : > { %2634 = vst.msk [vmem:[#allocation3 + $0x38] sm:$0xff] %vm636_vm1, %v4555_v41 }
 0x1e8   : > { %1251 = vmax.xlane.f32.xlu2 %v1250_v43 }
 0x1ea   : > { %v1225_v51 = vpop.xlane.xlu2 %1224 }
 0x1eb   : > { %v4582_v53 = vmax.f32 %v4571_v46, %v1225_v51  ;;  %v1361_v51 = vmul.f32 1.442695, %v1328_v23  ;;  %v4617_v23 = vpop.f32.mrf.mxu1 }
 0x1ec   : > { %5723 = vst [vmem:[#allocation25_spill] sm:$0xff] %v4617_v23 }
 0x1ed   : > { %2635 = vst.msk [vmem:[#allocation3 + $0x40] sm:$0xff] %vm636_vm1, %v4582_v53  ;;  %1254 = vmax.xlane.f32.xlu0 %v1253_v2  ;;  %3670 = vpow2.f32 %v1361_v51  ;;  %v1256_v51 = vmax.f32 %v4617_v23, %v4611_v47  ;;  %v3493_v23 = vld [vmem:[%s4631_s14 + $0x38] sm:$0xff] }
 0x1ee   : > { %3672 = vpow2.f32 %v1363_v58  ;;  %2384 = vmatpush.bf16.msrb.mxu3 %v3493_v23 }
 0x1ef   : > { %3674 = vpow2.f32 %v1367_v9 }
 0x1f2   : > { %v1228_v39 = vpop.xlane.xlu0 %1227 }
 0x1f3   : > { %v4597_v43 = vmax.f32 %v4592_v7, %v1228_v39  ;;  %v557_v39 = vpop.f32.mrf.mxu3  ;;  %v4615_v14 = vpop.eup %3670 }
 0x1f4   : > { %5722 = vst [vmem:[#allocation24_spill] sm:$0xff] %v4615_v14  ;;  %v4619_v27 = vpop.eup %3672  ;;  %v558_v25 = vadd.f32 %v4179_v52, %v557_v39 }
 0x1f5   : > { %2636 = vst.msk [vmem:[#allocation3 + $0x48] sm:$0xff] %vm636_vm1, %v4597_v43  ;;  %v4645_v39 = vpop.eup %3674 }
 0x1f6   : > { %5724 = vst [vmem:[#allocation26_spill] sm:$0xff] %v4619_v27 }
 0x1f7   : > { %5725 = vst [vmem:[#allocation27_spill] sm:$0xff] %v4645_v39 }
 0x1fa   : > { %v1231_v29 = vpop.xlane.xlu1 %1230 }
 0x1fb   : > { %v4609_v2 = vmax.f32 %v4604_v44, %v1231_v29  ;;  %v559_v47 = vpop.f32.mrf.mxu3 }
 0x1fc   : > { %v560_v34 = vadd.f32 %v4179_v52, %v559_v47 }
 0x1fd   : > { %2637 = vst.msk [vmem:[#allocation3 + $0x50] sm:$0xff] %vm636_vm1, %v4609_v2 }
 0x1fe   : > { %v3571_v9 = vpack.c.bf16 %v560_v34, %v558_v25  ;;  %v3491_v34 = vld [vmem:[%s4631_s14 + $0x28] sm:$0xff]  ;;  %v1330_v25 = vsub.f32 %v4450_v32, %v4459_v37 }
 0x200   : > { %2039 = vperm.xlu2 %3664, %v4615_v14   ;;  %v3501_v14 = vld [vmem:[%s4631_s14 + $0x78] sm:$0xff]  ;;  %3595 = vst [vmem:[#allocation2 + $0x70] sm:$0xff] %v3571_v9   ;;  %v3490_v9 = vld [vmem:[%s4631_s14 + $0x20] sm:$0xff] }
 0x201   : > { %2044 = vperm.xlu0 %3665, %v4619_v27   ;;  %2473 = vmatpush.bf16.msrb.mxu0 %v3501_v14  ;;  %v3492_v27 = vld [vmem:[%s4631_s14 + $0x30] sm:$0xff]  ;;  %v3499_v14 = vld [vmem:[%s4631_s14 + $0x68] sm:$0xff] }
 0x202   : > { %v1234_v58 = vpop.xlane.xlu2 %1233  ;;  %1257 = vmax.xlane.f32.xlu1 %v1256_v51  ;;  %v3500_v51 = vld [vmem:[%s4631_s14 + $0x70] sm:$0xff]  ;;  %2385 = vmatpush.bf16.msrb.mxu3 %v3492_v27  ;;  %v1365_v27 = vmul.f32 1.442695, %v1330_v25 }
 0x203   : > { %v4636_v29 = vmax.f32 %v4622_v49, %v1234_v58  ;;  %v4648_v58 = vld [vmem:[#allocation3 + $0x60] sm:$0xff] }
 0x204   : > { %3676 = vpow2.f32 %v1365_v27  ;;  %v3487_v27 = vld [vmem:[%s4631_s14 + $0x8] sm:$0xff] }
 0x205   : > { %2638 = vst.msk [vmem:[#allocation3 + $0x58] sm:$0xff] %vm636_vm1, %v4636_v29  ;;  %2474 = vmatpush.bf16.msrb.mxu0 %v3500_v51  ;;  %v4663_v51 = vld [vmem:[#allocation3 + $0x68] sm:$0xff] }
 0x206   : > { %2386 = vmatpush.bf16.msrb.mxu3 %v3491_v34  ;;  %v3497_v34 = vld [vmem:[%s4631_s14 + $0x58] sm:$0xff] }
 0x208   : > { %1440 = vperm.xlu2 %3664, %v4459_v37   ;;  %v3489_v37 = vld [vmem:[%s4631_s14 + $0x18] sm:$0xff] }
 0x209   : > { %2054 = vperm.xlu0 %3665, %v4645_v39   ;;  %2475 = vmatpush.bf16.msrb.mxu0 %v3499_v14  ;;  %v3498_v39 = vld [vmem:[%s4631_s14 + $0x60] sm:$0xff]  ;;  %v3496_v14 = vld [vmem:[%s4631_s14 + $0x50] sm:$0xff] }
 0x20a   : > { %v1237_v47 = vpop.xlane.xlu0 %1236  ;;  %2387 = vmatpush.bf16.msrb.mxu3 %v3490_v9  ;;  %v562_v9 = vpop.f32.mrf.mxu3 }
 0x20b   : > { %v4652_v23 = vmax.f32 %v4648_v58, %v1237_v47  ;;  %v3467_v47 = vld [vmem:[#allocation2 + $0x70] sm:$0xff] }
 0x20c   : > { %1151 = vmatmul.bf16.gmra.mxu2 %v3467_v47  ;;  %1062 = vmatmul.bf16.gmra.mxu1 %v3467_v47 }
 0x20d   : > { %2639 = vst.msk [vmem:[#allocation3 + $0x60] sm:$0xff] %vm636_vm1, %v4652_v23  ;;  %2476 = vmatpush.bf16.msrb.mxu0 %v3498_v39  ;;  %v4674_v39 = vld [vmem:[#allocation3 + $0x70] sm:$0xff] }
 0x20e   : > { %2388 = vmatpush.bf16.msrb.mxu3 %v3489_v37  ;;  %v3495_v37 = vld [vmem:[%s4631_s14 + $0x48] sm:$0xff] }
 0x210   : > { %1445 = vperm.xlu2 %3664, %v4484_v60   ;;  %v3488_v60 = vld [vmem:[%s4631_s14 + $0x10] sm:$0xff] }
 0x211   : > { %2477 = vmatpush.bf16.msrb.mxu0 %v3497_v34  ;;  %v3486_v34 = vld [vmem:[%s4631_s14] sm:$0xff]  ;;  %s3941_s14 = scalar_lea.hbm %s3940_s13, 256 }
 0x212   : > { %v1240_v36 = vpop.xlane.xlu1 %1239  ;;  %2389 = vmatpush.bf16.msrb.mxu3 %v3488_v60  ;;  %v4688_v60 = vld [vmem:[#allocation3 + $0x78] sm:$0xff]  ;;  %p3942_p12 = scmp.ne.s32.totalorder %s3940_s13, %s3941_s14 }
 0x213   : > { %v4666_v32 = vmax.f32 %v4663_v51, %v1240_v36  ;;  %v4676_v36 = vpop.eup %3676  ;;  %5727 = vst [vmem:[#allocation29_spill] sm:$0xff] %v4688_v60 }
 0x214   : > { %5726 = vst [vmem:[#allocation28_spill] sm:$0xff] %v4676_v36  ;;  %p3943_p13 = pnand %p3942_p12, %p4088_p4 }
 0x215   : > { %2640 = vst.msk [vmem:[#allocation3 + $0x68] sm:$0xff] %vm636_vm1, %v4666_v32  ;;  %2478 = vmatpush.bf16.msrb.mxu0 %v3496_v14  ;;  %v563_v14 = vadd.f32 %v4179_v52, %v562_v9 }
 0x216   : > { %2390 = vmatpush.bf16.msrb.mxu3 %v3487_v27  ;;  %v564_v27 = vpop.f32.mrf.mxu3  ;;  %p3944_p0 = pneg %p3943_p13 }
 0x217   : > { %v565_v61 = vadd.f32 %v4179_v52, %v564_v27 }
 0x219   : > { %2479 = vmatpush.bf16.msrb.mxu0 %v3495_v37  ;;  %v4697_v37 = vpop.f32.mrf.mxu2 }
 0x21a   : > { %v1243_v25 = vpop.xlane.xlu2 %1242  ;;  %2391 = vmatpush.bf16.msrb.mxu3 %v3486_v34  ;;  %5728 = vst [vmem:[#allocation30_spill] sm:$0xff] %v4697_v37 }
 0x21b   : > { %v4679_v47 = vmax.f32 %v4674_v39, %v1243_v25  ;;  %2049 = vperm.xlu1 %3666, %v4676_v36  }
 0x21d   : > { %2641 = vst.msk [vmem:[#allocation3 + $0x70] sm:$0xff] %vm636_vm1, %v4679_v47  ;;  %2480 = vmatpush.bf16.msrb.mxu0 %v3494_v4  ;;  %v4702_v4 = vpop.f32.mrf.mxu1 }
 0x21e   : > { %5729 = vst [vmem:[#allocation31_spill] sm:$0xff] %v4702_v4 }
 0x221   : > { %v4712_v9 = vpop.f32.mrf.mxu2 }
 0x222   : > { %v1426_v62 = vpop.permute.xlu2 %1425  ;;  %v1246_v56 = vpop.xlane.xlu0 %1245  ;;  %5730 = vst [vmem:[#allocation32_spill] sm:$0xff] %v4712_v9 }
 0x223   : > { %v1583_v25 = vsub.f32 %v4206_v55, %v1426_v62  ;;  %v1584_v36 = vsub.f32 %v4208_v57, %v1426_v62  ;;  %v4694_v54 = vmax.f32 %v4688_v60, %v1246_v56  ;;  %1450 = vperm.xlu1 %3666, %v4508_v11   ;;  %v3576_v55 = vpack.c.bf16 %v565_v61, %v563_v14  ;;  %v4704_v57 = vld [vmem:[#allocation3 + $0x80] sm:$0xff] }
 0x225   : > { %v1647_v34 = vmul.f32 1.442695, %v1583_v25  ;;  %v1649_v20 = vmul.f32 1.442695, %v1584_v36  ;;  %2642 = vst.msk [vmem:[#allocation3 + $0x78] sm:$0xff] %vm636_vm1, %v4694_v54 }
 0x226   : > { %3596 = vst [vmem:[#allocation2 + $0x78] sm:$0xff] %v3576_v55  }
 0x227   : > { %3678 = vpow2.f32 %v1647_v34 }
 0x228   : > { %3680 = vpow2.f32 %v1649_v20  ;;  %v4716_v20 = vpop.f32.mrf.mxu1 }
 0x229   : > { %5731 = vst [vmem:[#allocation33_spill] sm:$0xff] %v4716_v20  ;;  %v1262_v14 = vmax.f32 %v4716_v20, %v4712_v9  ;;  %v1334_v9 = vsub.f32 %v4546_v38, %v4555_v41 }
 0x22a   : > { %v1249_v56 = vpop.xlane.xlu1 %1248 }
 0x22b   : > { %v4707_v62 = vmax.f32 %v4704_v57, %v1249_v56  ;;  %1460 = vperm.xlu1 %3666, %v4555_v41   ;;  %v1259_v56 = vmax.f32 %v4702_v4, %v4697_v37 }
 0x22d   : > { %v3679_v52 = vpop.eup %3678  ;;  %2643 = vst.msk [vmem:[#allocation3 + $0x80] sm:$0xff] %vm636_vm1, %v4707_v62  ;;  %v3468_v25 = vld [vmem:[#allocation2 + $0x78] sm:$0xff] }
 0x22e   : > { %v3681_v36 = vpop.eup %3680  ;;  %1156 = vmatmul.bf16.gmra.mxu2 %v3468_v25  ;;  %1067 = vmatmul.bf16.gmra.mxu1 %v3468_v25 }
 0x22f   : > { %v4714_v61 = vadd.f32 %v3681_v36, %v3679_v52 }
 0x233   : > { %1263 = vmax.xlane.f32.xlu0 %v1262_v14 }
 0x235   : > { %v1431_v27 = vpop.permute.xlu0 %1430 }
 0x236   : > { %v1585_v34 = vsub.f32 %v4212_v59, %v1431_v27  ;;  %v1586_v55 = vsub.f32 %v4217_v63, %v1431_v27  ;;  %v1373_v63 = vmul.f32 1.442695, %v1334_v9  ;;  %v567_v27 = vpop.f32.mrf.mxu3 }
 0x238   : > { %v1651_v17 = vmul.f32 1.442695, %v1585_v34  ;;  %v1653_v45 = vmul.f32 1.442695, %v1586_v55 }
 0x239   : > { %1260 = vmax.xlane.f32.xlu2 %v1259_v56 }
 0x23a   : > { %3682 = vpow2.f32 %v1651_v17 }
 0x23b   : > { %3684 = vpow2.f32 %v1653_v45  ;;  %v1332_v45 = vsub.f32 %v4499_v0, %v4508_v11 }
 0x23c   : > { %3686 = vpow2.f32 %v1373_v63 }
 0x23e   : > { %v569_v0 = vpop.f32.mrf.mxu3 }
 0x240   : > { %v3683_v42 = vpop.eup %3682 }
 0x241   : > { %v3685_v20 = vpop.eup %3684  ;;  %v2224_v25 = vpack.c.bf16 %v3683_v42, %v3679_v52 }
 0x242   : > { %v4726_v14 = vpop.permute.xlu1 %2034  ;;  %v2225_v60 = vpack.c.bf16 %v3685_v20, %v3681_v36  ;;  %v4728_v59 = vadd.f32 %v3685_v20, %v3683_v42  ;;  %v4735_v36 = vpop.eup %3686  ;;  %v1369_v42 = vmul.f32 1.442695, %v1332_v45  ;;  %v4753_v45 = vld [vmem:[#allocation3 + $0x88] sm:$0xff] }
 0x243   : > { %2392 = vmatmul.bf16.vlgmr.msrb.gmra.mxu3 %v2224_v25 }
 0x244   : > { %2481 = vmatmul.bf16.vlgmr.msrb.gmra.mxu0 %v2225_v60  ;;  %v3924_v60 = vld [vmem:[%s5645_s3] ss:$0 sm:$0xff] }
 0x245   : > { %v568_v9 = vadd.f32 %v3924_v60, %v567_v27  ;;  %v570_v11 = vadd.f32 %v3924_v60, %v569_v0 }
 0x247   : > { %1465 = vperm.xlu0 %3665, %v4582_v53   ;;  %v3581_v55 = vpack.c.bf16 %v570_v11, %v568_v9 }
 0x249   : > { %3597 = vst [vmem:[#allocation2 + $0x28] sm:$0xff] %v3581_v55  }
 0x24a   : > { %v1436_v17 = vpop.permute.xlu1 %1435 }
 0x24b   : > { %v1587_v38 = vsub.f32 %v4221_v1, %v1436_v17  ;;  %v1588_v41 = vsub.f32 %v4223_v3, %v1436_v17  ;;  %v4742_v1 = vpop.f32.mrf.mxu1  ;;  %v4744_v3 = vpop.f32.mrf.mxu2 }
 0x24c   : > { %5732 = vst [vmem:[#allocation34_spill] sm:$0xff] %v4742_v1  ;;  %v1265_v20 = vmax.f32 %v4742_v1, %v4744_v3  ;;  %v4784_v1 = vld [vmem:[#allocation3 + $0x98] sm:$0xff] }
 0x24d   : > { %v1655_v52 = vmul.f32 1.442695, %v1587_v38  ;;  %v1657_v34 = vmul.f32 1.442695, %v1588_v41  ;;  %5733 = vst [vmem:[#allocation35_spill] sm:$0xff] %v4744_v3 }
 0x24f   : > { %3688 = vpow2.f32 %v1655_v52  ;;  %2069 = vperm.xlu0 %3665, %v4735_v36   ;;  %v4760_v52 = vld [vmem:[#allocation3 + $0x90] sm:$0xff] }
 0x250   : > { %3690 = vpow2.f32 %v1657_v34  ;;  %v3469_v41 = vld [vmem:[#allocation2 + $0x28] sm:$0xff]  ;;  %v1333_v34 = vsub.f32 %v4521_v24, %v4530_v31 }
 0x251   : > { %1455 = vperm.xlu2 %3664, %v4530_v31   ;;  %3692 = vpow2.f32 %v1369_v42  ;;  %1161 = vmatmul.bf16.gmra.mxu2 %v3469_v41 }
 0x252   : > { %1072 = vmatmul.bf16.gmra.mxu1 %v3469_v41  ;;  %v1371_v9 = vmul.f32 1.442695, %v1333_v34 }
 0x253   : > { %v4771_v11 = vpop.f32.mrf.mxu1 }
 0x254   : > { %3694 = vpow2.f32 %v1371_v9  ;;  %5735 = vst [vmem:[#allocation37_spill] sm:$0xff] %v4771_v11 }
 0x255   : > { %v3689_v56 = vpop.eup %3688  ;;  %1266 = vmax.xlane.f32.xlu1 %v1265_v20  ;;  %v4773_v20 = vpop.f32.mrf.mxu2 }
 0x256   : > { %v3691_v25 = vpop.eup %3690  ;;  %5736 = vst [vmem:[#allocation38_spill] sm:$0xff] %v4773_v20 }
 0x257   : > { %v4748_v63 = vadd.f32 %v3691_v25, %v3689_v56  ;;  %v4750_v27 = vpop.eup %3692 }
 0x258   : > { %5734 = vst [vmem:[#allocation36_spill] sm:$0xff] %v4750_v27 }
 0x259   : > { %2059 = vperm.xlu2 %3664, %v4750_v27  }
 0x25b   : > { %v1252_v17 = vpop.xlane.xlu2 %1251  ;;  %v4782_v9 = vpop.f32.mrf.mxu1 }
 0x25c   : > { %v4756_v38 = vmax.f32 %v4753_v45, %v1252_v17  ;;  %v4777_v17 = vpop.eup %3694  ;;  %5739 = vst [vmem:[#allocation41_spill] sm:$0xff] %v4782_v9 }
 0x25d   : > { %5737 = vst [vmem:[#allocation39_spill] sm:$0xff] %v4777_v17  ;;  %v4780_v34 = vpop.f32.mrf.mxu2 }
 0x25e   : > { %2644 = vst.msk [vmem:[#allocation3 + $0x88] sm:$0xff] %vm636_vm1, %v4756_v38 }
 0x25f   : > { %5738 = vst [vmem:[#allocation40_spill] sm:$0xff] %v4780_v34 }
 0x260   : > { %v1255_v42 = vpop.xlane.xlu0 %1254 }
 0x261   : > { %v4765_v60 = vmax.f32 %v4760_v52, %v1255_v42 }
 0x263   : > { %2645 = vst.msk [vmem:[#allocation3 + $0x90] sm:$0xff] %vm636_vm1, %v4765_v60  ;;  %v4769_v0 = vpop.permute.xlu2 %2039 }
 0x26b   : > { %v1441_v55 = vpop.permute.xlu2 %1440 }
 0x26c   : > { %v1589_v24 = vsub.f32 %v4227_v5, %v1441_v55  ;;  %v1590_v31 = vsub.f32 %v4229_v6, %v1441_v55  ;;  %v1271_v55 = vmax.f32 %v4782_v9, %v4780_v34 }
 0x26e   : > { %v1659_v41 = vmul.f32 1.442695, %v1589_v24  ;;  %v1661_v42 = vmul.f32 1.442695, %v1590_v31  ;;  %2064 = vperm.xlu1 %3666, %v4777_v17  }
 0x270   : > { %3696 = vpow2.f32 %v1659_v41 }
 0x271   : > { %3698 = vpow2.f32 %v1661_v42 }
 0x273   : > { %v1446_v3 = vpop.permute.xlu2 %1445 }
 0x274   : > { %v1591_v27 = vsub.f32 %v4233_v8, %v1446_v3  ;;  %v1592_v5 = vsub.f32 %v4235_v10, %v1446_v3 }
 0x275   : > { %v1258_v6 = vpop.xlane.xlu1 %1257 }
 0x276   : > { %v3697_v24 = vpop.eup %3696  ;;  %v1663_v31 = vmul.f32 1.442695, %v1591_v27  ;;  %v1665_v17 = vmul.f32 1.442695, %v1592_v5  ;;  %v4791_v41 = vmax.f32 %v4784_v1, %v1258_v6  ;;  %1475 = vperm.xlu1 %3666, %v4609_v2   ;;  %v1268_v5 = vmax.f32 %v4771_v11, %v4773_v20  ;;  %v4868_v20 = vld [vmem:[#allocation3 + $0xb0] sm:$0xff] }
 0x277   : > { %v3699_v42 = vpop.eup %3698  ;;  %v2226_v37 = vpack.c.bf16 %v3697_v24, %v3689_v56  ;;  %v1337_v56 = vsub.f32 %v4604_v44, %v4609_v2 }
 0x278   : > { %3700 = vpow2.f32 %v1663_v31  ;;  %2646 = vst.msk [vmem:[#allocation3 + $0x98] sm:$0xff] %vm636_vm1, %v4791_v41  ;;  %v2227_v8 = vpack.c.bf16 %v3699_v42, %v3691_v25  ;;  %v4796_v10 = vadd.f32 %v3699_v42, %v3697_v24 }
 0x279   : > { %3702 = vpow2.f32 %v1665_v17  ;;  %2397 = vmatmul.bf16.gmra.mxu3 %v2226_v37  ;;  %1272 = vmax.xlane.f32.xlu0 %v1271_v55  ;;  %v1379_v31 = vmul.f32 1.442695, %v1337_v56  ;;  %v1335_v37 = vsub.f32 %v4571_v46, %v4582_v53  ;;  %v4811_v17 = vpop.permute.xlu0 %2044  ;;  %v4819_v46 = vpop.f32.mrf.mxu2 }
 0x27a   : > { %2486 = vmatmul.bf16.gmra.mxu0 %v2227_v8  ;;  %5742 = vst [vmem:[#allocation44_spill] sm:$0xff] %v4819_v46 }
 0x27b   : > { %3704 = vpow2.f32 %v1379_v31  ;;  %v1375_v55 = vmul.f32 1.442695, %v1335_v37 }
 0x27d   : > { %3706 = vpow2.f32 %v1375_v55 }
 0x27e   : > { %v3701_v3 = vpop.eup %3700 }
 0x27f   : > { %v3703_v27 = vpop.eup %3702 }
 0x280   : > { %v4800_v6 = vadd.f32 %v3703_v27, %v3701_v3 }
 0x281   : > { %v4809_v25 = vpop.eup %3704  ;;  %v4821_v56 = vpop.permute.xlu0 %2054 }
 0x282   : > { %1269 = vmax.xlane.f32.xlu2 %v1268_v5  ;;  %5740 = vst [vmem:[#allocation42_spill] sm:$0xff] %v4809_v25  ;;  %v4817_v5 = vpop.f32.mrf.mxu1 }
 0x283   : > { %5741 = vst [vmem:[#allocation43_spill] sm:$0xff] %v4817_v5  ;;  %v4827_v37 = vpop.eup %3706 }
 0x284   : > { %5743 = vst [vmem:[#allocation45_spill] sm:$0xff] %v4827_v37 }
 0x28d   : > { %v4804_v34 = vpop.permute.xlu1 %2049  ;;  %1480 = vperm.xlu0 %3665, %v4636_v29  }
 0x295   : > { %v1451_v24 = vpop.permute.xlu1 %1450  ;;  %2084 = vperm.xlu0 %3665, %v4809_v25  }
 0x296   : > { %v1593_v42 = vsub.f32 %v4239_v12, %v1451_v24  ;;  %v1594_v44 = vsub.f32 %v4241_v13, %v1451_v24  ;;  %v1274_v13 = vmax.f32 %v4817_v5, %v4819_v46 }
 0x298   : > { %v1667_v2 = vmul.f32 1.442695, %v1593_v42  ;;  %v1669_v8 = vmul.f32 1.442695, %v1594_v44 }
 0x29a   : > { %3708 = vpow2.f32 %v1667_v2  ;;  %1470 = vperm.xlu2 %3664, %v4597_v43  }
 0x29b   : > { %3710 = vpow2.f32 %v1669_v8 }
 0x29d   : > { %v1461_v53 = vpop.permute.xlu1 %1460 }
 0x29e   : > { %v1597_v31 = vsub.f32 %v4251_v18, %v1461_v53  ;;  %v1598_v12 = vsub.f32 %v4253_v19, %v1461_v53  ;;  %v4832_v18 = vld [vmem:[#allocation3 + $0xa8] sm:$0xff] }
 0x2a0   : > { %v3709_v55 = vpop.eup %3708  ;;  %v1675_v24 = vmul.f32 1.442695, %v1597_v31  ;;  %v1677_v42 = vmul.f32 1.442695, %v1598_v12  ;;  %1275 = vmax.xlane.f32.xlu1 %v1274_v13 }
 0x2a1   : > { %v3711_v44 = vpop.eup %3710  ;;  %v2228_v2 = vpack.c.bf16 %v3709_v55, %v3701_v3  ;;  %v1336_v3 = vsub.f32 %v4592_v7, %v4597_v43 }
 0x2a2   : > { %3712 = vpow2.f32 %v1675_v24  ;;  %2074 = vperm.xlu2 %3664, %v4827_v37   ;;  %v2229_v8 = vpack.c.bf16 %v3711_v44, %v3703_v27  ;;  %v4830_v9 = vadd.f32 %v3711_v44, %v3709_v55  ;;  %v4841_v27 = vld [vmem:[#allocation3 + $0xa0] sm:$0xff]  ;;  %v4848_v44 = vpop.f32.mrf.mxu2 }
 0x2a3   : > { %3714 = vpow2.f32 %v1677_v42  ;;  %2402 = vmatmul.bf16.gmra.mxu3 %v2228_v2  ;;  %v1377_v42 = vmul.f32 1.442695, %v1336_v3  ;;  %5744 = vst [vmem:[#allocation46_spill] sm:$0xff] %v4848_v44  ;;  %v4850_v2 = vpop.f32.mrf.mxu1 }
 0x2a4   : > { %2491 = vmatmul.bf16.gmra.mxu0 %v2229_v8  ;;  %5745 = vst [vmem:[#allocation47_spill] sm:$0xff] %v4850_v2 }
 0x2a5   : > { %3716 = vpow2.f32 %v1377_v42 }
 0x2a6   : > { %v1264_v19 = vpop.xlane.xlu0 %1263 }
 0x2a7   : > { %v4835_v53 = vmax.f32 %v4832_v18, %v1264_v19 }
 0x2a8   : > { %v3713_v31 = vpop.eup %3712 }
 0x2a9   : > { %v3715_v12 = vpop.eup %3714  ;;  %2648 = vst.msk [vmem:[#allocation3 + $0xa8] sm:$0xff] %vm636_vm1, %v4835_v53 }
 0x2aa   : > { %v4843_v13 = vadd.f32 %v3715_v12, %v3713_v31 }
 0x2ab   : > { %v4856_v5 = vpop.eup %3716  ;;  %v4860_v3 = vpop.f32.mrf.mxu1 }
 0x2ac   : > { %v1261_v55 = vpop.xlane.xlu2 %1260  ;;  %5746 = vst [vmem:[#allocation48_spill] sm:$0xff] %v4856_v5 }
 0x2ad   : > { %v4846_v24 = vmax.f32 %v4841_v27, %v1261_v55  ;;  %v4858_v55 = vpop.f32.mrf.mxu2  ;;  %5748 = vst [vmem:[#allocation50_spill] sm:$0xff] %v4860_v3 }
 0x2ae   : > { %5747 = vst [vmem:[#allocation49_spill] sm:$0xff] %v4858_v55  ;;  %v1280_v42 = vmax.f32 %v4860_v3, %v4858_v55 }
 0x2af   : > { %2647 = vst.msk [vmem:[#allocation3 + $0xa0] sm:$0xff] %vm636_vm1, %v4846_v24 }
 0x2b4   : > { %v1456_v8 = vpop.permute.xlu2 %1455 }
 0x2b5   : > { %v1595_v7 = vsub.f32 %v4245_v15, %v1456_v8  ;;  %v1596_v43 = vsub.f32 %v4247_v16, %v1456_v8 }
 0x2b7   : > { %v1671_v19 = vmul.f32 1.442695, %v1595_v7  ;;  %v1673_v46 = vmul.f32 1.442695, %v1596_v43  ;;  %v2000_v7 = vld [vmem:[#allocation5] sm:$0xff] }
 0x2b9   : > { %3718 = vpow2.f32 %v1671_v19  ;;  %2079 = vperm.xlu1 %3666, %v4856_v5  }
 0x2ba   : > { %3720 = vpow2.f32 %v1673_v46  ;;  %v2192_v46 = vmul.f32 %v4726_v14, %v2000_v7  ;;  %v1466_v7 = vpop.permute.xlu0 %1465 }
 0x2bf   : > { %v3719_v37 = vpop.eup %3718  ;;  %1281 = vmax.xlane.f32.xlu0 %v1280_v42 }
 0x2c0   : > { %v3721_v15 = vpop.eup %3720  ;;  %v2230_v25 = vpack.c.bf16 %v3713_v31, %v3719_v37  ;;  %v1277_v31 = vmax.f32 %v4850_v2, %v4848_v44 }
 0x2c1   : > { %1490 = vperm.xlu1 %3666, %v4666_v32   ;;  %v2231_v16 = vpack.c.bf16 %v3715_v12, %v3721_v15  ;;  %v4866_v8 = vadd.f32 %v3721_v15, %v3719_v37  ;;  %v2482_v43 = vpop.f32.mrf.mxu0  ;;  %v2001_v37 = vld [vmem:[#allocation5 + $0x8] sm:$0xff] }
 0x2c2   : > { %2407 = vmatmul.bf16.gmra.mxu3 %v2230_v25  ;;  %v1340_v25 = vsub.f32 %v4663_v51, %v4666_v32  ;;  %v1338_v51 = vsub.f32 %v4622_v49, %v4636_v29 }
 0x2c3   : > { %2496 = vmatmul.bf16.gmra.mxu0 %v2231_v16 }
 0x2c4   : > { %v1381_v32 = vmul.f32 1.442695, %v1338_v51 }
 0x2c6   : > { %v2393_v19 = vpop.f32.mrf.mxu3 }
 0x2c7   : > { %v2483_v5 = vadd.f32 %v2482_v43, %v2393_v19  ;;  %v4894_v19 = vpop.f32.mrf.mxu1 }
 0x2c8   : > { %v1267_v55 = vpop.xlane.xlu1 %1266  ;;  %5750 = vst [vmem:[#allocation52_spill] sm:$0xff] %v4894_v19 }
 0x2c9   : > { %v2562_v3 = vadd.f32 %v2483_v5, %v2192_v46  ;;  %v4872_v42 = vmax.f32 %v4868_v20, %v1267_v55  ;;  %v2484_v14 = vpop.f32.mrf.mxu0  ;;  %v2193_v5 = vmul.f32 %v4769_v0, %v2001_v37  ;;  %v1385_v55 = vmul.f32 1.442695, %v1340_v25  ;;  %v4892_v0 = vpop.permute.xlu0 %2069 }
 0x2ca   : > { %v4896_v46 = vpop.f32.mrf.mxu2 }
 0x2cb   : > { %2595 = vst.msk [vmem:[#allocation5] sm:$0xff] %vm434_vm0, %v2562_v3  ;;  %1278 = vmax.xlane.f32.xlu2 %v1277_v31  ;;  %3722 = vpow2.f32 %v1385_v55  ;;  %v1283_v49 = vmax.f32 %v4894_v19, %v4896_v46  ;;  %v4907_v55 = vpop.permute.xlu2 %2059 }
 0x2cc   : > { %2649 = vst.msk [vmem:[#allocation3 + $0xb0] sm:$0xff] %vm636_vm1, %v4872_v42  ;;  %3724 = vpow2.f32 %v1381_v32  ;;  %v1339_v32 = vsub.f32 %v4648_v58, %v4652_v23  ;;  %v1600_v58 = vsub.f32 %v4259_v22, %v1466_v7 }
 0x2cd   : > { %5751 = vst [vmem:[#allocation53_spill] sm:$0xff] %v4896_v46 }
 0x2ce   : > { %v2395_v12 = vpop.f32.mrf.mxu3  ;;  %v1681_v2 = vmul.f32 1.442695, %v1600_v58 }
 0x2cf   : > { %v2485_v15 = vadd.f32 %v2484_v14, %v2395_v12  ;;  %v4904_v14 = vld [vmem:[#allocation3 + $0xc0] sm:$0xff] }
 0x2d0   : > { %5753 = vst [vmem:[#allocation55_spill] sm:$0xff] %v4904_v14 }
 0x2d1   : > { %v2563_v16 = vadd.f32 %v2485_v15, %v2193_v5  ;;  %v4884_v3 = vpop.eup %3722 }
 0x2d2   : > { %5749 = vst [vmem:[#allocation51_spill] sm:$0xff] %v4884_v3  ;;  %v4902_v29 = vpop.eup %3724 }
 0x2d3   : > { %2596 = vst.msk [vmem:[#allocation5 + $0x8] sm:$0xff] %vm434_vm0, %v2563_v16  ;;  %1495 = vperm.xlu0 %3665, %v4679_v47   ;;  %v4916_v16 = vld [vmem:[#allocation3 + $0xb8] sm:$0xff] }
 0x2d4   : > { %5752 = vst [vmem:[#allocation54_spill] sm:$0xff] %v4902_v29 }
 0x2db   : > { %2099 = vperm.xlu0 %3665, %v4884_v3  }
 0x2e0   : > { %v4889_v43 = vpop.permute.xlu1 %2064 }
 0x2e3   : > { %1485 = vperm.xlu2 %3664, %v4652_v23   ;;  %v2002_v23 = vld [vmem:[#allocation5 + $0x10] sm:$0xff] }
 0x2e4   : > { %v2194_v44 = vmul.f32 %v4811_v17, %v2002_v23 }
 0x2e8   : > { %v1476_v31 = vpop.permute.xlu1 %1475 }
 0x2e9   : > { %v1603_v25 = vsub.f32 %v4272_v30, %v1476_v31  ;;  %v1604_v37 = vsub.f32 %v4276_v33, %v1476_v31 }
 0x2eb   : > { %v1687_v12 = vmul.f32 1.442695, %v1603_v25  ;;  %v1689_v5 = vmul.f32 1.442695, %v1604_v37  ;;  %2089 = vperm.xlu2 %3664, %v4902_v29   ;;  %1284 = vmax.xlane.f32.xlu1 %v1283_v49  ;;  %v4926_v37 = vpop.f32.mrf.mxu1  ;;  %v4928_v49 = vpop.f32.mrf.mxu2 }
 0x2ec   : > { %v1273_v15 = vpop.xlane.xlu0 %1272  ;;  %5754 = vst [vmem:[#allocation56_spill] sm:$0xff] %v4926_v37 }
 0x2ed   : > { %3726 = vpow2.f32 %v1687_v12  ;;  %v4910_v30 = vmax.f32 %v4904_v14, %v1273_v15  ;;  %5755 = vst [vmem:[#allocation57_spill] sm:$0xff] %v4928_v49  ;;  %v1383_v15 = vmul.f32 1.442695, %v1339_v32 }
 0x2ee   : > { %3728 = vpow2.f32 %v1689_v5  ;;  %v1599_v5 = vsub.f32 %v4257_v21, %v1466_v7 }
 0x2ef   : > { %2651 = vst.msk [vmem:[#allocation3 + $0xc0] sm:$0xff] %vm636_vm1, %v4910_v30  ;;  %3730 = vpow2.f32 %v1383_v15 }
 0x2f0   : > { %v1679_v19 = vmul.f32 1.442695, %v1599_v5 }
 0x2f2   : > { %3732 = vpow2.f32 %v1679_v19 }
 0x2f3   : > { %v4914_v33 = vpop.eup %3726  ;;  %v4940_v14 = vpop.f32.mrf.mxu1  ;;  %3734 = vpow2.f32 %v1681_v2 }
 0x2f4   : > { %v4918_v51 = vpop.eup %3728  ;;  %5756 = vst [vmem:[#allocation58_spill] sm:$0xff] %v4940_v14  ;;  %v4942_v4 = vpop.f32.mrf.mxu2 }
 0x2f5   : > { %v1270_v31 = vpop.xlane.xlu2 %1269  ;;  %v4924_v25 = vadd.f32 %v4918_v51, %v4914_v33  ;;  %5757 = vst [vmem:[#allocation59_spill] sm:$0xff] %v4942_v4 }
 0x2f6   : > { %v4931_v12 = vmax.f32 %v4916_v16, %v1270_v31 }
 0x2f7   : > { %v2487_v46 = vpop.f32.mrf.mxu0 }
 0x2f8   : > { %2650 = vst.msk [vmem:[#allocation3 + $0xb8] sm:$0xff] %vm636_vm1, %v4931_v12 }
 0x2fc   : > { %v2398_v29 = vpop.f32.mrf.mxu3 }
 0x2fd   : > { %v2488_v3 = vadd.f32 %v2487_v46, %v2398_v29  ;;  %v1471_v11 = vpop.permute.xlu2 %1470  ;;  %v4949_v29 = vpop.eup %3730 }
 0x2fe   : > { %v1601_v31 = vsub.f32 %v4265_v26, %v1471_v11  ;;  %v1602_v21 = vsub.f32 %v4268_v28, %v1471_v11  ;;  %v1289_v26 = vmax.f32 %v4940_v14, %v4942_v4  ;;  %v2003_v28 = vld [vmem:[#allocation5 + $0x18] sm:$0xff]  ;;  %5758 = vst [vmem:[#allocation60_spill] sm:$0xff] %v4949_v29 }
 0x2ff   : > { %v2564_v22 = vadd.f32 %v2488_v3, %v2194_v44  ;;  %v1481_v7 = vpop.permute.xlu0 %1480  ;;  %v2489_v44 = vpop.f32.mrf.mxu0 }
 0x300   : > { %v1683_v32 = vmul.f32 1.442695, %v1601_v31  ;;  %v1685_v5 = vmul.f32 1.442695, %v1602_v21  ;;  %v1605_v15 = vsub.f32 %v4284_v35, %v1481_v7  ;;  %v1606_v17 = vsub.f32 %v4300_v40, %v1481_v7  ;;  %v4952_v35 = vpop.eup %3732 }
 0x301   : > { %2597 = vst.msk [vmem:[#allocation5 + $0x10] sm:$0xff] %vm434_vm0, %v2564_v22  ;;  %v2195_v40 = vmul.f32 %v4804_v34, %v2003_v28  ;;  %v4955_v19 = vpop.eup %3734 }
 0x302   : > { %3736 = vpow2.f32 %v1683_v32  ;;  %v1691_v11 = vmul.f32 1.442695, %v1605_v15  ;;  %v1693_v46 = vmul.f32 1.442695, %v1606_v17  ;;  %v4966_v15 = vld [vmem:[#allocation3 + $0xc8] sm:$0xff]  ;;  %v1286_v17 = vmax.f32 %v4926_v37, %v4928_v49 }
 0x303   : > { %3738 = vpow2.f32 %v1685_v5 }
 0x304   : > { %3740 = vpow2.f32 %v1691_v11  ;;  %v2400_v3 = vpop.f32.mrf.mxu3  ;;  %2094 = vperm.xlu1 %3666, %v4949_v29  }
 0x305   : > { %3742 = vpow2.f32 %v1693_v46  ;;  %v2490_v2 = vadd.f32 %v2489_v44, %v2400_v3  ;;  %1290 = vmax.xlane.f32.xlu0 %v1289_v26  ;;  %v1343_v46 = vsub.f32 %v4704_v57, %v4707_v62  ;;  %v2004_v3 = vld [vmem:[#allocation5 + $0x20] sm:$0xff] }
 0x307   : > { %v2565_v58 = vadd.f32 %v2490_v2, %v2195_v40  ;;  %v1391_v44 = vmul.f32 1.442695, %v1343_v46  ;;  %v1341_v2 = vsub.f32 %v4674_v39, %v4679_v47 }
 0x308   : > { %v3737_v23 = vpop.eup %3736 }
 0x309   : > { %v3739_v31 = vpop.eup %3738  ;;  %2598 = vst.msk [vmem:[#allocation5 + $0x18] sm:$0xff] %vm434_vm0, %v2565_v58  ;;  %v2232_v21 = vpack.c.bf16 %v3737_v23, %v4952_v35  ;;  %3744 = vpow2.f32 %v1391_v44  ;;  %v1387_v57 = vmul.f32 1.442695, %v1341_v2 }
 0x30a   : > { %v3741_v22 = vpop.eup %3740  ;;  %v2233_v7 = vpack.c.bf16 %v3739_v31, %v4955_v19  ;;  %v4960_v32 = vadd.f32 %v3739_v31, %v3737_v23  ;;  %v2196_v23 = vmul.f32 %v4821_v56, %v2004_v3 }
 0x30b   : > { %v3743_v5 = vpop.eup %3742  ;;  %2412 = vmatmul.bf16.gmra.mxu3 %v2232_v21  ;;  %v2234_v11 = vpack.c.bf16 %v3741_v22, %v4914_v33  ;;  %3746 = vpow2.f32 %v1387_v57  ;;  %v5015_v57 = vld [vmem:[#allocation3 + $0xd0] sm:$0xff] }
 0x30c   : > { %2501 = vmatmul.bf16.gmra.mxu0 %v2233_v7  ;;  %1505 = vperm.xlu1 %3666, %v4707_v62   ;;  %v4963_v34 = vadd.f32 %v3743_v5, %v3741_v22  ;;  %v2005_v22 = vld [vmem:[#allocation5 + $0x28] sm:$0xff] }
 0x30d   : > { %1840 = vadd.xlane.f32.xlu0 %v4714_v61  ;;  %v2235_v61 = vpack.c.bf16 %v3743_v5, %v4918_v51  ;;  %v4986_v51 = vpop.permute.xlu0 %2084  ;;  %v2197_v56 = vmul.f32 %v4907_v55, %v2005_v22  ;;  %v4993_v5 = vld [vmem:[#allocation3 + $0xd8] sm:$0xff] }
 0x30f   : > { %v4983_v31 = vpop.eup %3744 }
 0x313   : > { %v1276_v26 = vpop.xlane.xlu1 %1275 }
 0x314   : > { %v4971_v28 = vmax.f32 %v4966_v15, %v1276_v26  ;;  %1287 = vmax.xlane.f32.xlu2 %v1286_v17  ;;  %v4995_v17 = vpop.f32.mrf.mxu1  ;;  %v4997_v26 = vpop.f32.mrf.mxu2 }
 0x315   : > { %5759 = vst [vmem:[#allocation61_spill] sm:$0xff] %v4995_v17  ;;  %v1292_v55 = vmax.f32 %v4995_v17, %v4997_v26 }
 0x316   : > { %2652 = vst.msk [vmem:[#allocation3 + $0xc8] sm:$0xff] %vm636_vm1, %v4971_v28 }
 0x317   : > { %5760 = vst [vmem:[#allocation62_spill] sm:$0xff] %v4997_v26 }
 0x31b   : > { %2417 = vmatmul.bf16.gmra.mxu3 %v2234_v11 }
 0x31c   : > { %2506 = vmatmul.bf16.gmra.mxu0 %v2235_v61  ;;  %v5000_v61 = vpop.eup %3746 }
 0x31d   : > { %5761 = vst [vmem:[#allocation63_spill] sm:$0xff] %v5000_v61 }
 0x321   : > { %1510 = vperm.xlu0 %3665, %v4756_v38   ;;  %v2492_v40 = vpop.f32.mrf.mxu0 }
 0x326   : > { %v2403_v58 = vpop.f32.mrf.mxu3 }
 0x327   : > { %v2493_v33 = vadd.f32 %v2492_v40, %v2403_v58  ;;  %v5013_v58 = vpop.permute.xlu2 %2074 }
 0x329   : > { %v2566_v62 = vadd.f32 %v2493_v33, %v2196_v23  ;;  %2114 = vperm.xlu0 %3665, %v4983_v31   ;;  %v2494_v39 = vpop.f32.mrf.mxu0 }
 0x32b   : > { %2599 = vst.msk [vmem:[#allocation5 + $0x20] sm:$0xff] %vm434_vm0, %v2566_v62  ;;  %v4989_v21 = vpop.permute.xlu1 %2079 }
 0x32c   : > { %1500 = vperm.xlu2 %3664, %v4694_v54  }
 0x32e   : > { %v2405_v47 = vpop.f32.mrf.mxu3 }
 0x32f   : > { %v2495_v7 = vadd.f32 %v2494_v39, %v2405_v47 }
 0x331   : > { %v2567_v11 = vadd.f32 %v2495_v7, %v2197_v56  ;;  %1525 = vperm.xlu0 %3665, %v4846_v24   ;;  %v2006_v7 = vld [vmem:[#allocation5 + $0x30] sm:$0xff] }
 0x332   : > { %v1282_v46 = vpop.xlane.xlu0 %1281 }
 0x333   : > { %2600 = vst.msk [vmem:[#allocation5 + $0x28] sm:$0xff] %vm434_vm0, %v2567_v11  ;;  %v1491_v44 = vpop.permute.xlu1 %1490  ;;  %v5004_v3 = vmax.f32 %v4993_v5, %v1282_v46 }
 0x334   : > { %v1609_v40 = vsub.f32 %v4330_v48, %v1491_v44  ;;  %v1610_v2 = vsub.f32 %v4345_v50, %v1491_v44  ;;  %2104 = vperm.xlu2 %3664, %v5000_v61   ;;  %v5762_v50 = vld [vmem:[#allocation29_spill] sm:$0xff] }
 0x335   : > { %2654 = vst.msk [vmem:[#allocation3 + $0xd8] sm:$0xff] %vm636_vm1, %v5004_v3  ;;  %v1342_v47 = vsub.f32 %v5762_v50, %v4694_v54  ;;  %v2007_v61 = vld [vmem:[#allocation5 + $0x38] sm:$0xff] }
 0x336   : > { %v1699_v23 = vmul.f32 1.442695, %v1609_v40  ;;  %v1701_v33 = vmul.f32 1.442695, %v1610_v2  ;;  %1293 = vmax.xlane.f32.xlu1 %v1292_v55  ;;  %v2198_v55 = vmul.f32 %v4889_v43, %v2006_v7  ;;  %v2199_v43 = vmul.f32 %v4892_v0, %v2007_v61 }
 0x337   : > { %v1389_v46 = vmul.f32 1.442695, %v1342_v47  ;;  %v1346_v61 = vsub.f32 %v4784_v1, %v4791_v41 }
 0x338   : > { %3748 = vpow2.f32 %v1699_v23  ;;  %v5763_v23 = vld [vmem:[#allocation10_spill] sm:$0xff] }
 0x339   : > { %3750 = vpow2.f32 %v1701_v33 }
 0x33a   : > { %3752 = vpow2.f32 %v1389_v46 }
 0x33e   : > { %v3749_v62 = vpop.eup %3748  ;;  %v1279_v22 = vpop.xlane.xlu2 %1278 }
 0x33f   : > { %v3751_v39 = vpop.eup %3750  ;;  %v5018_v48 = vmax.f32 %v5015_v57, %v1279_v22  ;;  %v5764_v22 = vld [vmem:[#allocation11_spill] sm:$0xff] }
 0x340   : > { %v5022_v56 = vadd.f32 %v3751_v39, %v3749_v62  ;;  %v2497_v11 = vpop.f32.mrf.mxu0  ;;  %v5030_v14 = vpop.eup %3752 }
 0x341   : > { %2653 = vst.msk [vmem:[#allocation3 + $0xd0] sm:$0xff] %vm636_vm1, %v5018_v48 }
 0x342   : > { %5765 = vst [vmem:[#allocation29_spill] sm:$0xff] %v5030_v14 }
 0x345   : > { %v2408_v44 = vpop.f32.mrf.mxu3 }
 0x346   : > { %v2498_v40 = vadd.f32 %v2497_v11, %v2408_v44  ;;  %v1486_v2 = vpop.permute.xlu2 %1485 }
 0x347   : > { %v1607_v33 = vsub.f32 %v5763_v23, %v1486_v2  ;;  %v1608_v26 = vsub.f32 %v5764_v22, %v1486_v2 }
 0x348   : > { %v2568_v17 = vadd.f32 %v2498_v40, %v2198_v55  ;;  %v2499_v4 = vpop.f32.mrf.mxu0  ;;  %v5038_v40 = vld [vmem:[#allocation3 + $0xe0] sm:$0xff] }
 0x349   : > { %v1695_v54 = vmul.f32 1.442695, %v1607_v33  ;;  %v1697_v50 = vmul.f32 1.442695, %v1608_v26  ;;  %v5058_v33 = vld [vmem:[#allocation3 + $0xf0] sm:$0xff] }
 0x34a   : > { %2601 = vst.msk [vmem:[#allocation5 + $0x30] sm:$0xff] %vm434_vm0, %v2568_v17 }
 0x34b   : > { %3754 = vpow2.f32 %v1695_v54 }
 0x34c   : > { %3756 = vpow2.f32 %v1697_v50 }
 0x34d   : > { %v2410_v47 = vpop.f32.mrf.mxu3 }
 0x34e   : > { %v2500_v7 = vadd.f32 %v2499_v4, %v2410_v47  ;;  %v5070_v47 = vpop.permute.xlu2 %2089 }
 0x34f   : > { %2109 = vperm.xlu1 %3666, %v5030_v14   ;;  %v5773_v14 = vld [vmem:[#allocation14_spill] sm:$0xff] }
 0x350   : > { %v2569_v11 = vadd.f32 %v2500_v7, %v2199_v43  ;;  %v5768_v43 = vld [vmem:[#allocation16_spill] sm:$0xff] }
 0x351   : > { %v3755_v44 = vpop.eup %3754 }
 0x352   : > { %2602 = vst.msk [vmem:[#allocation5 + $0x38] sm:$0xff] %vm434_vm0, %v2569_v11  ;;  %v3757_v46 = vpop.eup %3756  ;;  %v2236_v26 = vpack.c.bf16 %v3749_v62, %v3755_v44  ;;  %v1397_v62 = vmul.f32 1.442695, %v1346_v61  ;;  %v5769_v11 = vld [vmem:[#allocation17_spill] sm:$0xff] }
 0x353   : > { %v2237_v55 = vpack.c.bf16 %v3751_v39, %v3757_v46  ;;  %v5035_v17 = vadd.f32 %v3757_v46, %v3755_v44  ;;  %v1496_v39 = vpop.permute.xlu0 %1495  ;;  %v5770_v46 = vld [vmem:[#allocation18_spill] sm:$0xff] }
 0x354   : > { %2422 = vmatmul.bf16.gmra.mxu3 %v2236_v26  ;;  %3758 = vpow2.f32 %v1397_v62  ;;  %v5076_v62 = vld [vmem:[#allocation3 + $0xe8] sm:$0xff] }
 0x355   : > { %2511 = vmatmul.bf16.gmra.mxu0 %v2237_v55 }
 0x35a   : > { %v5048_v2 = vpop.eup %3758 }
 0x35b   : > { %1852 = vadd.xlane.f32.xlu0 %v4800_v6  ;;  %5766 = vst [vmem:[#allocation10_spill] sm:$0xff] %v5048_v2  ;;  %v1344_v6 = vsub.f32 %v4753_v45, %v4756_v38  ;;  %v1775_v38 = vld [vmem:[#allocation4] sm:$0xff] }
 0x35c   : > { %v1807_v26 = vmul.f32 %v5770_v46, %v1775_v38 }
 0x35d   : > { %1843 = vadd.xlane.f32.xlu2 %v4728_v59  ;;  %v5053_v59 = vpop.permute.xlu0 %2099  ;;  %v1393_v23 = vmul.f32 1.442695, %v1344_v6 }
 0x35e   : > { %v1285_v4 = vpop.xlane.xlu1 %1284 }
 0x35f   : > { %v5042_v0 = vmax.f32 %v5038_v40, %v1285_v4  ;;  %3760 = vpow2.f32 %v1393_v23 }
 0x361   : > { %2655 = vst.msk [vmem:[#allocation3 + $0xe0] sm:$0xff] %vm636_vm1, %v5042_v0 }
 0x365   : > { %v5067_v45 = vpop.eup %3760 }
 0x366   : > { %5767 = vst [vmem:[#allocation11_spill] sm:$0xff] %v5067_v45 }
 0x36f   : > { %2129 = vperm.xlu0 %3665, %v5048_v2   ;;  %v5774_v2 = vld [vmem:[#allocation15_spill] sm:$0xff] }
 0x375   : > { %1515 = vperm.xlu2 %3664, %v4765_v60  }
 0x376   : > { %v5056_v1 = vpop.permute.xlu1 %2094 }
 0x377   : > { %1540 = vperm.xlu0 %3665, %v4931_v12  }
 0x378   : > { %v1291_v22 = vpop.xlane.xlu0 %1290 }
 0x379   : > { %v5062_v54 = vmax.f32 %v5058_v33, %v1291_v22  ;;  %1846 = vadd.xlane.f32.xlu1 %v4748_v63 }
 0x37b   : > { %2657 = vst.msk [vmem:[#allocation3 + $0xf0] sm:$0xff] %vm636_vm1, %v5062_v54 }
 0x37d   : > { %2119 = vperm.xlu2 %3664, %v5067_v45  }
 0x37e   : > { %v1506_v50 = vpop.permute.xlu1 %1505 }
 0x37f   : > { %v1615_v7 = vsub.f32 %v5768_v43, %v1506_v50  ;;  %v1616_v44 = vsub.f32 %v5769_v11, %v1506_v50  ;;  %v1345_v50 = vsub.f32 %v4760_v52, %v4765_v60 }
 0x380   : > { %v1841_v55 = vpop.xlane.xlu0 %1840 }
 0x381   : > { %v1711_v4 = vmul.f32 1.442695, %v1615_v7  ;;  %v1713_v63 = vmul.f32 1.442695, %v1616_v44  ;;  %v1935_v61 = vadd.f32 %v1841_v55, %v1807_v26  ;;  %v5771_v7 = vld [vmem:[#allocation12_spill] sm:$0xff]  ;;  %v5772_v44 = vld [vmem:[#allocation13_spill] sm:$0xff] }
 0x382   : > { %v1611_v11 = vsub.f32 %v5771_v7, %v1496_v39  ;;  %v1612_v46 = vsub.f32 %v5772_v44, %v1496_v39  ;;  %v2008_v55 = vld [vmem:[#allocation5 + $0x40] sm:$0xff] }
 0x383   : > { %3762 = vpow2.f32 %v1711_v4  ;;  %1968 = vst.msk [vmem:[#allocation4] sm:$0xff] %vm636_vm1, %v1935_v61  ;;  %v1395_v4 = vmul.f32 1.442695, %v1345_v50  ;;  %v2200_v52 = vmul.f32 %v5013_v58, %v2008_v55  ;;  %v2009_v58 = vld [vmem:[#allocation5 + $0x48] sm:$0xff] }
 0x384   : > { %3764 = vpow2.f32 %v1713_v63  ;;  %v1703_v63 = vmul.f32 1.442695, %v1611_v11  ;;  %v1705_v60 = vmul.f32 1.442695, %v1612_v46  ;;  %v5776_v46 = vld [vmem:[#allocation19_spill] sm:$0xff] }
 0x385   : > { %3766 = vpow2.f32 %v1395_v4 }
 0x386   : > { %3768 = vpow2.f32 %v1703_v63 }
 0x387   : > { %v1288_v6 = vpop.xlane.xlu2 %1287  ;;  %3770 = vpow2.f32 %v1705_v60 }
 0x388   : > { %v5079_v23 = vmax.f32 %v5076_v62, %v1288_v6 }
 0x389   : > { %v5081_v22 = vpop.eup %3762  ;;  %v2502_v38 = vpop.f32.mrf.mxu0 }
 0x38a   : > { %v5085_v43 = vpop.eup %3764  ;;  %2656 = vst.msk [vmem:[#allocation3 + $0xe8] sm:$0xff] %vm636_vm1, %v5079_v23 }
 0x38b   : > { %v5093_v26 = vadd.f32 %v5085_v43, %v5081_v22  ;;  %v5102_v4 = vpop.eup %3766 }
 0x38e   : > { %v2413_v61 = vpop.f32.mrf.mxu3 }
 0x38f   : > { %v2503_v6 = vadd.f32 %v2502_v38, %v2413_v61  ;;  %v1501_v45 = vpop.permute.xlu2 %1500  ;;  %v5775_v38 = vld [vmem:[#allocation20_spill] sm:$0xff] }
 0x390   : > { %v1613_v7 = vsub.f32 %v5773_v14, %v1501_v45  ;;  %v1614_v29 = vsub.f32 %v5774_v2, %v1501_v45 }
 0x391   : > { %v2570_v49 = vadd.f32 %v2503_v6, %v2200_v52  ;;  %v2504_v37 = vpop.f32.mrf.mxu0 }
 0x392   : > { %v1707_v39 = vmul.f32 1.442695, %v1613_v7  ;;  %v1709_v44 = vmul.f32 1.442695, %v1614_v29  ;;  %1520 = vperm.xlu1 %3666, %v4791_v41   ;;  %v2201_v29 = vmul.f32 %v4989_v21, %v2009_v58  ;;  %v5105_v41 = vpop.eup %3768  ;;  %v2010_v7 = vld [vmem:[#allocation5 + $0x50] sm:$0xff] }
 0x393   : > { %2603 = vst.msk [vmem:[#allocation5 + $0x40] sm:$0xff] %vm434_vm0, %v2570_v49  ;;  %v1511_v50 = vpop.permute.xlu0 %1510  ;;  %v5107_v49 = vpop.eup %3770 }
 0x394   : > { %3772 = vpow2.f32 %v1707_v39  ;;  %v1617_v11 = vsub.f32 %v5775_v38, %v1511_v50  ;;  %v1618_v14 = vsub.f32 %v5776_v46, %v1511_v50  ;;  %v2202_v38 = vmul.f32 %v4986_v51, %v2010_v7  ;;  %v5124_v51 = vld [vmem:[#allocation3 + $0xf8] sm:$0xff] }
 0x395   : > { %3774 = vpow2.f32 %v1709_v44 }
 0x396   : > { %v1715_v2 = vmul.f32 1.442695, %v1617_v11  ;;  %v1717_v45 = vmul.f32 1.442695, %v1618_v14  ;;  %v2415_v55 = vpop.f32.mrf.mxu3 }
 0x397   : > { %v2505_v63 = vadd.f32 %v2504_v37, %v2415_v55 }
 0x398   : > { %3776 = vpow2.f32 %v1715_v2  ;;  %v2011_v2 = vld [vmem:[#allocation5 + $0x58] sm:$0xff] }
 0x399   : > { %3778 = vpow2.f32 %v1717_v45  ;;  %v2571_v61 = vadd.f32 %v2505_v63, %v2201_v29  ;;  %v2507_v39 = vpop.f32.mrf.mxu0  ;;  %v1349_v45 = vsub.f32 %v4868_v20, %v4872_v42  ;;  %v2203_v63 = vmul.f32 %v5070_v47, %v2011_v2 }
 0x39a   : > { %v3773_v52 = vpop.eup %3772  ;;  %2124 = vperm.xlu1 %3666, %v5102_v4   ;;  %v1347_v47 = vsub.f32 %v4841_v27, %v4846_v24  ;;  %v1776_v27 = vld [vmem:[#allocation4 + $0x8] sm:$0xff] }
 0x39b   : > { %v3775_v60 = vpop.eup %3774  ;;  %2604 = vst.msk [vmem:[#allocation5 + $0x48] sm:$0xff] %vm434_vm0, %v2571_v61  ;;  %v2238_v6 = vpack.c.bf16 %v3773_v52, %v5105_v41  ;;  %v5777_v24 = vld [vmem:[#allocation27_spill] sm:$0xff] }
 0x39c   : > { %v2239_v21 = vpack.c.bf16 %v3775_v60, %v5107_v49  ;;  %v5113_v37 = vadd.f32 %v3775_v60, %v3773_v52 }
 0x39d   : > { %2427 = vmatmul.bf16.gmra.mxu3 %v2238_v6  ;;  %v1403_v6 = vmul.f32 1.442695, %v1349_v45 }
 0x39e   : > { %v3777_v44 = vpop.eup %3776  ;;  %2516 = vmatmul.bf16.gmra.mxu0 %v2239_v21  ;;  %v2418_v50 = vpop.f32.mrf.mxu3 }
 0x39f   : > { %v3779_v58 = vpop.eup %3778  ;;  %v2508_v11 = vadd.f32 %v2507_v39, %v2418_v50  ;;  %v2240_v7 = vpack.c.bf16 %v3777_v44, %v5081_v22  ;;  %3780 = vpow2.f32 %v1403_v6  ;;  %v1399_v39 = vmul.f32 1.442695, %v1347_v47  ;;  %v5139_v21 = vpop.permute.xlu0 %2114  ;;  %v1779_v50 = vld [vmem:[#allocation4 + $0x20] sm:$0xff] }
 0x3a0   : > { %v5116_v46 = vadd.f32 %v3779_v58, %v3777_v44  ;;  %v2241_v20 = vpack.c.bf16 %v3779_v58, %v5085_v43  ;;  %v5149_v44 = vpop.permute.xlu2 %2104  ;;  %v1811_v58 = vmul.f32 %v5777_v24, %v1779_v50 }
 0x3a1   : > { %v2572_v14 = vadd.f32 %v2508_v11, %v2202_v38  ;;  %1861 = vadd.xlane.f32.xlu0 %v4843_v13  ;;  %v2509_v55 = vpop.f32.mrf.mxu0  ;;  %3782 = vpow2.f32 %v1399_v39  ;;  %v5780_v39 = vld [vmem:[#allocation21_spill] sm:$0xff] }
 0x3a3   : > { %2605 = vst.msk [vmem:[#allocation5 + $0x50] sm:$0xff] %vm434_vm0, %v2572_v14  ;;  %v5778_v14 = vld [vmem:[#allocation24_spill] sm:$0xff] }
 0x3a4   : > { %v1808_v2 = vmul.f32 %v5778_v14, %v1776_v27 }
 0x3a6   : > { %v2420_v29 = vpop.f32.mrf.mxu3  ;;  %1849 = vadd.xlane.f32.xlu2 %v4796_v10  ;;  %v5134_v10 = vpop.eup %3780 }
 0x3a7   : > { %v2510_v61 = vadd.f32 %v2509_v55, %v2420_v29  ;;  %v5144_v22 = vpop.eup %3782  ;;  %v5146_v43 = vpop.permute.xlu0 %1525  ;;  %v1348_v55 = vsub.f32 %v4832_v18, %v4835_v53  ;;  %v2012_v29 = vld [vmem:[#allocation5 + $0x60] sm:$0xff]  ;;  %v2013_v18 = vld [vmem:[#allocation5 + $0x68] sm:$0xff] }
 0x3a8   : > { %v2204_v6 = vmul.f32 %v5056_v1, %v2012_v29  ;;  %v2205_v1 = vmul.f32 %v5053_v59, %v2013_v18  ;;  %v1352_v59 = vsub.f32 %v4966_v15, %v4971_v28 }
 0x3a9   : > { %v2573_v52 = vadd.f32 %v2510_v61, %v2203_v63  ;;  %v1294_v60 = vpop.xlane.xlu1 %1293  ;;  %v1401_v61 = vmul.f32 1.442695, %v1348_v55 }
 0x3aa   : > { %v5127_v13 = vmax.f32 %v5124_v51, %v1294_v60 }
 0x3ab   : > { %2606 = vst.msk [vmem:[#allocation5 + $0x58] sm:$0xff] %vm434_vm0, %v2573_v52  ;;  %3784 = vpow2.f32 %v1401_v61 }
 0x3ac   : > { %2658 = vst.msk [vmem:[#allocation3 + $0xf8] sm:$0xff] %vm636_vm1, %v5127_v13 }
 0x3ad   : > { %2432 = vmatmul.bf16.gmra.mxu3 %v2240_v7 }
 0x3ae   : > { %2521 = vmatmul.bf16.gmra.mxu0 %v2241_v20  ;;  %v5779_v20 = vld [vmem:[#allocation22_spill] sm:$0xff] }
 0x3b1   : > { %v5163_v14 = vpop.eup %3784 }
 0x3b5   : > { %2144 = vperm.xlu0 %3665, %v5134_v10  }
 0x3bd   : > { %1555 = vperm.xlu0 %3665, %v5018_v48  }
 0x3be   : > { %1530 = vperm.xlu2 %3664, %v4835_v53  }
 0x3c1   : > { %v5165_v55 = vpop.permute.xlu1 %2109 }
 0x3c4   : > { %1855 = vadd.xlane.f32.xlu1 %v4830_v9 }
 0x3c6   : > { %2134 = vperm.xlu2 %3664, %v5144_v22  }
 0x3ce   : > { %v1853_v38 = vpop.xlane.xlu0 %1852 }
 0x3cf   : > { %v1939_v11 = vadd.f32 %v1853_v38, %v1811_v58 }
 0x3d0   : > { %v1844_v45 = vpop.xlane.xlu2 %1843 }
 0x3d1   : > { %1972 = vst.msk [vmem:[#allocation4 + $0x20] sm:$0xff] %vm636_vm1, %v1939_v11  ;;  %v1936_v9 = vadd.f32 %v1844_v45, %v1808_v2 }
 0x3d2   : > { %v2512_v63 = vpop.f32.mrf.mxu0 }
 0x3d3   : > { %1969 = vst.msk [vmem:[#allocation4 + $0x8] sm:$0xff] %vm636_vm1, %v1936_v9 }
 0x3d7   : > { %v2423_v52 = vpop.f32.mrf.mxu3 }
 0x3d8   : > { %v1516_v60 = vpop.permute.xlu2 %1515  ;;  %v2513_v7 = vadd.f32 %v2512_v63, %v2423_v52  ;;  %v5781_v63 = vld [vmem:[#allocation26_spill] sm:$0xff] }
 0x3d9   : > { %v1619_v47 = vsub.f32 %v5779_v20, %v1516_v60  ;;  %v1620_v50 = vsub.f32 %v5780_v39, %v1516_v60  ;;  %v5782_v39 = vld [vmem:[#allocation25_spill] sm:$0xff] }
 0x3da   : > { %v2574_v27 = vadd.f32 %v2513_v7, %v2204_v6  ;;  %v2514_v53 = vpop.f32.mrf.mxu0  ;;  %v1409_v6 = vmul.f32 1.442695, %v1352_v59 }
 0x3db   : > { %v1719_v24 = vmul.f32 1.442695, %v1619_v47  ;;  %v1721_v58 = vmul.f32 1.442695, %v1620_v50 }
 0x3dc   : > { %2607 = vst.msk [vmem:[#allocation5 + $0x60] sm:$0xff] %vm434_vm0, %v2574_v27  ;;  %v5783_v27 = vld [vmem:[#allocation23_spill] sm:$0xff] }
 0x3dd   : > { %3786 = vpow2.f32 %v1719_v24  ;;  %1535 = vperm.xlu1 %3666, %v4872_v42   ;;  %v1777_v42 = vld [vmem:[#allocation4 + $0x10] sm:$0xff] }
 0x3de   : > { %3788 = vpow2.f32 %v1721_v58  ;;  %v1809_v61 = vmul.f32 %v5781_v63, %v1777_v42 }
 0x3df   : > { %v2425_v38 = vpop.f32.mrf.mxu3  ;;  %3790 = vpow2.f32 %v1409_v6 }
 0x3e0   : > { %v2515_v11 = vadd.f32 %v2514_v53, %v2425_v38 }
 0x3e1   : > { %v5182_v20 = vpop.permute.xlu0 %2129 }
 0x3e2   : > { %v2575_v45 = vadd.f32 %v2515_v11, %v2205_v1  ;;  %v1782_v11 = vld [vmem:[#allocation4 + $0x38] sm:$0xff] }
 0x3e3   : > { %v3787_v2 = vpop.eup %3786 }
 0x3e4   : > { %v3789_v9 = vpop.eup %3788  ;;  %2608 = vst.msk [vmem:[#allocation5 + $0x68] sm:$0xff] %vm434_vm0, %v2575_v45  ;;  %v5195_v45 = vpop.permute.xlu2 %2119 }
 0x3e5   : > { %2139 = vperm.xlu1 %3666, %v5163_v14   ;;  %v5169_v29 = vadd.f32 %v3789_v9, %v3787_v2  ;;  %v5177_v7 = vpop.eup %3790 }
 0x3e7   : > { %1870 = vadd.xlane.f32.xlu0 %v4924_v25  ;;  %v1350_v25 = vsub.f32 %v4916_v16, %v4931_v12  ;;  %v1863_v16 = vadd.f32 %v4955_v19, %v4952_v35  ;;  %v1778_v19 = vld [vmem:[#allocation4 + $0x18] sm:$0xff] }
 0x3e9   : > { %v1405_v15 = vmul.f32 1.442695, %v1350_v25  ;;  %v5188_v18 = vpop.permute.xlu0 %1540 }
 0x3eb   : > { %3792 = vpow2.f32 %v1405_v15  ;;  %v5785_v15 = vld [vmem:[#allocation31_spill] sm:$0xff] }
 0x3ec   : > { %v1847_v52 = vpop.xlane.xlu1 %1846 }
 0x3ed   : > { %v1937_v60 = vadd.f32 %v1847_v52, %v1809_v61  ;;  %v1814_v61 = vmul.f32 %v4735_v36, %v1782_v11  ;;  %v5784_v52 = vld [vmem:[#allocation28_spill] sm:$0xff] }
 0x3ef   : > { %1970 = vst.msk [vmem:[#allocation4 + $0x10] sm:$0xff] %vm636_vm1, %v1937_v60  ;;  %1858 = vadd.xlane.f32.xlu2 %v4866_v8  ;;  %v1810_v60 = vmul.f32 %v5784_v52, %v1778_v19 }
 0x3f1   : > { %v5192_v12 = vpop.eup %3792 }
 0x3fb   : > { %2159 = vperm.xlu0 %3665, %v5177_v7  }
 0x403   : > { %1570 = vperm.xlu0 %3665, %v5079_v23  }
 0x404   : > { %v1521_v47 = vpop.permute.xlu1 %1520 }
 0x405   : > { %v1621_v50 = vsub.f32 %v5782_v39, %v1521_v47  ;;  %v1622_v24 = vsub.f32 %v5783_v27, %v1521_v47  ;;  %v1623_v47 = vsub.f32 %v5785_v15, %v5146_v43 }
 0x407   : > { %v1723_v8 = vmul.f32 1.442695, %v1621_v50  ;;  %v1725_v58 = vmul.f32 1.442695, %v1622_v24  ;;  %1545 = vperm.xlu2 %3664, %v4910_v30   ;;  %v2014_v50 = vld [vmem:[#allocation5 + $0x70] sm:$0xff]  ;;  %v5787_v24 = vld [vmem:[#allocation55_spill] sm:$0xff] }
 0x408   : > { %v1727_v36 = vmul.f32 1.442695, %v1623_v47 }
 0x409   : > { %3794 = vpow2.f32 %v1723_v8  ;;  %v1351_v8 = vsub.f32 %v5787_v24, %v4910_v30 }
 0x40a   : > { %3796 = vpow2.f32 %v1725_v58  ;;  %v2206_v58 = vmul.f32 %v5149_v44, %v2014_v50  ;;  %v2016_v50 = vld [vmem:[#allocation5 + $0x80] sm:$0xff] }
 0x40b   : > { %3798 = vpow2.f32 %v1727_v36  ;;  %v1407_v52 = vmul.f32 1.442695, %v1351_v8 }
 0x40c   : > { %v5227_v24 = vpop.permute.xlu1 %2124 }
 0x40f   : > { %v3795_v53 = vpop.eup %3794  ;;  %2149 = vperm.xlu2 %3664, %v5192_v12   ;;  %1864 = vadd.xlane.f32.xlu1 %v1863_v16 }
 0x410   : > { %v3797_v38 = vpop.eup %3796  ;;  %v2242_v1 = vpack.c.bf16 %v3795_v53, %v3787_v2 }
 0x411   : > { %v2243_v42 = vpack.c.bf16 %v3797_v38, %v3789_v9  ;;  %v5197_v63 = vadd.f32 %v3797_v38, %v3795_v53  ;;  %v5786_v9 = vld [vmem:[#allocation30_spill] sm:$0xff] }
 0x412   : > { %2437 = vmatmul.bf16.gmra.mxu3 %v2242_v1  ;;  %v1624_v39 = vsub.f32 %v5786_v9, %v5146_v43  ;;  %v5788_v1 = vld [vmem:[#allocation33_spill] sm:$0xff] }
 0x413   : > { %2526 = vmatmul.bf16.gmra.mxu0 %v2243_v42  ;;  %v5789_v42 = vld [vmem:[#allocation32_spill] sm:$0xff] }
 0x414   : > { %v1862_v59 = vpop.xlane.xlu0 %1861  ;;  %v1729_v16 = vmul.f32 1.442695, %v1624_v39 }
 0x415   : > { %v1942_v35 = vadd.f32 %v1862_v59, %v1814_v61 }
 0x416   : > { %3800 = vpow2.f32 %v1729_v16  ;;  %v1355_v16 = vsub.f32 %v5038_v40, %v5042_v0 }
 0x417   : > { %1975 = vst.msk [vmem:[#allocation4 + $0x38] sm:$0xff] %vm636_vm1, %v1942_v35 }
 0x419   : > { %v1850_v6 = vpop.xlane.xlu2 %1849 }
 0x41a   : > { %v1938_v25 = vadd.f32 %v1850_v6, %v1810_v60  ;;  %v2015_v60 = vld [vmem:[#allocation5 + $0x78] sm:$0xff] }
 0x41b   : > { %v2517_v2 = vpop.f32.mrf.mxu0  ;;  %v2207_v44 = vmul.f32 %v5165_v55, %v2015_v60 }
 0x41c   : > { %1971 = vst.msk [vmem:[#allocation4 + $0x18] sm:$0xff] %vm636_vm1, %v1938_v25  ;;  %v5215_v25 = vpop.eup %3798 }
 0x420   : > { %v2428_v27 = vpop.f32.mrf.mxu3 }
 0x421   : > { %v2518_v53 = vadd.f32 %v2517_v2, %v2428_v27  ;;  %v1531_v38 = vpop.permute.xlu2 %1530  ;;  %v5217_v2 = vpop.eup %3800 }
 0x422   : > { %v1625_v11 = vsub.f32 %v5788_v1, %v1531_v38  ;;  %v1626_v61 = vsub.f32 %v5789_v42, %v1531_v38  ;;  %v1780_v38 = vld [vmem:[#allocation4 + $0x28] sm:$0xff]  ;;  %v1415_v1 = vmul.f32 1.442695, %v1355_v16  ;;  %v5790_v42 = vld [vmem:[#allocation36_spill] sm:$0xff] }
 0x423   : > { %v2576_v59 = vadd.f32 %v2518_v53, %v2206_v58  ;;  %v2519_v43 = vpop.f32.mrf.mxu0  ;;  %v2208_v58 = vmul.f32 %v5139_v21, %v2016_v50 }
 0x424   : > { %v1731_v35 = vmul.f32 1.442695, %v1625_v11  ;;  %v1733_v19 = vmul.f32 1.442695, %v1626_v61  ;;  %v2017_v11 = vld [vmem:[#allocation5 + $0x88] sm:$0xff]  ;;  %v1812_v61 = vmul.f32 %v5790_v42, %v1780_v38 }
 0x425   : > { %2609 = vst.msk [vmem:[#allocation5 + $0x70] sm:$0xff] %vm434_vm0, %v2576_v59  ;;  %v2209_v21 = vmul.f32 %v5195_v45, %v2017_v11  ;;  %v5792_v45 = vld [vmem:[#allocation38_spill] sm:$0xff] }
 0x426   : > { %3802 = vpow2.f32 %v1731_v35 }
 0x427   : > { %3804 = vpow2.f32 %v1733_v19 }
 0x428   : > { %v2430_v30 = vpop.f32.mrf.mxu3  ;;  %1550 = vperm.xlu1 %3666, %v4971_v28   ;;  %3806 = vpow2.f32 %v1407_v52 }
 0x429   : > { %v2520_v6 = vadd.f32 %v2519_v43, %v2430_v30  ;;  %3808 = vpow2.f32 %v1415_v1  ;;  %v5242_v30 = vpop.permute.xlu0 %2144  ;;  %v5795_v1 = vld [vmem:[#allocation42_spill] sm:$0xff] }
 0x42b   : > { %v2577_v15 = vadd.f32 %v2520_v6, %v2207_v44  ;;  %v2522_v36 = vpop.f32.mrf.mxu0  ;;  %v1353_v44 = vsub.f32 %v5015_v57, %v5018_v48 }
 0x42c   : > { %v3803_v47 = vpop.eup %3802 }
 0x42d   : > { %v3805_v9 = vpop.eup %3804  ;;  %2610 = vst.msk [vmem:[#allocation5 + $0x78] sm:$0xff] %vm434_vm0, %v2577_v15  ;;  %1879 = vadd.xlane.f32.xlu0 %v5022_v56  ;;  %v2244_v39 = vpack.c.bf16 %v3803_v47, %v5215_v25  ;;  %v1630_v15 = vsub.f32 %v5792_v45, %v5188_v18 }
 0x42e   : > { %v2245_v28 = vpack.c.bf16 %v3805_v9, %v5217_v2  ;;  %v5223_v27 = vadd.f32 %v3805_v9, %v3803_v47  ;;  %v5225_v55 = vpop.eup %3806  ;;  %v1411_v47 = vmul.f32 1.442695, %v1353_v44  ;;  %v5796_v44 = vld [vmem:[#allocation39_spill] sm:$0xff] }
 0x42f   : > { %2442 = vmatmul.bf16.gmra.mxu3 %v2244_v39  ;;  %v5239_v60 = vpop.eup %3808  ;;  %v1741_v39 = vmul.f32 1.442695, %v1630_v15  ;;  %v5797_v15 = vld [vmem:[#allocation41_spill] sm:$0xff] }
 0x430   : > { %2531 = vmatmul.bf16.gmra.mxu0 %v2245_v28  ;;  %v2433_v8 = vpop.f32.mrf.mxu3  ;;  %2154 = vperm.xlu1 %3666, %v5225_v55   ;;  %3810 = vpow2.f32 %v1411_v47 }
 0x431   : > { %v2523_v56 = vadd.f32 %v2522_v36, %v2433_v8  ;;  %v5793_v36 = vld [vmem:[#allocation34_spill] sm:$0xff]  ;;  %v5794_v8 = vld [vmem:[#allocation35_spill] sm:$0xff] }
 0x433   : > { %v2578_v53 = vadd.f32 %v2523_v56, %v2208_v58  ;;  %v2524_v35 = vpop.f32.mrf.mxu0  ;;  %v5253_v56 = vpop.permute.xlu0 %1555 }
 0x435   : > { %2611 = vst.msk [vmem:[#allocation5 + $0x80] sm:$0xff] %vm434_vm0, %v2578_v53 }
 0x436   : > { %v5255_v16 = vpop.eup %3810 }
 0x437   : > { %v1856_v59 = vpop.xlane.xlu1 %1855 }
 0x438   : > { %v1940_v19 = vadd.f32 %v1856_v59, %v1812_v61  ;;  %1867 = vadd.xlane.f32.xlu2 %v4960_v32  ;;  %v2435_v43 = vpop.f32.mrf.mxu3  ;;  %v5791_v32 = vld [vmem:[#allocation37_spill] sm:$0xff]  ;;  %v5263_v61 = vpop.permute.xlu2 %2134 }
 0x439   : > { %v2525_v52 = vadd.f32 %v2524_v35, %v2435_v43  ;;  %v1629_v6 = vsub.f32 %v5791_v32, %v5188_v18  ;;  %v1785_v18 = vld [vmem:[#allocation4 + $0x50] sm:$0xff] }
 0x43a   : > { %1973 = vst.msk [vmem:[#allocation4 + $0x28] sm:$0xff] %vm636_vm1, %v1940_v19  ;;  %v1817_v11 = vmul.f32 %v5795_v1, %v1785_v18 }
 0x43b   : > { %v2579_v40 = vadd.f32 %v2525_v52, %v2209_v21  ;;  %v1739_v9 = vmul.f32 1.442695, %v1629_v6 }
 0x43d   : > { %2612 = vst.msk [vmem:[#allocation5 + $0x88] sm:$0xff] %vm434_vm0, %v2579_v40  ;;  %3812 = vpow2.f32 %v1739_v9  ;;  %v1781_v40 = vld [vmem:[#allocation4 + $0x30] sm:$0xff] }
 0x43e   : > { %3814 = vpow2.f32 %v1741_v39  ;;  %v1813_v32 = vmul.f32 %v5796_v44, %v1781_v40  ;;  %v5798_v9 = vld [vmem:[#allocation40_spill] sm:$0xff] }
 0x43f   : > { %v2018_v40 = vld [vmem:[#allocation5 + $0x90] sm:$0xff] }
 0x441   : > { %2174 = vperm.xlu0 %3665, %v5239_v60  }
 0x443   : > { %v5257_v53 = vpop.eup %3812 }
 0x444   : > { %v5260_v38 = vpop.eup %3814 }
 0x44f   : > { %v1536_v50 = vpop.permute.xlu1 %1535 }
 0x450   : > { %v1627_v28 = vsub.f32 %v5793_v36, %v1536_v50  ;;  %v1628_v58 = vsub.f32 %v5794_v8, %v1536_v50  ;;  %1560 = vperm.xlu2 %3664, %v5004_v3   ;;  %v1354_v50 = vsub.f32 %v4993_v5, %v5004_v3  ;;  %v2664_v3 = vld [vmem:[#allocation4 + $0x10] sm:$0xff] }
 0x452   : > { %v1735_v57 = vmul.f32 1.442695, %v1627_v28  ;;  %v1737_v48 = vmul.f32 1.442695, %v1628_v58  ;;  %v1413_v8 = vmul.f32 1.442695, %v1354_v50  ;;  %v1358_v58 = vsub.f32 %v5124_v51, %v5127_v13 }
 0x453   : > { %v1783_v51 = vld [vmem:[#allocation4 + $0x40] sm:$0xff] }
 0x454   : > { %3816 = vpow2.f32 %v1735_v57  ;;  %v1421_v57 = vmul.f32 1.442695, %v1358_v58 }
 0x455   : > { %3818 = vpow2.f32 %v1737_v48 }
 0x457   : > { %v5285_v5 = vpop.permute.xlu1 %2139 }
 0x458   : > { %2164 = vperm.xlu2 %3664, %v5255_v16  }
 0x45a   : > { %v3817_v42 = vpop.eup %3816  ;;  %v1871_v59 = vpop.xlane.xlu0 %1870  ;;  %1873 = vadd.xlane.f32.xlu1 %v4963_v34 }
 0x45b   : > { %v3819_v35 = vpop.eup %3818  ;;  %v1945_v19 = vadd.f32 %v1871_v59, %v1817_v11  ;;  %v2246_v43 = vpack.c.bf16 %v5257_v53, %v3817_v42 }
 0x45c   : > { %v2247_v21 = vpack.c.bf16 %v5260_v38, %v3819_v35  ;;  %v5268_v52 = vadd.f32 %v3819_v35, %v3817_v42 }
 0x45d   : > { %1978 = vst.msk [vmem:[#allocation4 + $0x50] sm:$0xff] %vm636_vm1, %v1945_v19  ;;  %2447 = vmatmul.bf16.gmra.mxu3 %v2246_v43 }
 0x45e   : > { %2536 = vmatmul.bf16.gmra.mxu0 %v2247_v21  ;;  %v1356_v21 = vsub.f32 %v5076_v62, %v5079_v23  ;;  %v5801_v62 = vld [vmem:[#allocation44_spill] sm:$0xff] }
 0x462   : > { %v1859_v6 = vpop.xlane.xlu2 %1858 }
 0x463   : > { %v1941_v45 = vadd.f32 %v1859_v6, %v1813_v32  ;;  %v1417_v6 = vmul.f32 1.442695, %v1356_v21 }
 0x465   : > { %1974 = vst.msk [vmem:[#allocation4 + $0x30] sm:$0xff] %vm636_vm1, %v1941_v45  ;;  %v2210_v45 = vmul.f32 %v5227_v24, %v2018_v40 }
 0x46a   : > { %v1546_v34 = vpop.permute.xlu2 %1545 }
 0x46b   : > { %v1631_v47 = vsub.f32 %v5797_v15, %v1546_v34  ;;  %v1632_v39 = vsub.f32 %v5798_v9, %v1546_v34  ;;  %1888 = vadd.xlane.f32.xlu0 %v5093_v26  ;;  %v2019_v9 = vld [vmem:[#allocation5 + $0x98] sm:$0xff] }
 0x46d   : > { %v1743_v36 = vmul.f32 1.442695, %v1631_v47  ;;  %v1745_v28 = vmul.f32 1.442695, %v1632_v39  ;;  %v5294_v43 = vpop.permute.xlu0 %2159  ;;  %v5800_v39 = vld [vmem:[#allocation43_spill] sm:$0xff] }
 0x46f   : > { %3820 = vpow2.f32 %v1743_v36  ;;  %v1788_v36 = vld [vmem:[#allocation4 + $0x68] sm:$0xff] }
 0x470   : > { %3822 = vpow2.f32 %v1745_v28 }
 0x471   : > { %3824 = vpow2.f32 %v1413_v8 }
 0x472   : > { %3826 = vpow2.f32 %v1421_v57  ;;  %v2211_v57 = vmul.f32 %v5182_v20, %v2019_v9  ;;  %v5311_v21 = vpop.permute.xlu2 %2149  ;;  %v1881_v20 = vadd.f32 %v5107_v49, %v5105_v41  ;;  %v5805_v41 = vld [vmem:[#allocation46_spill] sm:$0xff] }
 0x473   : > { %1565 = vperm.xlu1 %3666, %v5042_v0   ;;  %3828 = vrcp.f32 %v2664_v3  ;;  %v5799_v0 = vld [vmem:[#allocation45_spill] sm:$0xff]  ;;  %v1636_v49 = vsub.f32 %v5805_v41, %v5253_v56 }
 0x474   : > { %v1815_v42 = vmul.f32 %v5799_v0, %v1783_v51  ;;  %3830 = vpow2.f32 %v1417_v6  ;;  %v5802_v51 = vld [vmem:[#allocation51_spill] sm:$0xff] }
 0x475   : > { %v3821_v48 = vpop.eup %3820  ;;  %v5299_v34 = vpop.permute.xlu0 %1570  ;;  %v1820_v0 = vmul.f32 %v5802_v51, %v1788_v36  ;;  %v5807_v51 = vld [vmem:[#allocation49_spill] sm:$0xff] }
 0x476   : > { %v3823_v18 = vpop.eup %3822 }
 0x477   : > { %v5281_v1 = vadd.f32 %v3823_v18, %v3821_v48  ;;  %v5283_v26 = vpop.eup %3824 }
 0x478   : > { %v5288_v11 = vpop.eup %3826 }
 0x479   : > { %v3829_v19 = vpop.eup %3828 }
 0x47b   : > { %2169 = vperm.xlu1 %3666, %v5283_v26  }
 0x47f   : > { %2189 = vperm.xlu0 %3665, %v5288_v11  }
 0x481   : > { %1876 = vadd.xlane.f32.xlu2 %v5035_v17 }
 0x482   : > { %v1865_v59 = vpop.xlane.xlu1 %1864 }
 0x483   : > { %v1943_v35 = vadd.f32 %v1865_v59, %v1815_v42  ;;  %v5307_v42 = vpop.eup %3830 }
 0x485   : > { %1976 = vst.msk [vmem:[#allocation4 + $0x40] sm:$0xff] %vm636_vm1, %v1943_v35 }
 0x487   : > { %2770 = vperm.xlu0 %3665, %v3829_v19  }
 0x490   : > { %v2527_v44 = vpop.f32.mrf.mxu0 }
 0x495   : > { %v2438_v32 = vpop.f32.mrf.mxu3 }
 0x496   : > { %v2528_v17 = vadd.f32 %v2527_v44, %v2438_v32 }
 0x498   : > { %v2580_v15 = vadd.f32 %v2528_v17, %v2210_v45  ;;  %v2529_v28 = vpop.f32.mrf.mxu0  ;;  %v1784_v45 = vld [vmem:[#allocation4 + $0x48] sm:$0xff] }
 0x499   : > { %1575 = vperm.xlu2 %3664, %v5062_v54  }
 0x49a   : > { %2613 = vst.msk [vmem:[#allocation5 + $0x90] sm:$0xff] %vm434_vm0, %v2580_v15  ;;  %v1551_v47 = vpop.permute.xlu1 %1550  ;;  %v5803_v15 = vld [vmem:[#allocation48_spill] sm:$0xff] }
 0x49b   : > { %v1633_v50 = vsub.f32 %v5800_v39, %v1551_v47  ;;  %v1634_v23 = vsub.f32 %v5801_v62, %v1551_v47  ;;  %v1816_v47 = vmul.f32 %v5803_v15, %v1784_v45 }
 0x49d   : > { %v1747_v8 = vmul.f32 1.442695, %v1633_v50  ;;  %v1749_v58 = vmul.f32 1.442695, %v1634_v23  ;;  %v2440_v24 = vpop.f32.mrf.mxu3  ;;  %v5804_v50 = vld [vmem:[#allocation47_spill] sm:$0xff]  ;;  %v2020_v23 = vld [vmem:[#allocation5 + $0xa0] sm:$0xff] }
 0x49e   : > { %v2530_v3 = vadd.f32 %v2529_v28, %v2440_v24  ;;  %v1635_v62 = vsub.f32 %v5804_v50, %v5253_v56  ;;  %v2212_v28 = vmul.f32 %v5263_v61, %v2020_v23  ;;  %v1357_v56 = vsub.f32 %v5058_v33, %v5062_v54 }
 0x49f   : > { %3832 = vpow2.f32 %v1747_v8  ;;  %v1753_v8 = vmul.f32 1.442695, %v1636_v49  ;;  %v5808_v49 = vld [vmem:[#allocation54_spill] sm:$0xff] }
 0x4a0   : > { %3834 = vpow2.f32 %v1749_v58  ;;  %v2581_v59 = vadd.f32 %v2530_v3, %v2211_v57  ;;  %v1880_v35 = vpop.xlane.xlu0 %1879  ;;  %v5806_v57 = vld [vmem:[#allocation50_spill] sm:$0xff] }
 0x4a1   : > { %v1948_v19 = vadd.f32 %v1880_v35, %v1820_v0  ;;  %2179 = vperm.xlu2 %3664, %v5307_v42  }
 0x4a2   : > { %2614 = vst.msk [vmem:[#allocation5 + $0x98] sm:$0xff] %vm434_vm0, %v2581_v59  ;;  %v5344_v41 = vpop.permute.xlu1 %2154 }
 0x4a3   : > { %1981 = vst.msk [vmem:[#allocation4 + $0x68] sm:$0xff] %vm636_vm1, %v1948_v19 }
 0x4a5   : > { %v3833_v40 = vpop.eup %3832  ;;  %1882 = vadd.xlane.f32.xlu1 %v1881_v20 }
 0x4a6   : > { %v3835_v44 = vpop.eup %3834  ;;  %v2248_v32 = vpack.c.bf16 %v3833_v40, %v3821_v48 }
 0x4a7   : > { %v2249_v6 = vpack.c.bf16 %v3835_v44, %v3823_v18  ;;  %v5316_v17 = vadd.f32 %v3835_v44, %v3833_v40  ;;  %v1751_v18 = vmul.f32 1.442695, %v1635_v62  ;;  %v1419_v40 = vmul.f32 1.442695, %v1357_v56  ;;  %v5810_v56 = vld [vmem:[#allocation57_spill] sm:$0xff] }
 0x4a8   : > { %2452 = vmatmul.bf16.gmra.mxu3 %v2248_v32 }
 0x4a9   : > { %2541 = vmatmul.bf16.gmra.mxu0 %v2249_v6  ;;  %3836 = vpow2.f32 %v1751_v18  ;;  %v2667_v6 = vld [vmem:[#allocation4 + $0x28] sm:$0xff] }
 0x4aa   : > { %3838 = vpow2.f32 %v1753_v8  ;;  %v1791_v8 = vld [vmem:[#allocation4 + $0x80] sm:$0xff] }
 0x4ab   : > { %v1868_v9 = vpop.xlane.xlu2 %1867 }
 0x4ac   : > { %v1944_v39 = vadd.f32 %v1868_v9, %v1816_v47 }
 0x4ad   : > { %v2532_v48 = vpop.f32.mrf.mxu0 }
 0x4ae   : > { %1977 = vst.msk [vmem:[#allocation4 + $0x48] sm:$0xff] %vm636_vm1, %v1944_v39 }
 0x4af   : > { %v5332_v45 = vpop.eup %3836 }
 0x4b0   : > { %v5334_v15 = vpop.eup %3838 }
 0x4b1   : > { %1897 = vadd.xlane.f32.xlu0 %v5197_v63  ;;  %v2021_v63 = vld [vmem:[#allocation5 + $0xa8] sm:$0xff] }
 0x4b2   : > { %v2443_v36 = vpop.f32.mrf.mxu3  ;;  %v2213_v44 = vmul.f32 %v5285_v5, %v2021_v63  ;;  %v1642_v63 = vsub.f32 %v5810_v56, %v5299_v34 }
 0x4b3   : > { %v2533_v58 = vadd.f32 %v2532_v48, %v2443_v36  ;;  %v1561_v24 = vpop.permute.xlu2 %1560  ;;  %v5350_v36 = vpop.permute.xlu0 %2174 }
 0x4b4   : > { %v1637_v3 = vsub.f32 %v5806_v57, %v1561_v24  ;;  %v1638_v0 = vsub.f32 %v5807_v51, %v1561_v24  ;;  %v2022_v24 = vld [vmem:[#allocation5 + $0xb0] sm:$0xff] }
 0x4b5   : > { %v2582_v59 = vadd.f32 %v2533_v58, %v2212_v28  ;;  %v2534_v61 = vpop.f32.mrf.mxu0  ;;  %v2662_v28 = vld [vmem:[#allocation4] sm:$0xff]  ;;  %v1823_v58 = vmul.f32 %v4983_v31, %v1791_v8 }
 0x4b6   : > { %v1755_v35 = vmul.f32 1.442695, %v1637_v3  ;;  %v1757_v19 = vmul.f32 1.442695, %v1638_v0  ;;  %v5809_v0 = vld [vmem:[#allocation56_spill] sm:$0xff] }
 0x4b7   : > { %2615 = vst.msk [vmem:[#allocation5 + $0xa0] sm:$0xff] %vm434_vm0, %v2582_v59 }
 0x4b8   : > { %3840 = vpow2.f32 %v1755_v35 }
 0x4b9   : > { %3842 = vpow2.f32 %v1757_v19  ;;  %v2214_v19 = vmul.f32 %v5242_v30, %v2022_v24 }
 0x4ba   : > { %v2445_v20 = vpop.f32.mrf.mxu3  ;;  %3844 = vrcp.f32 %v2667_v6  ;;  %v5811_v6 = vld [vmem:[#allocation52_spill] sm:$0xff] }
 0x4bb   : > { %v2535_v32 = vadd.f32 %v2534_v61, %v2445_v20  ;;  %3846 = vpow2.f32 %v1419_v40  ;;  %v1765_v40 = vmul.f32 1.442695, %v1642_v63  ;;  %v2986_v63 = vld [vmem:[%s4117_s20 + $0x10] sm:$0xff] }
 0x4bc   : > { %3848 = vrcp.f32 %v2662_v28 }
 0x4bd   : > { %v2583_v47 = vadd.f32 %v2535_v32, %v2213_v44  ;;  %v2023_v32 = vld [vmem:[#allocation5 + $0xb8] sm:$0xff] }
 0x4be   : > { %v3841_v9 = vpop.eup %3840  ;;  %1580 = vperm.xlu1 %3666, %v5127_v13   ;;  %v1786_v13 = vld [vmem:[#allocation4 + $0x58] sm:$0xff] }
 0x4bf   : > { %v3843_v33 = vpop.eup %3842  ;;  %2616 = vst.msk [vmem:[#allocation5 + $0xa8] sm:$0xff] %vm434_vm0, %v2583_v47  ;;  %v2250_v54 = vpack.c.bf16 %v3841_v9, %v5332_v45  ;;  %v1818_v23 = vmul.f32 %v5808_v49, %v1786_v13 }
 0x4c0   : > { %v2251_v39 = vpack.c.bf16 %v3843_v33, %v5334_v15  ;;  %v5340_v5 = vadd.f32 %v3843_v33, %v3841_v9  ;;  %v3845_v50 = vpop.eup %3844  ;;  %v5812_v9 = vld [vmem:[#allocation53_spill] sm:$0xff] }
 0x4c1   : > { %2457 = vmatmul.bf16.gmra.mxu3 %v2250_v54  ;;  %v5342_v62 = vpop.eup %3846 }
 0x4c2   : > { %2546 = vmatmul.bf16.gmra.mxu0 %v2251_v39  ;;  %v3849_v35 = vpop.eup %3848 }
 0x4c5   : > { %2785 = vperm.xlu0 %3665, %v3845_v50   ;;  %v2215_v50 = vmul.f32 %v5311_v21, %v2023_v32  ;;  %v1787_v21 = vld [vmem:[#allocation4 + $0x60] sm:$0xff] }
 0x4c6   : > { %2184 = vperm.xlu1 %3666, %v5342_v62  }
 0x4ca   : > { %1885 = vadd.xlane.f32.xlu2 %v5113_v37  ;;  %v1641_v37 = vsub.f32 %v5809_v0, %v5299_v34 }
 0x4cc   : > { %v1763_v31 = vmul.f32 1.442695, %v1641_v37 }
 0x4cd   : > { %v1874_v48 = vpop.xlane.xlu1 %1873 }
 0x4ce   : > { %v1946_v18 = vadd.f32 %v1874_v48, %v1818_v23  ;;  %3850 = vpow2.f32 %v1763_v31  ;;  %v5363_v23 = vpop.permute.xlu2 %2164  ;;  %v5814_v31 = vld [vmem:[#allocation58_spill] sm:$0xff] }
 0x4cf   : > { %3852 = vpow2.f32 %v1765_v40 }
 0x4d0   : > { %1979 = vst.msk [vmem:[#allocation4 + $0x58] sm:$0xff] %vm636_vm1, %v1946_v18 }
 0x4d4   : > { %v5366_v48 = vpop.eup %3850 }
 0x4d5   : > { %v5368_v18 = vpop.eup %3852 }
 0x4db   : > { %v2537_v57 = vpop.f32.mrf.mxu0 }
 0x4de   : > { %v1889_v3 = vpop.xlane.xlu0 %1888 }
 0x4df   : > { %v1951_v51 = vadd.f32 %v1889_v3, %v1823_v58 }
 0x4e0   : > { %v2448_v59 = vpop.f32.mrf.mxu3 }
 0x4e1   : > { %1984 = vst.msk [vmem:[#allocation4 + $0x80] sm:$0xff] %vm636_vm1, %v1951_v51  ;;  %v2538_v61 = vadd.f32 %v2537_v57, %v2448_v59  ;;  %v5813_v51 = vld [vmem:[#allocation60_spill] sm:$0xff]  ;;  %v5381_v59 = vstv %s2950_s17 }
 0x4e2   : > { %2760 = vperm.xlu2 %3664, %v3849_v35  }
 0x4e3   : > { %v2584_v20 = vadd.f32 %v2538_v61, %v2214_v19  ;;  %v2539_v30 = vpop.f32.mrf.mxu0  ;;  %v2670_v19 = vld [vmem:[#allocation4 + $0x40] sm:$0xff] }
 0x4e5   : > { %2617 = vst.msk [vmem:[#allocation5 + $0xb0] sm:$0xff] %vm434_vm0, %v2584_v20  ;;  %v1566_v44 = vpop.permute.xlu1 %1565 }
 0x4e6   : > { %v1639_v47 = vsub.f32 %v5811_v6, %v1566_v44  ;;  %v1640_v33 = vsub.f32 %v5812_v9, %v1566_v44  ;;  %v5815_v44 = vld [vmem:[#allocation59_spill] sm:$0xff] }
 0x4e7   : > { %v2663_v6 = vld [vmem:[#allocation4 + $0x8] sm:$0xff] }
 0x4e8   : > { %v1759_v54 = vmul.f32 1.442695, %v1639_v47  ;;  %v1761_v39 = vmul.f32 1.442695, %v1640_v33  ;;  %v2450_v34 = vpop.f32.mrf.mxu3 }
 0x4e9   : > { %v2540_v13 = vadd.f32 %v2539_v30, %v2450_v34 }
 0x4ea   : > { %3854 = vpow2.f32 %v1759_v54 }
 0x4eb   : > { %3856 = vpow2.f32 %v1761_v39  ;;  %v2585_v49 = vadd.f32 %v2540_v13, %v2215_v50 }
 0x4ec   : > { %3858 = vrcp.f32 %v2670_v19 }
 0x4ed   : > { %2618 = vst.msk [vmem:[#allocation5 + $0xb8] sm:$0xff] %vm434_vm0, %v2585_v49  ;;  %3860 = vrcp.f32 %v2663_v6  ;;  %v5402_v13 = vpop.permute.xlu1 %2169  ;;  %v1789_v49 = vld [vmem:[#allocation4 + $0x70] sm:$0xff]  ;;  %v5819_v6 = vld [vmem:[#allocation62_spill] sm:$0xff] }
 0x4ef   : > { %1906 = vadd.xlane.f32.xlu0 %v5268_v52  ;;  %v1819_v52 = vmul.f32 %v5813_v51, %v1787_v21  ;;  %v1794_v51 = vld [vmem:[#allocation4 + $0x98] sm:$0xff] }
 0x4f0   : > { %v3855_v28 = vpop.eup %3854  ;;  %1891 = vadd.xlane.f32.xlu1 %v5116_v46  ;;  %v2728_v46 = vld [vmem:[#allocation5 + $0x10] sm:$0xff] }
 0x4f1   : > { %v3857_v8 = vpop.eup %3856  ;;  %v5372_v58 = vpop.permute.xlu0 %2189  ;;  %v2252_v24 = vpack.c.bf16 %v5366_v48, %v3855_v28 }
 0x4f2   : > { %v2253_v57 = vpack.c.bf16 %v5368_v18, %v3857_v8  ;;  %v5376_v3 = vadd.f32 %v3857_v8, %v3855_v28  ;;  %v3859_v30 = vpop.eup %3858  ;;  %v5816_v28 = vld [vmem:[#allocation63_spill] sm:$0xff] }
 0x4f3   : > { %2462 = vmatmul.bf16.gmra.mxu3 %v2252_v24  ;;  %v3861_v54 = vpop.eup %3860  ;;  %v1821_v21 = vmul.f32 %v5816_v28, %v1789_v49 }
 0x4f4   : > { %2551 = vmatmul.bf16.gmra.mxu0 %v2253_v57  ;;  %v1877_v0 = vpop.xlane.xlu2 %1876  ;;  %v2665_v57 = vld [vmem:[#allocation4 + $0x18] sm:$0xff] }
 0x4f5   : > { %v1947_v37 = vadd.f32 %v1877_v0, %v1819_v52  ;;  %v5817_v0 = vld [vmem:[#allocation10_spill] sm:$0xff] }
 0x4f7   : > { %1980 = vst.msk [vmem:[#allocation4 + $0x60] sm:$0xff] %vm636_vm1, %v1947_v37  ;;  %v1826_v37 = vmul.f32 %v5817_v0, %v1794_v51  ;;  %v1790_v51 = vld [vmem:[#allocation4 + $0x78] sm:$0xff] }
 0x4f9   : > { %v2771_v35 = vpop.permute.xlu0 %2770 }
 0x4fa   : > { %v2920_v56 = vmul.f32 %v2771_v35, %v2728_v46 }
 0x4fc   : > { %v2954_v61 = vmul.f32 %v5381_v59, %v2920_v56  ;;  %v1576_v20 = vpop.permute.xlu2 %1575 }
 0x4fd   : > { %v1643_v40 = vsub.f32 %v5814_v31, %v1576_v20  ;;  %v1644_v32 = vsub.f32 %v5815_v44, %v1576_v20  ;;  %v5818_v44 = vld [vmem:[#allocation61_spill] sm:$0xff] }
 0x4fe   : > { %v3018_v47 = vadd.f32 %v2986_v63, %v2954_v61 }
 0x4ff   : > { %v1767_v9 = vmul.f32 1.442695, %v1643_v40  ;;  %v1769_v33 = vmul.f32 1.442695, %v1644_v32  ;;  %v2025_v40 = vld [vmem:[#allocation5 + $0xc8] sm:$0xff] }
 0x500   : > { %3050 = vst.msk [vmem:[%s5389_s21 + $0x10] sm:$0xff] %vm434_vm0, %v3018_v47 }
 0x501   : > { %3862 = vpow2.f32 %v1767_v9  ;;  %v1899_v9 = vadd.f32 %v5217_v2, %v5215_v25  ;;  %v2989_v2 = vld [vmem:[%s4117_s20 + $0x28] sm:$0xff] }
 0x502   : > { %3864 = vpow2.f32 %v1769_v33 }
 0x503   : > { %2800 = vperm.xlu0 %3665, %v3859_v30   ;;  %3866 = vrcp.f32 %v2665_v57  ;;  %v2673_v57 = vld [vmem:[#allocation4 + $0x58] sm:$0xff] }
 0x504   : > { %v5416_v28 = vpop.permute.xlu2 %2179 }
 0x507   : > { %v5393_v39 = vpop.eup %3862 }
 0x508   : > { %v5395_v34 = vpop.eup %3864 }
 0x509   : > { %2765 = vperm.xlu1 %3666, %v3861_v54   ;;  %v5399_v50 = vadd.f32 %v5395_v34, %v5393_v39  ;;  %v3867_v52 = vpop.eup %3866 }
 0x50b   : > { %1894 = vadd.xlane.f32.xlu2 %v5169_v29  ;;  %v2024_v29 = vld [vmem:[#allocation5 + $0xc0] sm:$0xff] }
 0x50c   : > { %v2216_v63 = vmul.f32 %v5344_v41, %v2024_v29 }
 0x518   : > { %v1883_v8 = vpop.xlane.xlu1 %1882 }
 0x519   : > { %v1949_v24 = vadd.f32 %v1883_v8, %v1821_v21  ;;  %v2731_v8 = vld [vmem:[#allocation5 + $0x28] sm:$0xff] }
 0x51b   : > { %1982 = vst.msk [vmem:[#allocation4 + $0x70] sm:$0xff] %vm636_vm1, %v1949_v24 }
 0x523   : > { %2775 = vperm.xlu2 %3664, %v3867_v52  }
 0x524   : > { %v1898_v46 = vpop.xlane.xlu0 %1897 }
 0x525   : > { %v1954_v35 = vadd.f32 %v1898_v46, %v1826_v37  ;;  %v5820_v46 = vld [vmem:[#allocation29_spill] sm:$0xff] }
 0x526   : > { %v2542_v19 = vpop.f32.mrf.mxu0 }
 0x527   : > { %1987 = vst.msk [vmem:[#allocation4 + $0x98] sm:$0xff] %vm636_vm1, %v1954_v35  ;;  %v1822_v35 = vmul.f32 %v5820_v46, %v1790_v51  ;;  %v1797_v51 = vld [vmem:[#allocation4 + $0xb0] sm:$0xff] }
 0x52b   : > { %v2453_v56 = vpop.f32.mrf.mxu3 }
 0x52c   : > { %v2543_v61 = vadd.f32 %v2542_v19, %v2453_v56 }
 0x52d   : > { %1915 = vadd.xlane.f32.xlu0 %v5316_v17  ;;  %v2217_v17 = vmul.f32 %v5294_v43, %v2025_v40 }
 0x52e   : > { %v2586_v20 = vadd.f32 %v2543_v61, %v2216_v63  ;;  %v2544_v33 = vpop.f32.mrf.mxu0 }
 0x530   : > { %2619 = vst.msk [vmem:[#allocation5 + $0xc0] sm:$0xff] %vm434_vm0, %v2586_v20  ;;  %v1581_v31 = vpop.permute.xlu1 %1580 }
 0x531   : > { %v1645_v32 = vsub.f32 %v5818_v44, %v1581_v31  ;;  %v1646_v47 = vsub.f32 %v5819_v6, %v1581_v31  ;;  %v2026_v31 = vld [vmem:[#allocation5 + $0xd0] sm:$0xff]  ;;  %v2666_v44 = vld [vmem:[#allocation4 + $0x20] sm:$0xff] }
 0x532   : > { %v2726_v6 = vld [vmem:[#allocation5] sm:$0xff] }
 0x533   : > { %v1771_v30 = vmul.f32 1.442695, %v1645_v32  ;;  %v1773_v54 = vmul.f32 1.442695, %v1646_v47  ;;  %1900 = vadd.xlane.f32.xlu1 %v1899_v9  ;;  %v2455_v41 = vpop.f32.mrf.mxu3  ;;  %v2218_v32 = vmul.f32 %v5363_v23, %v2026_v31  ;;  %v2676_v31 = vld [vmem:[#allocation4 + $0x70] sm:$0xff] }
 0x534   : > { %v2545_v49 = vadd.f32 %v2544_v33, %v2455_v41  ;;  %v2027_v41 = vld [vmem:[#allocation5 + $0xd8] sm:$0xff] }
 0x535   : > { %3868 = vpow2.f32 %v1771_v30  ;;  %v2984_v30 = vld [vmem:[%s4117_s20] sm:$0xff] }
 0x536   : > { %3870 = vpow2.f32 %v1773_v54  ;;  %v2587_v21 = vadd.f32 %v2545_v49, %v2217_v17 }
 0x537   : > { %v2786_v24 = vpop.permute.xlu0 %2785  ;;  %3872 = vrcp.f32 %v2673_v57 }
 0x538   : > { %2620 = vst.msk [vmem:[#allocation5 + $0xc8] sm:$0xff] %vm434_vm0, %v2587_v21  ;;  %v2923_v25 = vmul.f32 %v2786_v24, %v2731_v8  ;;  %3874 = vrcp.f32 %v2666_v44  ;;  %v2219_v8 = vmul.f32 %v5402_v13, %v2027_v41  ;;  %v2985_v41 = vld [vmem:[%s4117_s20 + $0x8] sm:$0xff] }
 0x53a   : > { %v2957_v52 = vmul.f32 %v5381_v59, %v2923_v25  ;;  %v2668_v25 = vld [vmem:[#allocation4 + $0x30] sm:$0xff] }
 0x53b   : > { %v3869_v0 = vpop.eup %3868  ;;  %3876 = vrcp.f32 %v2668_v25 }
 0x53c   : > { %v3871_v43 = vpop.eup %3870  ;;  %v3021_v37 = vadd.f32 %v2989_v2, %v2957_v52  ;;  %v2254_v29 = vpack.c.bf16 %v3869_v0, %v5393_v39  ;;  %v5438_v2 = vpop.permute.xlu1 %2184  ;;  %v1792_v52 = vld [vmem:[#allocation4 + $0x88] sm:$0xff]  ;;  %3878 = vrcp.f32 %v2676_v31 }
 0x53d   : > { %v1886_v19 = vpop.xlane.xlu2 %1885  ;;  %v2255_v56 = vpack.c.bf16 %v3871_v43, %v5395_v34  ;;  %v5424_v63 = vadd.f32 %v3871_v43, %v3869_v0  ;;  %v3873_v20 = vpop.eup %3872  ;;  %v1829_v0 = vmul.f32 %v5134_v10, %v1797_v51  ;;  %v1908_v10 = vadd.f32 %v5260_v38, %v5257_v53  ;;  %v2727_v53 = vld [vmem:[#allocation5 + $0x8] sm:$0xff] }
 0x53e   : > { %3053 = vst.msk [vmem:[%s5389_s21 + $0x28] sm:$0xff] %vm434_vm0, %v3021_v37  ;;  %v1950_v61 = vadd.f32 %v1886_v19, %v1822_v35  ;;  %2467 = vmatmul.bf16.gmra.mxu3 %v2254_v29  ;;  %v3875_v49 = vpop.eup %3874  ;;  %v5821_v37 = vld [vmem:[#allocation11_spill] sm:$0xff] }
 0x53f   : > { %2556 = vmatmul.bf16.gmra.mxu0 %v2255_v56  ;;  %v2547_v40 = vpop.f32.mrf.mxu0  ;;  %v1824_v46 = vmul.f32 %v5821_v37, %v1792_v52  ;;  %v2028_v56 = vld [vmem:[#allocation5 + $0xe0] sm:$0xff]  ;;  %v2729_v52 = vld [vmem:[#allocation5 + $0x18] sm:$0xff] }
 0x540   : > { %1983 = vst.msk [vmem:[#allocation4 + $0x78] sm:$0xff] %vm636_vm1, %v1950_v61  ;;  %v2734_v61 = vld [vmem:[#allocation5 + $0x40] sm:$0xff]  ;;  %v2987_v37 = vld [vmem:[%s4117_s20 + $0x18] sm:$0xff] }
 0x541   : > { %2815 = vperm.xlu0 %3665, %v3873_v20  }
 0x544   : > { %v2458_v39 = vpop.f32.mrf.mxu3 }
 0x545   : > { %v2548_v34 = vadd.f32 %v2547_v40, %v2458_v39  ;;  %v2761_v47 = vpop.permute.xlu2 %2760  ;;  %v2220_v39 = vmul.f32 %v5350_v36, %v2028_v56 }
 0x546   : > { %v2918_v9 = vmul.f32 %v2761_v47, %v2726_v6 }
 0x547   : > { %v2588_v33 = vadd.f32 %v2548_v34, %v2218_v32  ;;  %v2549_v21 = vpop.f32.mrf.mxu0  ;;  %v2992_v32 = vld [vmem:[%s4117_s20 + $0x40] sm:$0xff] }
 0x548   : > { %v2952_v54 = vmul.f32 %v5381_v59, %v2918_v9  ;;  %v1793_v9 = vld [vmem:[#allocation4 + $0x90] sm:$0xff] }
 0x549   : > { %2621 = vst.msk [vmem:[#allocation5 + $0xd0] sm:$0xff] %vm434_vm0, %v2588_v33  ;;  %v2029_v33 = vld [vmem:[#allocation5 + $0xe8] sm:$0xff]  ;;  %v1825_v36 = vmul.f32 %v5102_v4, %v1793_v9  ;;  %v2669_v4 = vld [vmem:[#allocation4 + $0x38] sm:$0xff] }
 0x54a   : > { %v3016_v17 = vadd.f32 %v2984_v30, %v2952_v54  ;;  %3880 = vrcp.f32 %v2669_v4  ;;  %v2672_v4 = vld [vmem:[#allocation4 + $0x50] sm:$0xff] }
 0x54c   : > { %3048 = vst.msk [vmem:[%s5389_s21] sm:$0xff] %vm434_vm0, %v3016_v17  ;;  %1903 = vadd.xlane.f32.xlu2 %v5223_v27  ;;  %2780 = vperm.xlu1 %3666, %v3875_v49   ;;  %v2460_v23 = vpop.f32.mrf.mxu3  ;;  %v3877_v27 = vpop.eup %3876 }
 0x54d   : > { %v2550_v24 = vadd.f32 %v2549_v21, %v2460_v23  ;;  %v3879_v17 = vpop.eup %3878 }
 0x54f   : > { %v2589_v57 = vadd.f32 %v2550_v24, %v2219_v8  ;;  %v2221_v8 = vmul.f32 %v5416_v28, %v2029_v33  ;;  %v2030_v33 = vld [vmem:[#allocation5 + $0xf0] sm:$0xff] }
 0x551   : > { %2622 = vst.msk [vmem:[#allocation5 + $0xd8] sm:$0xff] %vm434_vm0, %v2589_v57 }
 0x562   : > { %v1907_v43 = vpop.xlane.xlu0 %1906 }
 0x563   : > { %v1957_v35 = vadd.f32 %v1907_v43, %v1829_v0  ;;  %v1892_v29 = vpop.xlane.xlu1 %1891 }
 0x564   : > { %v1952_v13 = vadd.f32 %v1892_v29, %v1824_v46  ;;  %2790 = vperm.xlu2 %3664, %v3877_v27   ;;  %v3881_v27 = vpop.eup %3880  ;;  %v1800_v29 = vld [vmem:[#allocation4 + $0xc8] sm:$0xff] }
 0x565   : > { %1990 = vst.msk [vmem:[#allocation4 + $0xb0] sm:$0xff] %vm636_vm1, %v1957_v35  ;;  %v2671_v35 = vld [vmem:[#allocation4 + $0x48] sm:$0xff] }
 0x566   : > { %1985 = vst.msk [vmem:[#allocation4 + $0x88] sm:$0xff] %vm636_vm1, %v1952_v13  ;;  %3882 = vrcp.f32 %v2671_v35  ;;  %v1832_v13 = vmul.f32 %v5177_v7, %v1800_v29  ;;  %v1803_v29 = vld [vmem:[#allocation4 + $0xe0] sm:$0xff] }
 0x56b   : > { %1924 = vadd.xlane.f32.xlu0 %v5376_v3 }
 0x56d   : > { %v2679_v7 = vld [vmem:[#allocation4 + $0x88] sm:$0xff] }
 0x56e   : > { %3884 = vrcp.f32 %v2679_v7  ;;  %v2998_v7 = vld [vmem:[%s4117_s20 + $0x70] sm:$0xff] }
 0x571   : > { %v2552_v19 = vpop.f32.mrf.mxu0 }
 0x575   : > { %v2801_v20 = vpop.permute.xlu0 %2800 }
 0x576   : > { %v2926_v40 = vmul.f32 %v2801_v20, %v2734_v61  ;;  %1909 = vadd.xlane.f32.xlu1 %v1908_v10  ;;  %v2463_v44 = vpop.f32.mrf.mxu3  ;;  %v1795_v10 = vld [vmem:[#allocation4 + $0xa0] sm:$0xff]  ;;  %v3883_v61 = vpop.eup %3882 }
 0x577   : > { %v2553_v34 = vadd.f32 %v2552_v19, %v2463_v44  ;;  %v1827_v20 = vmul.f32 %v5144_v22, %v1795_v10  ;;  %v1796_v22 = vld [vmem:[#allocation4 + $0xa8] sm:$0xff]  ;;  %v3885_v9 = vpop.eup %3884 }
 0x578   : > { %v2960_v6 = vmul.f32 %v5381_v59, %v2926_v40  ;;  %v2737_v40 = vld [vmem:[#allocation5 + $0x58] sm:$0xff] }
 0x579   : > { %v2590_v3 = vadd.f32 %v2553_v34, %v2220_v39  ;;  %v2554_v54 = vpop.f32.mrf.mxu0 }
 0x57a   : > { %v3024_v47 = vadd.f32 %v2992_v32, %v2960_v6  ;;  %v2995_v32 = vld [vmem:[%s4117_s20 + $0x58] sm:$0xff]  ;;  %v1917_v6 = vadd.f32 %v5334_v15, %v5332_v45  ;;  %v2988_v45 = vld [vmem:[%s4117_s20 + $0x20] sm:$0xff] }
 0x57b   : > { %2623 = vst.msk [vmem:[#allocation5 + $0xe0] sm:$0xff] %vm434_vm0, %v2590_v3  ;;  %v2766_v38 = vpop.permute.xlu1 %2765 }
 0x57c   : > { %3056 = vst.msk [vmem:[%s5389_s21 + $0x40] sm:$0xff] %vm434_vm0, %v3024_v47  ;;  %v2919_v30 = vmul.f32 %v2766_v38, %v2727_v53  ;;  %v1828_v38 = vmul.f32 %v5163_v14, %v1796_v22 }
 0x57e   : > { %v2953_v49 = vmul.f32 %v5381_v59, %v2919_v30  ;;  %v1895_v21 = vpop.xlane.xlu2 %1894  ;;  %v2465_v23 = vpop.f32.mrf.mxu3 }
 0x57f   : > { %v1953_v24 = vadd.f32 %v1895_v21, %v1825_v36  ;;  %v2555_v57 = vadd.f32 %v2554_v54, %v2465_v23  ;;  %2830 = vperm.xlu0 %3665, %v3879_v17  }
 0x580   : > { %v3017_v25 = vadd.f32 %v2985_v41, %v2953_v49  ;;  %v2222_v49 = vmul.f32 %v5438_v2, %v2030_v33 }
 0x581   : > { %1986 = vst.msk [vmem:[#allocation4 + $0x90] sm:$0xff] %vm636_vm1, %v1953_v24  ;;  %v2591_v51 = vadd.f32 %v2555_v57, %v2221_v8  ;;  %v2031_v24 = vld [vmem:[#allocation5 + $0xf8] sm:$0xff]  ;;  %v2732_v57 = vld [vmem:[#allocation5 + $0x30] sm:$0xff] }
 0x582   : > { %3049 = vst.msk [vmem:[%s5389_s21 + $0x8] sm:$0xff] %vm434_vm0, %v3017_v25 }
 0x583   : > { %2624 = vst.msk [vmem:[#allocation5 + $0xe8] sm:$0xff] %vm434_vm0, %v2591_v51 }
 0x586   : > { %v2776_v0 = vpop.permute.xlu2 %2775 }
 0x587   : > { %v2921_v43 = vmul.f32 %v2776_v0, %v2729_v52  ;;  %v2990_v0 = vld [vmem:[%s4117_s20 + $0x30] sm:$0xff] }
 0x589   : > { %v2955_v28 = vmul.f32 %v5381_v59, %v2921_v43  ;;  %v2223_v43 = vmul.f32 %v5372_v58, %v2031_v24 }
 0x58b   : > { %v3019_v46 = vadd.f32 %v2987_v37, %v2955_v28 }
 0x58d   : > { %3051 = vst.msk [vmem:[%s5389_s21 + $0x18] sm:$0xff] %vm434_vm0, %v3019_v46  ;;  %1912 = vadd.xlane.f32.xlu2 %v5281_v1 }
 0x58f   : > { %2795 = vperm.xlu1 %3666, %v3881_v27  }
 0x5a0   : > { %v1916_v19 = vpop.xlane.xlu0 %1915 }
 0x5a1   : > { %v1960_v56 = vadd.f32 %v1916_v19, %v1832_v13  ;;  %v2674_v13 = vld [vmem:[#allocation4 + $0x60] sm:$0xff]  ;;  %v1835_v19 = vmul.f32 %v5239_v60, %v1803_v29 }
 0x5a3   : > { %1993 = vst.msk [vmem:[#allocation4 + $0xc8] sm:$0xff] %vm636_vm1, %v1960_v56 }
 0x5a5   : > { %2805 = vperm.xlu2 %3664, %v3883_v61   ;;  %v1798_v61 = vld [vmem:[#allocation4 + $0xb8] sm:$0xff] }
 0x5a6   : > { %v1901_v31 = vpop.xlane.xlu1 %1900 }
 0x5a7   : > { %v1955_v1 = vadd.f32 %v1901_v31, %v1827_v20 }
 0x5a9   : > { %1988 = vst.msk [vmem:[#allocation4 + $0xa0] sm:$0xff] %vm636_vm1, %v1955_v1  ;;  %1933 = vadd.xlane.f32.xlu0 %v5424_v63  ;;  %v2730_v63 = vld [vmem:[#allocation5 + $0x20] sm:$0xff]  ;;  %v2740_v1 = vld [vmem:[#allocation5 + $0x70] sm:$0xff] }
 0x5b0   : > { %v2682_v47 = vld [vmem:[#allocation4 + $0xa0] sm:$0xff] }
 0x5b1   : > { %3886 = vrcp.f32 %v2682_v47 }
 0x5b2   : > { %3888 = vrcp.f32 %v2672_v4 }
 0x5b3   : > { %v2816_v44 = vpop.permute.xlu0 %2815  ;;  %3890 = vrcp.f32 %v2674_v13  ;;  %v3001_v13 = vld [vmem:[%s4117_s20 + $0x88] sm:$0xff] }
 0x5b4   : > { %v2929_v39 = vmul.f32 %v2816_v44, %v2737_v40 }
 0x5b6   : > { %v2963_v34 = vmul.f32 %v5381_v59, %v2929_v39 }
 0x5b7   : > { %v3887_v8 = vpop.eup %3886 }
 0x5b8   : > { %v3027_v3 = vadd.f32 %v2995_v32, %v2963_v34  ;;  %v3889_v35 = vpop.eup %3888 }
 0x5b9   : > { %1918 = vadd.xlane.f32.xlu1 %v1917_v6  ;;  %v3891_v10 = vpop.eup %3890  ;;  %v1799_v6 = vld [vmem:[#allocation4 + $0xc0] sm:$0xff] }
 0x5ba   : > { %3059 = vst.msk [vmem:[%s5389_s21 + $0x58] sm:$0xff] %vm434_vm0, %v3027_v3  ;;  %v1831_v3 = vmul.f32 %v5225_v55, %v1799_v6 }
 0x5bc   : > { %v2557_v30 = vpop.f32.mrf.mxu0 }
 0x5bd   : > { %2845 = vperm.xlu0 %3665, %v3885_v9   ;;  %v2733_v9 = vld [vmem:[#allocation5 + $0x38] sm:$0xff] }
 0x5be   : > { %v2781_v53 = vpop.permute.xlu1 %2780 }
 0x5bf   : > { %v2922_v54 = vmul.f32 %v2781_v53, %v2730_v63  ;;  %v1904_v41 = vpop.xlane.xlu2 %1903 }
 0x5c0   : > { %v1956_v15 = vadd.f32 %v1904_v41, %v1828_v38  ;;  %v2991_v38 = vld [vmem:[%s4117_s20 + $0x38] sm:$0xff]  ;;  %v2993_v41 = vld [vmem:[%s4117_s20 + $0x48] sm:$0xff] }
 0x5c1   : > { %v2956_v36 = vmul.f32 %v5381_v59, %v2922_v54  ;;  %v2468_v17 = vpop.f32.mrf.mxu3 }
 0x5c2   : > { %1989 = vst.msk [vmem:[#allocation4 + $0xa8] sm:$0xff] %vm636_vm1, %v1956_v15  ;;  %v2558_v21 = vadd.f32 %v2557_v30, %v2468_v17 }
 0x5c3   : > { %v3020_v23 = vadd.f32 %v2988_v45, %v2956_v36  ;;  %v2675_v45 = vld [vmem:[#allocation4 + $0x68] sm:$0xff]  ;;  %v2678_v36 = vld [vmem:[#allocation4 + $0x80] sm:$0xff] }
 0x5c4   : > { %v2592_v14 = vadd.f32 %v2558_v21, %v2222_v49  ;;  %v2559_v52 = vpop.f32.mrf.mxu0  ;;  %v1806_v49 = vld [vmem:[#allocation4 + $0xf8] sm:$0xff] }
 0x5c5   : > { %3052 = vst.msk [vmem:[%s5389_s21 + $0x20] sm:$0xff] %vm434_vm0, %v3020_v23  ;;  %2860 = vperm.xlu0 %3665, %v3887_v8   ;;  %v1838_v21 = vmul.f32 %v5288_v11, %v1806_v49  ;;  %v2681_v23 = vld [vmem:[#allocation4 + $0x98] sm:$0xff] }
 0x5c6   : > { %2625 = vst.msk [vmem:[#allocation5 + $0xf0] sm:$0xff] %vm434_vm0, %v2592_v14 }
 0x5c7   : > { %v2791_v25 = vpop.permute.xlu2 %2790 }
 0x5c8   : > { %v2924_v51 = vmul.f32 %v2791_v25, %v2732_v57  ;;  %v2677_v57 = vld [vmem:[#allocation4 + $0x78] sm:$0xff]  ;;  %v2684_v25 = vld [vmem:[#allocation4 + $0xb0] sm:$0xff] }
 0x5c9   : > { %v2470_v2 = vpop.f32.mrf.mxu3 }
 0x5ca   : > { %v2958_v37 = vmul.f32 %v5381_v59, %v2924_v51  ;;  %v2560_v28 = vadd.f32 %v2559_v52, %v2470_v2  ;;  %v1801_v52 = vld [vmem:[#allocation4 + $0xd0] sm:$0xff] }
 0x5cb   : > { %v1833_v11 = vmul.f32 %v5255_v16, %v1801_v52 }
 0x5cc   : > { %v3022_v46 = vadd.f32 %v2990_v0, %v2958_v37  ;;  %v2593_v27 = vadd.f32 %v2560_v28, %v2223_v43  ;;  %v2687_v0 = vld [vmem:[#allocation4 + $0xc8] sm:$0xff] }
 0x5cd   : > { %v2683_v28 = vld [vmem:[#allocation4 + $0xa8] sm:$0xff] }
 0x5ce   : > { %3054 = vst.msk [vmem:[%s5389_s21 + $0x30] sm:$0xff] %vm434_vm0, %v3022_v46  ;;  %1921 = vadd.xlane.f32.xlu2 %v5340_v5  ;;  %v1830_v5 = vmul.f32 %v5192_v12, %v1798_v61  ;;  %v1926_v12 = vadd.f32 %v5368_v18, %v5366_v48  ;;  %v2735_v48 = vld [vmem:[#allocation5 + $0x48] sm:$0xff] }
 0x5cf   : > { %2626 = vst.msk [vmem:[#allocation5 + $0xf8] sm:$0xff] %vm434_vm0, %v2593_v27  ;;  %v2743_v27 = vld [vmem:[#allocation5 + $0x88] sm:$0xff] }
 0x5d2   : > { %2810 = vperm.xlu1 %3666, %v3889_v35  }
 0x5de   : > { %v1925_v58 = vpop.xlane.xlu0 %1924 }
 0x5df   : > { %v1963_v56 = vadd.f32 %v1925_v58, %v1835_v19 }
 0x5e1   : > { %1996 = vst.msk [vmem:[#allocation4 + $0xe0] sm:$0xff] %vm636_vm1, %v1963_v56 }
 0x5e6   : > { %2820 = vperm.xlu2 %3664, %v3891_v10  }
 0x5e8   : > { %v2690_v16 = vld [vmem:[#allocation4 + $0xe0] sm:$0xff] }
 0x5e9   : > { %v1910_v20 = vpop.xlane.xlu1 %1909 }
 0x5ea   : > { %v1958_v31 = vadd.f32 %v1910_v20, %v1830_v5  ;;  %v2746_v20 = vld [vmem:[#allocation5 + $0xa0] sm:$0xff] }
 0x5ec   : > { %1991 = vst.msk [vmem:[#allocation4 + $0xb8] sm:$0xff] %vm636_vm1, %v1958_v31 }
 0x5f1   : > { %v2831_v40 = vpop.permute.xlu0 %2830 }
 0x5f2   : > { %v2932_v44 = vmul.f32 %v2831_v40, %v2740_v1  ;;  %v3004_v40 = vld [vmem:[%s4117_s20 + $0xa0] sm:$0xff] }
 0x5f3   : > { %v2685_v60 = vld [vmem:[#allocation4 + $0xb8] sm:$0xff] }
 0x5f4   : > { %v2966_v39 = vmul.f32 %v5381_v59, %v2932_v44  ;;  %3892 = vrcp.f32 %v2685_v60 }
 0x5f5   : > { %3894 = vrcp.f32 %v2675_v45 }
 0x5f6   : > { %v3030_v32 = vadd.f32 %v2998_v7, %v2966_v39  ;;  %3896 = vrcp.f32 %v2678_v36  ;;  %v1804_v36 = vld [vmem:[#allocation4 + $0xe8] sm:$0xff] }
 0x5f7   : > { %3898 = vrcp.f32 %v2681_v23  ;;  %v1836_v23 = vmul.f32 %v5307_v42, %v1804_v36  ;;  %v3008_v36 = vld [vmem:[%s4117_s20 + $0xc0] sm:$0xff] }
 0x5f8   : > { %3062 = vst.msk [vmem:[%s5389_s21 + $0x70] sm:$0xff] %vm434_vm0, %v3030_v32  ;;  %3900 = vrcp.f32 %v2677_v57 }
 0x5f9   : > { %3902 = vrcp.f32 %v2684_v25 }
 0x5fa   : > { %v3893_v34 = vpop.eup %3892 }
 0x5fb   : > { %2875 = vperm.xlu0 %3665, %v3893_v34   ;;  %v3895_v17 = vpop.eup %3894  ;;  %v1802_v34 = vld [vmem:[#allocation4 + $0xd8] sm:$0xff] }
 0x5fc   : > { %1927 = vadd.xlane.f32.xlu1 %v1926_v12  ;;  %v3897_v8 = vpop.eup %3896  ;;  %v1834_v6 = vmul.f32 %v5283_v26, %v1802_v34  ;;  %v2996_v26 = vld [vmem:[%s4117_s20 + $0x60] sm:$0xff] }
 0x5fd   : > { %v3899_v51 = vpop.eup %3898 }
 0x5fe   : > { %v3901_v4 = vpop.eup %3900 }
 0x5ff   : > { %v3903_v2 = vpop.eup %3902 }
 0x600   : > { %v1913_v22 = vpop.xlane.xlu2 %1912 }
 0x601   : > { %v1959_v47 = vadd.f32 %v1913_v22, %v1831_v3  ;;  %v2796_v63 = vpop.permute.xlu1 %2795 }
 0x602   : > { %v2925_v53 = vmul.f32 %v2796_v63, %v2733_v9  ;;  %v2736_v9 = vld [vmem:[#allocation5 + $0x50] sm:$0xff] }
 0x603   : > { %1992 = vst.msk [vmem:[#allocation4 + $0xc0] sm:$0xff] %vm636_vm1, %v1959_v47 }
 0x604   : > { %v2959_v33 = vmul.f32 %v5381_v59, %v2925_v53 }
 0x606   : > { %v3023_v30 = vadd.f32 %v2991_v38, %v2959_v33  ;;  %v2994_v38 = vld [vmem:[%s4117_s20 + $0x50] sm:$0xff] }
 0x608   : > { %3055 = vst.msk [vmem:[%s5389_s21 + $0x38] sm:$0xff] %vm434_vm0, %v3023_v30  ;;  %v2806_v18 = vpop.permute.xlu2 %2805 }
 0x609   : > { %v2927_v54 = vmul.f32 %v2806_v18, %v2735_v48  ;;  %v2738_v48 = vld [vmem:[#allocation5 + $0x60] sm:$0xff] }
 0x60a   : > { %v2686_v10 = vld [vmem:[#allocation4 + $0xc0] sm:$0xff] }
 0x60b   : > { %v2961_v55 = vmul.f32 %v5381_v59, %v2927_v54 }
 0x60d   : > { %v3025_v15 = vadd.f32 %v2993_v41, %v2961_v55 }
 0x60f   : > { %3057 = vst.msk [vmem:[%s5389_s21 + $0x48] sm:$0xff] %vm434_vm0, %v3025_v15  ;;  %1930 = vadd.xlane.f32.xlu2 %v5399_v50  ;;  %v2680_v50 = vld [vmem:[#allocation4 + $0x90] sm:$0xff] }
 0x610   : > { %3904 = vrcp.f32 %v2680_v50  ;;  %v1805_v50 = vld [vmem:[#allocation4 + $0xf0] sm:$0xff] }
 0x611   : > { %3906 = vrcp.f32 %v2687_v0  ;;  %v1837_v52 = vmul.f32 %v5342_v62, %v1805_v50  ;;  %v2739_v0 = vld [vmem:[#allocation5 + $0x68] sm:$0xff] }
 0x612   : > { %3908 = vrcp.f32 %v2683_v28 }
 0x613   : > { %3910 = vrcp.f32 %v2690_v16 }
 0x615   : > { %2825 = vperm.xlu1 %3666, %v3895_v17   ;;  %v2749_v17 = vld [vmem:[#allocation5 + $0xb8] sm:$0xff] }
 0x616   : > { %v3905_v46 = vpop.eup %3904 }
 0x617   : > { %v3907_v58 = vpop.eup %3906 }
 0x618   : > { %v3909_v61 = vpop.eup %3908 }
 0x619   : > { %v3911_v60 = vpop.eup %3910 }
 0x61c   : > { %v1934_v14 = vpop.xlane.xlu0 %1933 }
 0x61d   : > { %v1966_v24 = vadd.f32 %v1934_v14, %v1838_v21  ;;  %2840 = vperm.xlu1 %3666, %v3897_v8   ;;  %v3007_v8 = vld [vmem:[%s4117_s20 + $0xb8] sm:$0xff] }
 0x61f   : > { %1999 = vst.msk [vmem:[#allocation4 + $0xf8] sm:$0xff] %vm636_vm1, %v1966_v24 }
 0x625   : > { %2855 = vperm.xlu1 %3666, %v3899_v51  }
 0x626   : > { %v2693_v7 = vld [vmem:[#allocation4 + $0xf8] sm:$0xff] }
 0x627   : > { %2835 = vperm.xlu2 %3664, %v3901_v4  }
 0x62c   : > { %v1919_v43 = vpop.xlane.xlu1 %1918 }
 0x62d   : > { %v1961_v37 = vadd.f32 %v1919_v43, %v1833_v11  ;;  %2870 = vperm.xlu1 %3666, %v3903_v2  }
 0x62f   : > { %1994 = vst.msk [vmem:[#allocation4 + $0xd0] sm:$0xff] %vm636_vm1, %v1961_v37  ;;  %2850 = vperm.xlu2 %3664, %v3905_v46   ;;  %v2846_v35 = vpop.permute.xlu0 %2845  ;;  %v2997_v37 = vld [vmem:[%s4117_s20 + $0x68] sm:$0xff] }
 0x630   : > { %v2935_v29 = vmul.f32 %v2846_v35, %v2743_v27  ;;  %v2741_v27 = vld [vmem:[#allocation5 + $0x78] sm:$0xff] }
 0x632   : > { %v2969_v19 = vmul.f32 %v5381_v59, %v2935_v29 }
 0x634   : > { %v3033_v56 = vadd.f32 %v3001_v13, %v2969_v19  ;;  %v2999_v13 = vld [vmem:[%s4117_s20 + $0x78] sm:$0xff] }
 0x635   : > { %2885 = vperm.xlu1 %3666, %v3907_v58   ;;  %v2742_v58 = vld [vmem:[#allocation5 + $0x80] sm:$0xff] }
 0x636   : > { %3065 = vst.msk [vmem:[%s5389_s21 + $0x88] sm:$0xff] %vm434_vm0, %v3033_v56  ;;  %v2688_v5 = vld [vmem:[#allocation4 + $0xd0] sm:$0xff] }
 0x637   : > { %2865 = vperm.xlu2 %3664, %v3909_v61   ;;  %v2861_v31 = vpop.permute.xlu0 %2860  ;;  %3912 = vrcp.f32 %v2688_v5  ;;  %v3000_v61 = vld [vmem:[%s4117_s20 + $0x80] sm:$0xff] }
 0x638   : > { %v2938_v1 = vmul.f32 %v2861_v31, %v2746_v20  ;;  %3914 = vrcp.f32 %v2686_v10  ;;  %v2744_v31 = vld [vmem:[#allocation5 + $0x90] sm:$0xff] }
 0x639   : > { %3916 = vrcp.f32 %v2693_v7  ;;  %v3002_v7 = vld [vmem:[%s4117_s20 + $0x90] sm:$0xff] }
 0x63a   : > { %v2972_v44 = vmul.f32 %v5381_v59, %v2938_v1 }
 0x63c   : > { %v3036_v39 = vadd.f32 %v3004_v40, %v2972_v44 }
 0x63d   : > { %v3913_v32 = vpop.eup %3912  ;;  %2900 = vperm.xlu1 %3666, %v3911_v60  }
 0x63e   : > { %v3915_v12 = vpop.eup %3914  ;;  %3068 = vst.msk [vmem:[%s5389_s21 + $0xa0] sm:$0xff] %vm434_vm0, %v3036_v39  ;;  %2890 = vperm.xlu0 %3665, %v3913_v32   ;;  %v2745_v32 = vld [vmem:[#allocation5 + $0x98] sm:$0xff] }
 0x63f   : > { %2880 = vperm.xlu2 %3664, %v3915_v12   ;;  %v3917_v47 = vpop.eup %3916 }
 0x641   : > { %v1922_v3 = vpop.xlane.xlu2 %1921 }
 0x642   : > { %v1962_v22 = vadd.f32 %v1922_v3, %v1834_v6  ;;  %v3003_v6 = vld [vmem:[%s4117_s20 + $0x98] sm:$0xff] }
 0x644   : > { %1995 = vst.msk [vmem:[#allocation4 + $0xd8] sm:$0xff] %vm636_vm1, %v1962_v22  ;;  %v2811_v63 = vpop.permute.xlu1 %2810 }
 0x645   : > { %v2928_v53 = vmul.f32 %v2811_v63, %v2736_v9  ;;  %2915 = vperm.xlu1 %3666, %v3917_v47   ;;  %v2747_v47 = vld [vmem:[#allocation5 + $0xa8] sm:$0xff] }
 0x647   : > { %v2962_v33 = vmul.f32 %v5381_v59, %v2928_v53  ;;  %v3005_v53 = vld [vmem:[%s4117_s20 + $0xa8] sm:$0xff] }
 0x649   : > { %v3026_v30 = vadd.f32 %v2994_v38, %v2962_v33  ;;  %v2821_v18 = vpop.permute.xlu2 %2820 }
 0x64a   : > { %v2930_v54 = vmul.f32 %v2821_v18, %v2738_v48 }
 0x64b   : > { %3058 = vst.msk [vmem:[%s5389_s21 + $0x50] sm:$0xff] %vm434_vm0, %v3026_v30  ;;  %v2689_v41 = vld [vmem:[#allocation4 + $0xd8] sm:$0xff]  ;;  %v2748_v30 = vld [vmem:[#allocation5 + $0xb0] sm:$0xff] }
 0x64c   : > { %v2964_v55 = vmul.f32 %v5381_v59, %v2930_v54  ;;  %3918 = vrcp.f32 %v2689_v41  ;;  %v3006_v54 = vld [vmem:[%s4117_s20 + $0xb0] sm:$0xff] }
 0x64e   : > { %v3028_v45 = vadd.f32 %v2996_v26, %v2964_v55  ;;  %v2750_v55 = vld [vmem:[#allocation5 + $0xc0] sm:$0xff] }
 0x650   : > { %3060 = vst.msk [vmem:[%s5389_s21 + $0x60] sm:$0xff] %vm434_vm0, %v3028_v45 }
 0x652   : > { %v3919_v15 = vpop.eup %3918 }
 0x653   : > { %2895 = vperm.xlu2 %3664, %v3919_v15  }
 0x66d   : > { %v2876_v49 = vpop.permute.xlu0 %2875 }
 0x66e   : > { %v2941_v21 = vmul.f32 %v2876_v49, %v2749_v17 }
 0x66f   : > { %v1928_v14 = vpop.xlane.xlu1 %1927 }
 0x670   : > { %v2975_v24 = vmul.f32 %v5381_v59, %v2941_v21  ;;  %v1964_v57 = vadd.f32 %v1928_v14, %v1836_v23  ;;  %v2751_v21 = vld [vmem:[#allocation5 + $0xc8] sm:$0xff] }
 0x671   : > { %v3009_v14 = vld [vmem:[%s4117_s20 + $0xc8] sm:$0xff] }
 0x672   : > { %v3039_v25 = vadd.f32 %v3007_v8, %v2975_v24  ;;  %1997 = vst.msk [vmem:[#allocation4 + $0xe8] sm:$0xff] %vm636_vm1, %v1964_v57 }
 0x674   : > { %3071 = vst.msk [vmem:[%s5389_s21 + $0xb8] sm:$0xff] %vm434_vm0, %v3039_v25 }
 0x679   : > { %v2691_v51 = vld [vmem:[#allocation4 + $0xe8] sm:$0xff] }
 0x67a   : > { %3920 = vrcp.f32 %v2691_v51  ;;  %v2753_v51 = vld [vmem:[#allocation5 + $0xd8] sm:$0xff] }
 0x680   : > { %v3921_v4 = vpop.eup %3920 }
 0x681   : > { %2905 = vperm.xlu0 %3665, %v3921_v4   ;;  %v3011_v4 = vld [vmem:[%s4117_s20 + $0xd8] sm:$0xff] }
 0x682   : > { %v1931_v42 = vpop.xlane.xlu2 %1930 }
 0x683   : > { %v1965_v11 = vadd.f32 %v1931_v42, %v1837_v52  ;;  %v2754_v52 = vld [vmem:[#allocation5 + $0xe0] sm:$0xff] }
 0x685   : > { %1998 = vst.msk [vmem:[#allocation4 + $0xf0] sm:$0xff] %vm636_vm1, %v1965_v11 }
 0x687   : > { %v2826_v2 = vpop.permute.xlu1 %2825 }
 0x688   : > { %v2931_v43 = vmul.f32 %v2826_v2, %v2739_v0  ;;  %v2752_v2 = vld [vmem:[#allocation5 + $0xd0] sm:$0xff] }
 0x68a   : > { %v2965_v28 = vmul.f32 %v5381_v59, %v2931_v43  ;;  %v2836_v46 = vpop.permute.xlu2 %2835 }
 0x68b   : > { %v2933_v35 = vmul.f32 %v2836_v46, %v2741_v27 }
 0x68c   : > { %v3029_v29 = vadd.f32 %v2997_v37, %v2965_v28  ;;  %v2692_v19 = vld [vmem:[#allocation4 + $0xf0] sm:$0xff]  ;;  %v3012_v37 = vld [vmem:[%s4117_s20 + $0xe0] sm:$0xff] }
 0x68d   : > { %v2967_v62 = vmul.f32 %v5381_v59, %v2933_v35  ;;  %3922 = vrcp.f32 %v2692_v19  ;;  %v3010_v35 = vld [vmem:[%s4117_s20 + $0xd0] sm:$0xff] }
 0x68e   : > { %3061 = vst.msk [vmem:[%s5389_s21 + $0x68] sm:$0xff] %vm434_vm0, %v3029_v29 }
 0x68f   : > { %v3031_v16 = vadd.f32 %v2999_v13, %v2967_v62  ;;  %v2841_v56 = vpop.permute.xlu1 %2840  ;;  %v2757_v62 = vld [vmem:[#allocation5 + $0xf8] sm:$0xff] }
 0x690   : > { %v2934_v10 = vmul.f32 %v2841_v56, %v2742_v58  ;;  %v3015_v56 = vld [vmem:[%s4117_s20 + $0xf8] sm:$0xff] }
 0x691   : > { %3063 = vst.msk [vmem:[%s5389_s21 + $0x78] sm:$0xff] %vm434_vm0, %v3031_v16 }
 0x692   : > { %v2968_v5 = vmul.f32 %v5381_v59, %v2934_v10  ;;  %v2851_v20 = vpop.permute.xlu2 %2850 }
 0x693   : > { %v3923_v1 = vpop.eup %3922  ;;  %v2936_v40 = vmul.f32 %v2851_v20, %v2744_v31  ;;  %v2756_v20 = vld [vmem:[#allocation5 + $0xf0] sm:$0xff] }
 0x694   : > { %v3032_v44 = vadd.f32 %v3000_v61, %v2968_v5  ;;  %2910 = vperm.xlu2 %3664, %v3923_v1   ;;  %v3014_v1 = vld [vmem:[%s4117_s20 + $0xf0] sm:$0xff] }
 0x695   : > { %v2970_v60 = vmul.f32 %v5381_v59, %v2936_v40 }
 0x696   : > { %3064 = vst.msk [vmem:[%s5389_s21 + $0x80] sm:$0xff] %vm434_vm0, %v3032_v44 }
 0x697   : > { %v3034_v39 = vadd.f32 %v3002_v7, %v2970_v60  ;;  %v2856_v34 = vpop.permute.xlu1 %2855  ;;  %v2755_v7 = vld [vmem:[#allocation5 + $0xe8] sm:$0xff] }
 0x698   : > { %v2937_v12 = vmul.f32 %v2856_v34, %v2745_v32  ;;  %v3013_v32 = vld [vmem:[%s4117_s20 + $0xe8] sm:$0xff]  ;;  %s3945_s20 = scalar_lea.hbm %s5648_s6, 512 }
 0x699   : > { %3066 = vst.msk [vmem:[%s5389_s21 + $0x90] sm:$0xff] %vm434_vm0, %v3034_v39  ;;  %p3947_p2 = scmp.lt.s32.totalorder %s3945_s20, %s3941_s14 }
 0x69a   : > { %v2971_v3 = vmul.f32 %v5381_v59, %v2937_v12  ;;  %v2866_v22 = vpop.permute.xlu2 %2865 }
 0x69b   : > { %v2939_v9 = vmul.f32 %v2866_v22, %v2747_v47  ;;  %p3948_p3 = por %p3947_p2, %p3946_p1 }
 0x69c   : > { %v3035_v63 = vadd.f32 %v3003_v6, %v2971_v3 }
 0x69d   : > { %v2973_v38 = vmul.f32 %v5381_v59, %v2939_v9  ;;  %p3949_p5 = pnand %p3948_p3, %p3944_p0 }
 0x69e   : > { %3067 = vst.msk [vmem:[%s5389_s21 + $0x98] sm:$0xff] %vm434_vm0, %v3035_v63 }
 0x69f   : > { %v3037_v33 = vadd.f32 %v3005_v53, %v2973_v38  ;;  %v2871_v48 = vpop.permute.xlu1 %2870 }
 0x6a0   : > { %v2940_v18 = vmul.f32 %v2871_v48, %v2748_v30 }
 0x6a1   : > { %3069 = vst.msk [vmem:[%s5389_s21 + $0xa8] sm:$0xff] %vm434_vm0, %v3037_v33 }
 0x6a2   : > { %v2974_v26 = vmul.f32 %v5381_v59, %v2940_v18  ;;  %v2881_v41 = vpop.permute.xlu2 %2880 }
 0x6a3   : > { %v2942_v45 = vmul.f32 %v2881_v41, %v2750_v55 }
 0x6a4   : > { %v3038_v15 = vadd.f32 %v3006_v54, %v2974_v26 }
 0x6a5   : > { %v2976_v17 = vmul.f32 %v5381_v59, %v2942_v45 }
 0x6a6   : > { %3070 = vst.msk [vmem:[%s5389_s21 + $0xb0] sm:$0xff] %vm434_vm0, %v3038_v15 }
 0x6a7   : > { %v3040_v49 = vadd.f32 %v3008_v36, %v2976_v17  ;;  %v2886_v23 = vpop.permute.xlu1 %2885 }
 0x6a8   : > { %v2943_v8 = vmul.f32 %v2886_v23, %v2751_v21 }
 0x6a9   : > { %3072 = vst.msk [vmem:[%s5389_s21 + $0xc0] sm:$0xff] %vm434_vm0, %v3040_v49 }
 0x6aa   : > { %v2977_v24 = vmul.f32 %v5381_v59, %v2943_v8 }
 0x6ac   : > { %v3041_v57 = vadd.f32 %v3009_v14, %v2977_v24 }
 0x6ad   : > { %v2896_v25 = vpop.permute.xlu2 %2895 }
 0x6ae   : > { %3073 = vst.msk [vmem:[%s5389_s21 + $0xc8] sm:$0xff] %vm434_vm0, %v3041_v57  ;;  %v2945_v50 = vmul.f32 %v2896_v25, %v2753_v51 }
 0x6af   : > { %v2901_v42 = vpop.permute.xlu1 %2900 }
 0x6b0   : > { %v2979_v11 = vmul.f32 %v5381_v59, %v2945_v50  ;;  %v2946_v0 = vmul.f32 %v2901_v42, %v2754_v52  ;;  %v2891_v43 = vpop.permute.xlu0 %2890 }
 0x6b1   : > { %v2944_v28 = vmul.f32 %v2891_v43, %v2752_v2 }
 0x6b2   : > { %v3043_v46 = vadd.f32 %v3011_v4, %v2979_v11  ;;  %v2980_v27 = vmul.f32 %v5381_v59, %v2946_v0 }
 0x6b3   : > { %v2978_v29 = vmul.f32 %v5381_v59, %v2944_v28 }
 0x6b4   : > { %3075 = vst.msk [vmem:[%s5389_s21 + $0xd8] sm:$0xff] %vm434_vm0, %v3043_v46  ;;  %v3044_v13 = vadd.f32 %v3012_v37, %v2980_v27 }
 0x6b5   : > { %v3042_v19 = vadd.f32 %v3010_v35, %v2978_v29 }
 0x6b6   : > { %3076 = vst.msk [vmem:[%s5389_s21 + $0xe0] sm:$0xff] %vm434_vm0, %v3044_v13 }
 0x6b7   : > { %3074 = vst.msk [vmem:[%s5389_s21 + $0xd0] sm:$0xff] %vm434_vm0, %v3042_v19  ;;  %v2916_v16 = vpop.permute.xlu1 %2915 }
 0x6b8   : > { %v2949_v58 = vmul.f32 %v2916_v16, %v2757_v62 }
 0x6ba   : > { %v2983_v10 = vmul.f32 %v5381_v59, %v2949_v58 }
 0x6bc   : > { %v3047_v61 = vadd.f32 %v3015_v56, %v2983_v10 }
 0x6be   : > { %3079 = vst.msk [vmem:[%s5389_s21 + $0xf8] sm:$0xff] %vm434_vm0, %v3047_v61 }
 0x6ee   : > { %v2911_v5 = vpop.permute.xlu2 %2910 }
 0x6ef   : > { %v2948_v31 = vmul.f32 %v2911_v5, %v2756_v20 }
 0x6f1   : > { %v2982_v40 = vmul.f32 %v5381_v59, %v2948_v31 }
 0x6f3   : > { %v3046_v44 = vadd.f32 %v3014_v1, %v2982_v40  ;;  %v2906_v60 = vpop.permute.xlu0 %2905 }
 0x6f4   : > { %v2947_v39 = vmul.f32 %v2906_v60, %v2755_v7 }
 0x6f5   : > { %3078 = vst.msk [vmem:[%s5389_s21 + $0xf0] sm:$0xff] %vm434_vm0, %v3046_v44 }
 0x6f6   : > { %v2981_v34 = vmul.f32 %v5381_v59, %v2947_v39 }
 0x6f8   : > { %v3045_v12 = vadd.f32 %v3013_v32, %v2981_v34 }
 0x6fa   : > { %3077 = vst.msk [vmem:[%s5389_s21 + $0xe8] sm:$0xff] %vm434_vm0, %v3045_v12 }
 0x6fb   : > { %3952 = shalt.err (!%p3949_p5)
}
 0x6fc   : > { %s4008_s18 = smov 128   ;;  %s4009_s21 = smov 8  }
 0x6fd   : > { %3604 = dma.vmem_to_hbm [thread:$0]  (%p4088_p4), %s3096_s9, 4096, %s3098_s12, %s3081_s26, %s4008_s18, %s4008_s18, %s4009_s21  }
 0x6fe PF: > { %p3610_p6 = scmp.ge.s32.totalorder %s4003_s28, 2  ;;  %s3112_s22 = sand.u32 1, %s3983_s23  }
 0x6ff   : > { %s3113_s0 = scalar_lea.sflag [#allocation8], %s3112_s22 }
 0x700   : > { %p3607_p7 = pnand %p3610_p6, %p4095_p8 }
 0x702   : > { %p3608_p9 = pneg %p3607_p7 }
 0x704   : > { %3978 = dma.done.wait (%p3608_p9), %s3113_s0, 4096  }
 0x705   : > { %3980 = vsyncadd (%p3608_p9), %s3113_s0, 4294963200  ;;  %s20_s28 = sadd.s32 1, %s4003_s28   ;;  %s5822_s23 = smov %s3987_s24 }
 0x706   : > { %p17_p10 = scmp.ge.s32.totalorder %s20_s28, 4   ;;  %s5823_s24 = smov %s3991_s25 }
 0x707   : > { %s5824_s25 = smov %s4101_s11  ;;  %s5825_s26 = smov %s3999_s27 }
 0x708   : > { %s5826_s27 = smov %s5828_s30  ;;  %19 = sbr.rel (!%p17_p10) target bundleno = 6 (0x6), region = 93 }
 0x70d   :  { %3119 = vsyncpa [#allocation8], 1 }
 0x70e   :  { %3121 = vsyncpa [#allocation8 + $0x1], 1 }

</bundles_post_ra>
